<compile_context>
chip_gen: v7x
topology: tpu7x:2x2x1
jax: 0.10.0
libtpu: 0.0.40
codegen_flags: <defaults>
</compile_context>

<pallas_src>
import math
import functools

import jax
import jax.numpy as jnp
from jax.experimental import pallas as pl
from jax.experimental.pallas import tpu as pltpu


# Ordering of the per-layer weight refs passed to the fused layer kernel.
LAYER_KEYS = ("w_q", "w_k", "w_v", "b_q", "b_k", "b_v",
              "w_o", "b_o", "ln1_g", "ln1_b",
              "w1", "b1", "w2", "b2", "ln2_g", "ln2_b")


# ---------------------------------------------------------------------------
# Kernel bodies
# ---------------------------------------------------------------------------

def _layernorm(y, g, b):
    mean = jnp.mean(y, axis=-1, keepdims=True)
    cent = y - mean
    var = jnp.mean(cent * cent, axis=-1, keepdims=True)
    return cent * jax.lax.rsqrt(var + 1e-5) * g + b


def _encoder_layer_body(x, mask_add, p, n_head):
    """One PyTorch nn.TransformerEncoderLayer (batch_first, post-LN, ReLU, eval).

    x: (T, D) f32 value for one sequence; mask_add: (1, T) additive key-padding
    mask; p: dict of weight refs (attention weights pre-split per head on the
    leading axis). Everything stays in VMEM / vregs.
    """
    T, D = x.shape
    Dh = D // n_head
    scale = 1.0 / math.sqrt(Dh)

    attn = jnp.zeros((T, D), jnp.float32)
    for h in range(n_head):                      # static unrolled loop over heads
        q = jnp.dot(x, p["w_q"][h], preferred_element_type=jnp.float32) + p["b_q"][h]
        k = jnp.dot(x, p["w_k"][h], preferred_element_type=jnp.float32) + p["b_k"][h]
        v = jnp.dot(x, p["w_v"][h], preferred_element_type=jnp.float32) + p["b_v"][h]
        # scores = q @ k^T  (contract head_dim of both, no explicit transpose)
        s = jax.lax.dot_general(q, k, (((1,), (1,)), ((), ())),
                                preferred_element_type=jnp.float32) * scale   # (T, T)
        s = s + mask_add                                    # broadcast over queries
        s = s - jnp.max(s, axis=-1, keepdims=True)
        e = jnp.exp(s)
        prob = e / jnp.sum(e, axis=-1, keepdims=True)
        ho = jnp.dot(prob, v, preferred_element_type=jnp.float32)             # (T, Dh)
        # concat(heads) @ W_out  ==  sum_h head_h @ W_out[h*Dh:(h+1)*Dh, :]
        attn = attn + jnp.dot(ho, p["w_o"][h], preferred_element_type=jnp.float32)
    attn = attn + p["b_o"][...]

    h1 = _layernorm(x + attn, p["ln1_g"][...], p["ln1_b"][...])               # norm1
    ff = jnp.dot(h1, p["w1"][...], preferred_element_type=jnp.float32) + p["b1"][...]
    ff = jnp.maximum(ff, 0.0)
    ff = jnp.dot(ff, p["w2"][...], preferred_element_type=jnp.float32) + p["b2"][...]
    return _layernorm(h1 + ff, p["ln2_g"][...], p["ln2_b"][...])              # norm2


def _make_layer_kernel(n_head, fuse_embed):
    def kernel(*refs):
        o_ref = refs[-1]
        if fuse_embed:
            x_ref, pe_ref, emb_w_ref, emb_b_ref, mask_ref = refs[:5]
            wrefs = refs[5:-1]
            # embedding + positional encoding fused (PE broadcast done in-kernel)
            h = jnp.dot(x_ref[...], emb_w_ref[...],
                        preferred_element_type=jnp.float32)
            h = h + emb_b_ref[...] + pe_ref[...]
        else:
            x_ref, mask_ref = refs[:2]
            wrefs = refs[2:-1]
            h = x_ref[...]
        p = dict(zip(LAYER_KEYS, wrefs))
        o_ref[...] = _encoder_layer_body(h, mask_ref[...], p, n_head)
    return kernel


def _pool_fc_kernel(hs_ref, hd_ref, m_ref, inv_ref, fcw_ref, fcb_ref,
                    rs_ref, rd_ref, pred_ref):
    m = m_ref[...]                                   # (1, T) 0/1 valid mask
    inv = inv_ref[...]                               # (1, 1) = 1/seq_len
    rs = jnp.dot(m, hs_ref[...], preferred_element_type=jnp.float32) * inv    # (1, D)
    rd = jnp.dot(m, hd_ref[...], preferred_element_type=jnp.float32) * inv    # (1, D)
    rs_ref[...] = rs
    rd_ref[...] = rd
    logits = jnp.dot(rd, fcw_ref[...], preferred_element_type=jnp.float32) + fcb_ref[...]
    pred_ref[...] = jax.nn.sigmoid(logits)


# ---------------------------------------------------------------------------
# pallas_call wrappers
# ---------------------------------------------------------------------------

def _const_spec(shape):
    """Whole-array block that is identical for every grid step."""
    n = len(shape)
    return pl.BlockSpec(tuple(shape), lambda b, _n=n: (0,) * _n)


def encoder_layer(x3d, mask_add, layer_p, *, n_head, embed=None):
    """Fused transformer encoder layer; one grid step per batch element.

    x3d: (B, T, C_in). If `embed=(pe, emb_w, emb_b)` is given, C_in is the raw
    input_size and the embedding + positional encoding is fused into the same
    kernel; otherwise C_in == d_model.
    """
    B, T, _ = x3d.shape
    D = layer_p["w_o"].shape[-1]

    inputs, in_specs = [], []
    if embed is not None:
        pe, emb_w, emb_b = embed
        C = x3d.shape[2]
        inputs += [x3d, pe, emb_w, emb_b]
        in_specs += [pl.BlockSpec((None, T, C), lambda b: (b, 0, 0)),
                     _const_spec(pe.shape),
                     _const_spec(emb_w.shape),
                     _const_spec(emb_b.shape)]
    else:
        inputs.append(x3d)
        in_specs.append(pl.BlockSpec((None, T, D), lambda b: (b, 0, 0)))

    inputs.append(mask_add)
    in_specs.append(pl.BlockSpec((None, 1, T), lambda b: (b, 0, 0)))

    for kname in LAYER_KEYS:
        arr = layer_p[kname]
        inputs.append(arr)
        in_specs.append(_const_spec(arr.shape))

    return pl.pallas_call(
        _make_layer_kernel(n_head, embed is not None),
        out_shape=jax.ShapeDtypeStruct((B, T, D), jnp.float32),
        grid=(B,),
        in_specs=in_specs,
        out_specs=pl.BlockSpec((None, T, D), lambda b: (b, 0, 0)),
        compiler_params=pltpu.CompilerParams(dimension_semantics=("parallel",)),
    )(*inputs)


def pool_and_classify(h_shared, h_distinct, mask01, inv_len, fc_w, fc_b):
    """Masked mean over valid timesteps for both streams + fc_distinct + sigmoid."""
    B, T, D = h_shared.shape
    NC = fc_w.shape[1]
    rs, rd, pred = pl.pallas_call(
        _pool_fc_kernel,
        out_shape=(jax.ShapeDtypeStruct((B, 1, D), jnp.float32),
                   jax.ShapeDtypeStruct((B, 1, D), jnp.float32),
                   jax.ShapeDtypeStruct((B, 1, NC), jnp.float32)),
        grid=(B,),
        in_specs=[pl.BlockSpec((None, T, D), lambda b: (b, 0, 0)),
                  pl.BlockSpec((None, T, D), lambda b: (b, 0, 0)),
                  pl.BlockSpec((None, 1, T), lambda b: (b, 0, 0)),
                  pl.BlockSpec((None, 1, 1), lambda b: (b, 0, 0)),
                  _const_spec(fc_w.shape),
                  _const_spec(fc_b.shape)],
        out_specs=(pl.BlockSpec((None, 1, D), lambda b: (b, 0, 0)),
                   pl.BlockSpec((None, 1, D), lambda b: (b, 0, 0)),
                   pl.BlockSpec((None, 1, NC), lambda b: (b, 0, 0))),
        compiler_params=pltpu.CompilerParams(dimension_semantics=("parallel",)),
    )(h_shared, h_distinct, mask01, inv_len, fc_w, fc_b)
    return rs.reshape(B, D), rd.reshape(B, D), pred.reshape(B, NC)


# ---------------------------------------------------------------------------
# Weight layout preparation (torch-style packed weights -> per-head slabs)
# ---------------------------------------------------------------------------

def _prep_layer(p, n_head):
    """Split QKV / out-proj weights per head so the kernel only does leading-axis
    ref indexing (no in-kernel lane slicing / concatenation)."""
    D = p["w_out"].shape[0]
    Dh = D // n_head
    w_in, b_in = p["w_in"], p["b_in"]                 # (D, 3D) cols = [q | k | v], (3D,)

    def split_w(mat):                                  # (D, D) -> (H, D, Dh)
        return mat.reshape(D, n_head, Dh).transpose(1, 0, 2)

    def split_b(vec):                                  # (D,) -> (H, 1, Dh)
        return vec.reshape(n_head, Dh)[:, None, :]

    return dict(
        w_q=split_w(w_in[:, :D]), w_k=split_w(w_in[:, D:2 * D]),
        w_v=split_w(w_in[:, 2 * D:]),
        b_q=split_b(b_in[:D]), b_k=split_b(b_in[D:2 * D]), b_v=split_b(b_in[2 * D:]),
        w_o=p["w_out"].reshape(n_head, Dh, D),
        b_o=p["b_out"].reshape(1, D),
        ln1_g=p["ln1_g"].reshape(1, D), ln1_b=p["ln1_b"].reshape(1, D),
        w1=p["w1"], b1=p["b1"].reshape(1, -1),
        w2=p["w2"], b2=p["b2"].reshape(1, -1),
        ln2_g=p["ln2_g"].reshape(1, D), ln2_b=p["ln2_b"].reshape(1, D))


# ---------------------------------------------------------------------------
# Full forward pass
# ---------------------------------------------------------------------------

def ehr_transformer_forward(params, x, seq_lengths, *, n_head):
    """x: (B, input_size, T) like PyTorch (N, C, T); seq_lengths: (B,) int32."""
    B, C, T = x.shape
    D = params["emb_w"].shape[1]

    # x = x.permute(0, 2, 1)  -> token-major layout for the kernels.
    xt = jnp.transpose(x, (0, 2, 1))                                # (B, T, C)
    pe = params["pe"][0, :T, :]                                     # (T, D); broadcast in-kernel

    # TODO(synk): the reference forward body is truncated after pos_encoder; the
    # remainder follows the original DrFuse EHRTransformer: encoder stacks with a
    # key-padding mask built from seq_lengths, masked mean pooling over valid
    # timesteps, and fc_distinct + sigmoid.
    lens = jnp.maximum(seq_lengths.astype(jnp.float32), 1.0)        # guard zero-length
    valid = (jnp.arange(T)[None, :] < seq_lengths[:, None]).astype(jnp.float32)
    mask_add = jnp.where(valid > 0.0, 0.0, -1e9).reshape(B, 1, T).astype(jnp.float32)
    mask01 = valid.reshape(B, 1, T)
    inv_len = (1.0 / lens).reshape(B, 1, 1)

    feat_p = _prep_layer(params["feat"], n_head)
    shared_p = _prep_layer(params["shared"], n_head)
    distinct_p = _prep_layer(params["distinct"], n_head)

    # embedding + positional encoding + feat encoder layer fused into one kernel
    feat = encoder_layer(xt, mask_add, feat_p, n_head=n_head,
                         embed=(pe, params["emb_w"], params["emb_b"].reshape(1, D)))
    h_shared = encoder_layer(feat, mask_add, shared_p, n_head=n_head)
    h_distinct = encoder_layer(feat, mask_add, distinct_p, n_head=n_head)

    return pool_and_classify(h_shared, h_distinct, mask01, inv_len,
                             params["fc_w"], params["fc_b"].reshape(1, -1))


# ---------------------------------------------------------------------------
# Deterministic parameter initialization (synthetic, not a checkpoint)
# ---------------------------------------------------------------------------

def _init_linear(key, fan_in, fan_out):
    k1, k2 = jax.random.split(key)
    bound = 1.0 / math.sqrt(fan_in)
    w = jax.random.uniform(k1, (fan_in, fan_out), jnp.float32, -bound, bound)
    b = jax.random.uniform(k2, (fan_out,), jnp.float32, -bound, bound)
    return w, b


def _init_encoder_layer(key, d_model, dim_ff):
    keys = jax.random.split(key, 4)
    w_in, b_in = _init_linear(keys[0], d_model, 3 * d_model)
    w_out, b_out = _init_linear(keys[1], d_model, d_model)
    w1, b1 = _init_linear(keys[2], d_model, dim_ff)
    w2, b2 = _init_linear(keys[3], dim_ff, d_model)
    return dict(w_in=w_in, b_in=b_in, w_out=w_out, b_out=b_out,
                w1=w1, b1=b1, w2=w2, b2=b2,
                ln1_g=jnp.ones((d_model,), jnp.float32),
                ln1_b=jnp.zeros((d_model,), jnp.float32),
                ln2_g=jnp.ones((d_model,), jnp.float32),
                ln2_b=jnp.zeros((d_model,), jnp.float32))


def init_params(key, input_size, num_classes, d_model, dim_ff, max_len):
    keys = jax.random.split(key, 6)
    emb_w, emb_b = _init_linear(keys[0], input_size, d_model)
    pe = jax.random.uniform(keys[1], (1, max_len, d_model), jnp.float32, -0.1, 0.1)
    fc_w, fc_b = _init_linear(keys[5], d_model, num_classes)
    return dict(emb_w=emb_w, emb_b=emb_b, pe=pe,
                feat=_init_encoder_layer(keys[2], d_model, dim_ff),
                shared=_init_encoder_layer(keys[3], d_model, dim_ff),
                distinct=_init_encoder_layer(keys[4], d_model, dim_ff),
                fc_w=fc_w, fc_b=fc_b)


# ---------------------------------------------------------------------------
# Demo
# ---------------------------------------------------------------------------

if __name__ == "__main__":
    # Small shapes consistent with the module.
    B, input_size, T = 2, 16, 8
    d_model, n_head, num_classes = 32, 4, 3
    dim_ff = 2048            # PyTorch nn.TransformerEncoderLayer default
    max_len = 64             # small max_len for the demo (>= T)

    key = jax.random.PRNGKey(0)
    kp, kx = jax.random.split(key)
    params = init_params(kp, input_size, num_classes, d_model, dim_ff, max_len)

    x = jax.random.normal(kx, (B, input_size, T), jnp.float32)   # (N, C, T) like PyTorch
    seq_lengths = jnp.array([8, 5], dtype=jnp.int32)

    fwd = jax.jit(functools.partial(ehr_transformer_forward, n_head=n_head))
    rep_shared, rep_distinct, pred_distinct = jax.block_until_ready(
        fwd(params, x, seq_lengths))

    assert rep_shared.shape == (B, d_model)
    assert rep_distinct.shape == (B, d_model)
    assert pred_distinct.shape == (B, num_classes)
    assert bool(jnp.all(jnp.isfinite(rep_shared)))
    assert bool(jnp.all(jnp.isfinite(rep_distinct)))
    assert bool(jnp.all((pred_distinct >= 0.0) & (pred_distinct <= 1.0)))

    print("KERNEL_OK")
</pallas_src>

<mosaic_0001>
module attributes {stable_mosaic.version = 11 : i64} {
  func.func @kernel(%arg0: i32, %arg1: memref<1x8x32xf32, #tpu.memory_space<vmem>>, %arg2: memref<1x1x8xf32, #tpu.memory_space<vmem>>, %arg3: memref<4x32x8xf32, #tpu.memory_space<vmem>>, %arg4: memref<4x32x8xf32, #tpu.memory_space<vmem>>, %arg5: memref<4x32x8xf32, #tpu.memory_space<vmem>>, %arg6: memref<4x1x8xf32, #tpu.memory_space<vmem>>, %arg7: memref<4x1x8xf32, #tpu.memory_space<vmem>>, %arg8: memref<4x1x8xf32, #tpu.memory_space<vmem>>, %arg9: memref<4x8x32xf32, #tpu.memory_space<vmem>>, %arg10: memref<1x32xf32, #tpu.memory_space<vmem>>, %arg11: memref<1x32xf32, #tpu.memory_space<vmem>>, %arg12: memref<1x32xf32, #tpu.memory_space<vmem>>, %arg13: memref<32x2048xf32, #tpu.memory_space<vmem>>, %arg14: memref<1x2048xf32, #tpu.memory_space<vmem>>, %arg15: memref<2048x32xf32, #tpu.memory_space<vmem>>, %arg16: memref<1x32xf32, #tpu.memory_space<vmem>>, %arg17: memref<1x32xf32, #tpu.memory_space<vmem>>, %arg18: memref<1x32xf32, #tpu.memory_space<vmem>>, %arg19: memref<1x8x32xf32, #tpu.memory_space<vmem>>) attributes {dimension_semantics = [#tpu.dimension_semantics<parallel>], iteration_bounds = array<i64: 2>, scalar_prefetch = 0 : i64, scratch_operands = 0 : i64, tpu.core_type = #tpu.core_type<tc>, window_params = [{transform_indices = @transform_0, window_bounds = array<i64: 1, 8, 32>}, {transform_indices = @transform_1, window_bounds = array<i64: 1, 1, 8>}, {pipeline_mode = #tpu.pipeline_mode<synchronous>, transform_indices = @transform_2, window_bounds = array<i64: 4, 32, 8>}, {pipeline_mode = #tpu.pipeline_mode<synchronous>, transform_indices = @transform_3, window_bounds = array<i64: 4, 32, 8>}, {pipeline_mode = #tpu.pipeline_mode<synchronous>, transform_indices = @transform_4, window_bounds = array<i64: 4, 32, 8>}, {pipeline_mode = #tpu.pipeline_mode<synchronous>, transform_indices = @transform_5, window_bounds = array<i64: 4, 1, 8>}, {pipeline_mode = #tpu.pipeline_mode<synchronous>, transform_indices = @transform_6, window_bounds = array<i64: 4, 1, 8>}, {pipeline_mode = #tpu.pipeline_mode<synchronous>, transform_indices = @transform_7, window_bounds = array<i64: 4, 1, 8>}, {pipeline_mode = #tpu.pipeline_mode<synchronous>, transform_indices = @transform_8, window_bounds = array<i64: 4, 8, 32>}, {pipeline_mode = #tpu.pipeline_mode<synchronous>, transform_indices = @transform_9, window_bounds = array<i64: 1, 32>}, {pipeline_mode = #tpu.pipeline_mode<synchronous>, transform_indices = @transform_10, window_bounds = array<i64: 1, 32>}, {pipeline_mode = #tpu.pipeline_mode<synchronous>, transform_indices = @transform_11, window_bounds = array<i64: 1, 32>}, {pipeline_mode = #tpu.pipeline_mode<synchronous>, transform_indices = @transform_12, window_bounds = array<i64: 32, 2048>}, {pipeline_mode = #tpu.pipeline_mode<synchronous>, transform_indices = @transform_13, window_bounds = array<i64: 1, 2048>}, {pipeline_mode = #tpu.pipeline_mode<synchronous>, transform_indices = @transform_14, window_bounds = array<i64: 2048, 32>}, {pipeline_mode = #tpu.pipeline_mode<synchronous>, transform_indices = @transform_15, window_bounds = array<i64: 1, 32>}, {pipeline_mode = #tpu.pipeline_mode<synchronous>, transform_indices = @transform_16, window_bounds = array<i64: 1, 32>}, {pipeline_mode = #tpu.pipeline_mode<synchronous>, transform_indices = @transform_17, window_bounds = array<i64: 1, 32>}, {transform_indices = @transform_18, window_bounds = array<i64: 1, 8, 32>}]} {
    %c0 = arith.constant 0 : index
    %c0_0 = arith.constant 0 : index
    %c0_1 = arith.constant 0 : index
    %0 = vector.load %arg1[%c0, %c0_0, %c0_1] : memref<1x8x32xf32, #tpu.memory_space<vmem>>, vector<1x8x32xf32>
    %1 = vector.shape_cast %0 : vector<1x8x32xf32> to vector<8x32xf32>
    %c0_2 = arith.constant 0 : index
    %c0_3 = arith.constant 0 : index
    %c0_4 = arith.constant 0 : index
    %2 = vector.load %arg2[%c0_2, %c0_3, %c0_4] : memref<1x1x8xf32, #tpu.memory_space<vmem>>, vector<1x1x8xf32>
    %3 = vector.shape_cast %2 : vector<1x1x8xf32> to vector<1x8xf32>
    %cst = arith.constant 0.000000e+00 : f32
    %4 = vector.broadcast %cst : f32 to vector<8x32xf32>
    %c0_5 = arith.constant 0 : index
    %c0_6 = arith.constant 0 : index
    %c0_7 = arith.constant 0 : index
    %5 = vector.load %arg3[%c0_5, %c0_6, %c0_7] : memref<4x32x8xf32, #tpu.memory_space<vmem>>, vector<1x32x8xf32>
    %6 = vector.shape_cast %5 : vector<1x32x8xf32> to vector<32x8xf32>
    %cst_8 = arith.constant dense<0.000000e+00> : vector<8x8xf32>
    %7 = tpu.matmul %1, %6, %cst_8 {dimension_numbers = #tpu.dot_dimension_numbers<[1], [0], [0], [1], [0, 0, 1, 1], [], []>} : vector<8x32xf32>, vector<32x8xf32>, vector<8x8xf32> -> vector<8x8xf32>
    %c0_9 = arith.constant 0 : index
    %c0_10 = arith.constant 0 : index
    %c0_11 = arith.constant 0 : index
    %8 = vector.load %arg6[%c0_9, %c0_10, %c0_11] : memref<4x1x8xf32, #tpu.memory_space<vmem>>, vector<1x1x8xf32>
    %9 = vector.shape_cast %8 : vector<1x1x8xf32> to vector<1x8xf32>
    %10 = vector.broadcast %9 : vector<1x8xf32> to vector<8x8xf32>
    %11 = arith.addf %7, %10 : vector<8x8xf32>
    %c0_12 = arith.constant 0 : index
    %c0_13 = arith.constant 0 : index
    %c0_14 = arith.constant 0 : index
    %12 = vector.load %arg4[%c0_12, %c0_13, %c0_14] : memref<4x32x8xf32, #tpu.memory_space<vmem>>, vector<1x32x8xf32>
    %13 = vector.shape_cast %12 : vector<1x32x8xf32> to vector<32x8xf32>
    %cst_15 = arith.constant dense<0.000000e+00> : vector<8x8xf32>
    %14 = tpu.matmul %1, %13, %cst_15 {dimension_numbers = #tpu.dot_dimension_numbers<[1], [0], [0], [1], [0, 0, 1, 1], [], []>} : vector<8x32xf32>, vector<32x8xf32>, vector<8x8xf32> -> vector<8x8xf32>
    %c0_16 = arith.constant 0 : index
    %c0_17 = arith.constant 0 : index
    %c0_18 = arith.constant 0 : index
    %15 = vector.load %arg7[%c0_16, %c0_17, %c0_18] : memref<4x1x8xf32, #tpu.memory_space<vmem>>, vector<1x1x8xf32>
    %16 = vector.shape_cast %15 : vector<1x1x8xf32> to vector<1x8xf32>
    %17 = vector.broadcast %16 : vector<1x8xf32> to vector<8x8xf32>
    %18 = arith.addf %14, %17 : vector<8x8xf32>
    %c0_19 = arith.constant 0 : index
    %c0_20 = arith.constant 0 : index
    %c0_21 = arith.constant 0 : index
    %19 = vector.load %arg5[%c0_19, %c0_20, %c0_21] : memref<4x32x8xf32, #tpu.memory_space<vmem>>, vector<1x32x8xf32>
    %20 = vector.shape_cast %19 : vector<1x32x8xf32> to vector<32x8xf32>
    %cst_22 = arith.constant dense<0.000000e+00> : vector<8x8xf32>
    %21 = tpu.matmul %1, %20, %cst_22 {dimension_numbers = #tpu.dot_dimension_numbers<[1], [0], [0], [1], [0, 0, 1, 1], [], []>} : vector<8x32xf32>, vector<32x8xf32>, vector<8x8xf32> -> vector<8x8xf32>
    %c0_23 = arith.constant 0 : index
    %c0_24 = arith.constant 0 : index
    %c0_25 = arith.constant 0 : index
    %22 = vector.load %arg8[%c0_23, %c0_24, %c0_25] : memref<4x1x8xf32, #tpu.memory_space<vmem>>, vector<1x1x8xf32>
    %23 = vector.shape_cast %22 : vector<1x1x8xf32> to vector<1x8xf32>
    %24 = vector.broadcast %23 : vector<1x8xf32> to vector<8x8xf32>
    %25 = arith.addf %21, %24 : vector<8x8xf32>
    %cst_26 = arith.constant dense<0.000000e+00> : vector<8x8xf32>
    %26 = tpu.matmul %11, %18, %cst_26 {dimension_numbers = #tpu.dot_dimension_numbers<[1], [1], [0], [0], [0, 0, 1, 0], [], []>} : vector<8x8xf32>, vector<8x8xf32>, vector<8x8xf32> -> vector<8x8xf32>
    %cst_27 = arith.constant 0.353553385 : f32
    %27 = vector.broadcast %cst_27 : f32 to vector<8x8xf32>
    %28 = arith.mulf %26, %27 : vector<8x8xf32>
    %29 = vector.broadcast %3 : vector<1x8xf32> to vector<8x8xf32>
    %30 = arith.addf %28, %29 : vector<8x8xf32>
    %cst_28 = arith.constant dense<0xFF800000> : vector<8xf32>
    %31 = vector.multi_reduction <maximumf>, %30, %cst_28 [1] : vector<8x8xf32> to vector<8xf32>
    %32 = vector.shape_cast %31 : vector<8xf32> to vector<8x1xf32>
    %33 = vector.broadcast %32 : vector<8x1xf32> to vector<8x8xf32>
    %34 = arith.subf %30, %33 : vector<8x8xf32>
    %35 = math.exp %34 : vector<8x8xf32>
    %cst_29 = arith.constant dense<0.000000e+00> : vector<8xf32>
    %36 = vector.multi_reduction <add>, %35, %cst_29 [1] : vector<8x8xf32> to vector<8xf32>
    %37 = vector.shape_cast %36 : vector<8xf32> to vector<8x1xf32>
    %38 = vector.broadcast %37 : vector<8x1xf32> to vector<8x8xf32>
    %39 = arith.divf %35, %38 : vector<8x8xf32>
    %cst_30 = arith.constant dense<0.000000e+00> : vector<8x8xf32>
    %40 = tpu.matmul %39, %25, %cst_30 {dimension_numbers = #tpu.dot_dimension_numbers<[1], [0], [0], [1], [0, 0, 1, 1], [], []>} : vector<8x8xf32>, vector<8x8xf32>, vector<8x8xf32> -> vector<8x8xf32>
    %c0_31 = arith.constant 0 : index
    %c0_32 = arith.constant 0 : index
    %c0_33 = arith.constant 0 : index
    %41 = vector.load %arg9[%c0_31, %c0_32, %c0_33] : memref<4x8x32xf32, #tpu.memory_space<vmem>>, vector<1x8x32xf32>
    %42 = vector.shape_cast %41 : vector<1x8x32xf32> to vector<8x32xf32>
    %cst_34 = arith.constant dense<0.000000e+00> : vector<8x32xf32>
    %43 = tpu.matmul %40, %42, %cst_34 {dimension_numbers = #tpu.dot_dimension_numbers<[1], [0], [0], [1], [0, 0, 1, 1], [], []>} : vector<8x8xf32>, vector<8x32xf32>, vector<8x32xf32> -> vector<8x32xf32>
    %44 = arith.addf %4, %43 : vector<8x32xf32>
    %c1 = arith.constant 1 : index
    %c0_35 = arith.constant 0 : index
    %c0_36 = arith.constant 0 : index
    %45 = vector.load %arg3[%c1, %c0_35, %c0_36] : memref<4x32x8xf32, #tpu.memory_space<vmem>>, vector<1x32x8xf32>
    %46 = vector.shape_cast %45 : vector<1x32x8xf32> to vector<32x8xf32>
    %cst_37 = arith.constant dense<0.000000e+00> : vector<8x8xf32>
    %47 = tpu.matmul %1, %46, %cst_37 {dimension_numbers = #tpu.dot_dimension_numbers<[1], [0], [0], [1], [0, 0, 1, 1], [], []>} : vector<8x32xf32>, vector<32x8xf32>, vector<8x8xf32> -> vector<8x8xf32>
    %c1_38 = arith.constant 1 : index
    %c0_39 = arith.constant 0 : index
    %c0_40 = arith.constant 0 : index
    %48 = vector.load %arg6[%c1_38, %c0_39, %c0_40] : memref<4x1x8xf32, #tpu.memory_space<vmem>>, vector<1x1x8xf32>
    %49 = vector.shape_cast %48 : vector<1x1x8xf32> to vector<1x8xf32>
    %50 = vector.broadcast %49 : vector<1x8xf32> to vector<8x8xf32>
    %51 = arith.addf %47, %50 : vector<8x8xf32>
    %c1_41 = arith.constant 1 : index
    %c0_42 = arith.constant 0 : index
    %c0_43 = arith.constant 0 : index
    %52 = vector.load %arg4[%c1_41, %c0_42, %c0_43] : memref<4x32x8xf32, #tpu.memory_space<vmem>>, vector<1x32x8xf32>
    %53 = vector.shape_cast %52 : vector<1x32x8xf32> to vector<32x8xf32>
    %cst_44 = arith.constant dense<0.000000e+00> : vector<8x8xf32>
    %54 = tpu.matmul %1, %53, %cst_44 {dimension_numbers = #tpu.dot_dimension_numbers<[1], [0], [0], [1], [0, 0, 1, 1], [], []>} : vector<8x32xf32>, vector<32x8xf32>, vector<8x8xf32> -> vector<8x8xf32>
    %c1_45 = arith.constant 1 : index
    %c0_46 = arith.constant 0 : index
    %c0_47 = arith.constant 0 : index
    %55 = vector.load %arg7[%c1_45, %c0_46, %c0_47] : memref<4x1x8xf32, #tpu.memory_space<vmem>>, vector<1x1x8xf32>
    %56 = vector.shape_cast %55 : vector<1x1x8xf32> to vector<1x8xf32>
    %57 = vector.broadcast %56 : vector<1x8xf32> to vector<8x8xf32>
    %58 = arith.addf %54, %57 : vector<8x8xf32>
    %c1_48 = arith.constant 1 : index
    %c0_49 = arith.constant 0 : index
    %c0_50 = arith.constant 0 : index
    %59 = vector.load %arg5[%c1_48, %c0_49, %c0_50] : memref<4x32x8xf32, #tpu.memory_space<vmem>>, vector<1x32x8xf32>
    %60 = vector.shape_cast %59 : vector<1x32x8xf32> to vector<32x8xf32>
    %cst_51 = arith.constant dense<0.000000e+00> : vector<8x8xf32>
    %61 = tpu.matmul %1, %60, %cst_51 {dimension_numbers = #tpu.dot_dimension_numbers<[1], [0], [0], [1], [0, 0, 1, 1], [], []>} : vector<8x32xf32>, vector<32x8xf32>, vector<8x8xf32> -> vector<8x8xf32>
    %c1_52 = arith.constant 1 : index
    %c0_53 = arith.constant 0 : index
    %c0_54 = arith.constant 0 : index
    %62 = vector.load %arg8[%c1_52, %c0_53, %c0_54] : memref<4x1x8xf32, #tpu.memory_space<vmem>>, vector<1x1x8xf32>
    %63 = vector.shape_cast %62 : vector<1x1x8xf32> to vector<1x8xf32>
    %64 = vector.broadcast %63 : vector<1x8xf32> to vector<8x8xf32>
    %65 = arith.addf %61, %64 : vector<8x8xf32>
    %cst_55 = arith.constant dense<0.000000e+00> : vector<8x8xf32>
    %66 = tpu.matmul %51, %58, %cst_55 {dimension_numbers = #tpu.dot_dimension_numbers<[1], [1], [0], [0], [0, 0, 1, 0], [], []>} : vector<8x8xf32>, vector<8x8xf32>, vector<8x8xf32> -> vector<8x8xf32>
    %cst_56 = arith.constant 0.353553385 : f32
    %67 = vector.broadcast %cst_56 : f32 to vector<8x8xf32>
    %68 = arith.mulf %66, %67 : vector<8x8xf32>
    %69 = vector.broadcast %3 : vector<1x8xf32> to vector<8x8xf32>
    %70 = arith.addf %68, %69 : vector<8x8xf32>
    %cst_57 = arith.constant dense<0xFF800000> : vector<8xf32>
    %71 = vector.multi_reduction <maximumf>, %70, %cst_57 [1] : vector<8x8xf32> to vector<8xf32>
    %72 = vector.shape_cast %71 : vector<8xf32> to vector<8x1xf32>
    %73 = vector.broadcast %72 : vector<8x1xf32> to vector<8x8xf32>
    %74 = arith.subf %70, %73 : vector<8x8xf32>
    %75 = math.exp %74 : vector<8x8xf32>
    %cst_58 = arith.constant dense<0.000000e+00> : vector<8xf32>
    %76 = vector.multi_reduction <add>, %75, %cst_58 [1] : vector<8x8xf32> to vector<8xf32>
    %77 = vector.shape_cast %76 : vector<8xf32> to vector<8x1xf32>
    %78 = vector.broadcast %77 : vector<8x1xf32> to vector<8x8xf32>
    %79 = arith.divf %75, %78 : vector<8x8xf32>
    %cst_59 = arith.constant dense<0.000000e+00> : vector<8x8xf32>
    %80 = tpu.matmul %79, %65, %cst_59 {dimension_numbers = #tpu.dot_dimension_numbers<[1], [0], [0], [1], [0, 0, 1, 1], [], []>} : vector<8x8xf32>, vector<8x8xf32>, vector<8x8xf32> -> vector<8x8xf32>
    %c1_60 = arith.constant 1 : index
    %c0_61 = arith.constant 0 : index
    %c0_62 = arith.constant 0 : index
    %81 = vector.load %arg9[%c1_60, %c0_61, %c0_62] : memref<4x8x32xf32, #tpu.memory_space<vmem>>, vector<1x8x32xf32>
    %82 = vector.shape_cast %81 : vector<1x8x32xf32> to vector<8x32xf32>
    %cst_63 = arith.constant dense<0.000000e+00> : vector<8x32xf32>
    %83 = tpu.matmul %80, %82, %cst_63 {dimension_numbers = #tpu.dot_dimension_numbers<[1], [0], [0], [1], [0, 0, 1, 1], [], []>} : vector<8x8xf32>, vector<8x32xf32>, vector<8x32xf32> -> vector<8x32xf32>
    %84 = arith.addf %44, %83 : vector<8x32xf32>
    %c2 = arith.constant 2 : index
    %c0_64 = arith.constant 0 : index
    %c0_65 = arith.constant 0 : index
    %85 = vector.load %arg3[%c2, %c0_64, %c0_65] : memref<4x32x8xf32, #tpu.memory_space<vmem>>, vector<1x32x8xf32>
    %86 = vector.shape_cast %85 : vector<1x32x8xf32> to vector<32x8xf32>
    %cst_66 = arith.constant dense<0.000000e+00> : vector<8x8xf32>
    %87 = tpu.matmul %1, %86, %cst_66 {dimension_numbers = #tpu.dot_dimension_numbers<[1], [0], [0], [1], [0, 0, 1, 1], [], []>} : vector<8x32xf32>, vector<32x8xf32>, vector<8x8xf32> -> vector<8x8xf32>
    %c2_67 = arith.constant 2 : index
    %c0_68 = arith.constant 0 : index
    %c0_69 = arith.constant 0 : index
    %88 = vector.load %arg6[%c2_67, %c0_68, %c0_69] : memref<4x1x8xf32, #tpu.memory_space<vmem>>, vector<1x1x8xf32>
    %89 = vector.shape_cast %88 : vector<1x1x8xf32> to vector<1x8xf32>
    %90 = vector.broadcast %89 : vector<1x8xf32> to vector<8x8xf32>
    %91 = arith.addf %87, %90 : vector<8x8xf32>
    %c2_70 = arith.constant 2 : index
    %c0_71 = arith.constant 0 : index
    %c0_72 = arith.constant 0 : index
    %92 = vector.load %arg4[%c2_70, %c0_71, %c0_72] : memref<4x32x8xf32, #tpu.memory_space<vmem>>, vector<1x32x8xf32>
    %93 = vector.shape_cast %92 : vector<1x32x8xf32> to vector<32x8xf32>
    %cst_73 = arith.constant dense<0.000000e+00> : vector<8x8xf32>
    %94 = tpu.matmul %1, %93, %cst_73 {dimension_numbers = #tpu.dot_dimension_numbers<[1], [0], [0], [1], [0, 0, 1, 1], [], []>} : vector<8x32xf32>, vector<32x8xf32>, vector<8x8xf32> -> vector<8x8xf32>
    %c2_74 = arith.constant 2 : index
    %c0_75 = arith.constant 0 : index
    %c0_76 = arith.constant 0 : index
    %95 = vector.load %arg7[%c2_74, %c0_75, %c0_76] : memref<4x1x8xf32, #tpu.memory_space<vmem>>, vector<1x1x8xf32>
    %96 = vector.shape_cast %95 : vector<1x1x8xf32> to vector<1x8xf32>
    %97 = vector.broadcast %96 : vector<1x8xf32> to vector<8x8xf32>
    %98 = arith.addf %94, %97 : vector<8x8xf32>
    %c2_77 = arith.constant 2 : index
    %c0_78 = arith.constant 0 : index
    %c0_79 = arith.constant 0 : index
    %99 = vector.load %arg5[%c2_77, %c0_78, %c0_79] : memref<4x32x8xf32, #tpu.memory_space<vmem>>, vector<1x32x8xf32>
    %100 = vector.shape_cast %99 : vector<1x32x8xf32> to vector<32x8xf32>
    %cst_80 = arith.constant dense<0.000000e+00> : vector<8x8xf32>
    %101 = tpu.matmul %1, %100, %cst_80 {dimension_numbers = #tpu.dot_dimension_numbers<[1], [0], [0], [1], [0, 0, 1, 1], [], []>} : vector<8x32xf32>, vector<32x8xf32>, vector<8x8xf32> -> vector<8x8xf32>
    %c2_81 = arith.constant 2 : index
    %c0_82 = arith.constant 0 : index
    %c0_83 = arith.constant 0 : index
    %102 = vector.load %arg8[%c2_81, %c0_82, %c0_83] : memref<4x1x8xf32, #tpu.memory_space<vmem>>, vector<1x1x8xf32>
    %103 = vector.shape_cast %102 : vector<1x1x8xf32> to vector<1x8xf32>
    %104 = vector.broadcast %103 : vector<1x8xf32> to vector<8x8xf32>
    %105 = arith.addf %101, %104 : vector<8x8xf32>
    %cst_84 = arith.constant dense<0.000000e+00> : vector<8x8xf32>
    %106 = tpu.matmul %91, %98, %cst_84 {dimension_numbers = #tpu.dot_dimension_numbers<[1], [1], [0], [0], [0, 0, 1, 0], [], []>} : vector<8x8xf32>, vector<8x8xf32>, vector<8x8xf32> -> vector<8x8xf32>
    %cst_85 = arith.constant 0.353553385 : f32
    %107 = vector.broadcast %cst_85 : f32 to vector<8x8xf32>
    %108 = arith.mulf %106, %107 : vector<8x8xf32>
    %109 = vector.broadcast %3 : vector<1x8xf32> to vector<8x8xf32>
    %110 = arith.addf %108, %109 : vector<8x8xf32>
    %cst_86 = arith.constant dense<0xFF800000> : vector<8xf32>
    %111 = vector.multi_reduction <maximumf>, %110, %cst_86 [1] : vector<8x8xf32> to vector<8xf32>
    %112 = vector.shape_cast %111 : vector<8xf32> to vector<8x1xf32>
    %113 = vector.broadcast %112 : vector<8x1xf32> to vector<8x8xf32>
    %114 = arith.subf %110, %113 : vector<8x8xf32>
    %115 = math.exp %114 : vector<8x8xf32>
    %cst_87 = arith.constant dense<0.000000e+00> : vector<8xf32>
    %116 = vector.multi_reduction <add>, %115, %cst_87 [1] : vector<8x8xf32> to vector<8xf32>
    %117 = vector.shape_cast %116 : vector<8xf32> to vector<8x1xf32>
    %118 = vector.broadcast %117 : vector<8x1xf32> to vector<8x8xf32>
    %119 = arith.divf %115, %118 : vector<8x8xf32>
    %cst_88 = arith.constant dense<0.000000e+00> : vector<8x8xf32>
    %120 = tpu.matmul %119, %105, %cst_88 {dimension_numbers = #tpu.dot_dimension_numbers<[1], [0], [0], [1], [0, 0, 1, 1], [], []>} : vector<8x8xf32>, vector<8x8xf32>, vector<8x8xf32> -> vector<8x8xf32>
    %c2_89 = arith.constant 2 : index
    %c0_90 = arith.constant 0 : index
    %c0_91 = arith.constant 0 : index
    %121 = vector.load %arg9[%c2_89, %c0_90, %c0_91] : memref<4x8x32xf32, #tpu.memory_space<vmem>>, vector<1x8x32xf32>
    %122 = vector.shape_cast %121 : vector<1x8x32xf32> to vector<8x32xf32>
    %cst_92 = arith.constant dense<0.000000e+00> : vector<8x32xf32>
    %123 = tpu.matmul %120, %122, %cst_92 {dimension_numbers = #tpu.dot_dimension_numbers<[1], [0], [0], [1], [0, 0, 1, 1], [], []>} : vector<8x8xf32>, vector<8x32xf32>, vector<8x32xf32> -> vector<8x32xf32>
    %124 = arith.addf %84, %123 : vector<8x32xf32>
    %c3 = arith.constant 3 : index
    %c0_93 = arith.constant 0 : index
    %c0_94 = arith.constant 0 : index
    %125 = vector.load %arg3[%c3, %c0_93, %c0_94] : memref<4x32x8xf32, #tpu.memory_space<vmem>>, vector<1x32x8xf32>
    %126 = vector.shape_cast %125 : vector<1x32x8xf32> to vector<32x8xf32>
    %cst_95 = arith.constant dense<0.000000e+00> : vector<8x8xf32>
    %127 = tpu.matmul %1, %126, %cst_95 {dimension_numbers = #tpu.dot_dimension_numbers<[1], [0], [0], [1], [0, 0, 1, 1], [], []>} : vector<8x32xf32>, vector<32x8xf32>, vector<8x8xf32> -> vector<8x8xf32>
    %c3_96 = arith.constant 3 : index
    %c0_97 = arith.constant 0 : index
    %c0_98 = arith.constant 0 : index
    %128 = vector.load %arg6[%c3_96, %c0_97, %c0_98] : memref<4x1x8xf32, #tpu.memory_space<vmem>>, vector<1x1x8xf32>
    %129 = vector.shape_cast %128 : vector<1x1x8xf32> to vector<1x8xf32>
    %130 = vector.broadcast %129 : vector<1x8xf32> to vector<8x8xf32>
    %131 = arith.addf %127, %130 : vector<8x8xf32>
    %c3_99 = arith.constant 3 : index
    %c0_100 = arith.constant 0 : index
    %c0_101 = arith.constant 0 : index
    %132 = vector.load %arg4[%c3_99, %c0_100, %c0_101] : memref<4x32x8xf32, #tpu.memory_space<vmem>>, vector<1x32x8xf32>
    %133 = vector.shape_cast %132 : vector<1x32x8xf32> to vector<32x8xf32>
    %cst_102 = arith.constant dense<0.000000e+00> : vector<8x8xf32>
    %134 = tpu.matmul %1, %133, %cst_102 {dimension_numbers = #tpu.dot_dimension_numbers<[1], [0], [0], [1], [0, 0, 1, 1], [], []>} : vector<8x32xf32>, vector<32x8xf32>, vector<8x8xf32> -> vector<8x8xf32>
    %c3_103 = arith.constant 3 : index
    %c0_104 = arith.constant 0 : index
    %c0_105 = arith.constant 0 : index
    %135 = vector.load %arg7[%c3_103, %c0_104, %c0_105] : memref<4x1x8xf32, #tpu.memory_space<vmem>>, vector<1x1x8xf32>
    %136 = vector.shape_cast %135 : vector<1x1x8xf32> to vector<1x8xf32>
    %137 = vector.broadcast %136 : vector<1x8xf32> to vector<8x8xf32>
    %138 = arith.addf %134, %137 : vector<8x8xf32>
    %c3_106 = arith.constant 3 : index
    %c0_107 = arith.constant 0 : index
    %c0_108 = arith.constant 0 : index
    %139 = vector.load %arg5[%c3_106, %c0_107, %c0_108] : memref<4x32x8xf32, #tpu.memory_space<vmem>>, vector<1x32x8xf32>
    %140 = vector.shape_cast %139 : vector<1x32x8xf32> to vector<32x8xf32>
    %cst_109 = arith.constant dense<0.000000e+00> : vector<8x8xf32>
    %141 = tpu.matmul %1, %140, %cst_109 {dimension_numbers = #tpu.dot_dimension_numbers<[1], [0], [0], [1], [0, 0, 1, 1], [], []>} : vector<8x32xf32>, vector<32x8xf32>, vector<8x8xf32> -> vector<8x8xf32>
    %c3_110 = arith.constant 3 : index
    %c0_111 = arith.constant 0 : index
    %c0_112 = arith.constant 0 : index
    %142 = vector.load %arg8[%c3_110, %c0_111, %c0_112] : memref<4x1x8xf32, #tpu.memory_space<vmem>>, vector<1x1x8xf32>
    %143 = vector.shape_cast %142 : vector<1x1x8xf32> to vector<1x8xf32>
    %144 = vector.broadcast %143 : vector<1x8xf32> to vector<8x8xf32>
    %145 = arith.addf %141, %144 : vector<8x8xf32>
    %cst_113 = arith.constant dense<0.000000e+00> : vector<8x8xf32>
    %146 = tpu.matmul %131, %138, %cst_113 {dimension_numbers = #tpu.dot_dimension_numbers<[1], [1], [0], [0], [0, 0, 1, 0], [], []>} : vector<8x8xf32>, vector<8x8xf32>, vector<8x8xf32> -> vector<8x8xf32>
    %cst_114 = arith.constant 0.353553385 : f32
    %147 = vector.broadcast %cst_114 : f32 to vector<8x8xf32>
    %148 = arith.mulf %146, %147 : vector<8x8xf32>
    %149 = vector.broadcast %3 : vector<1x8xf32> to vector<8x8xf32>
    %150 = arith.addf %148, %149 : vector<8x8xf32>
    %cst_115 = arith.constant dense<0xFF800000> : vector<8xf32>
    %151 = vector.multi_reduction <maximumf>, %150, %cst_115 [1] : vector<8x8xf32> to vector<8xf32>
    %152 = vector.shape_cast %151 : vector<8xf32> to vector<8x1xf32>
    %153 = vector.broadcast %152 : vector<8x1xf32> to vector<8x8xf32>
    %154 = arith.subf %150, %153 : vector<8x8xf32>
    %155 = math.exp %154 : vector<8x8xf32>
    %cst_116 = arith.constant dense<0.000000e+00> : vector<8xf32>
    %156 = vector.multi_reduction <add>, %155, %cst_116 [1] : vector<8x8xf32> to vector<8xf32>
    %157 = vector.shape_cast %156 : vector<8xf32> to vector<8x1xf32>
    %158 = vector.broadcast %157 : vector<8x1xf32> to vector<8x8xf32>
    %159 = arith.divf %155, %158 : vector<8x8xf32>
    %cst_117 = arith.constant dense<0.000000e+00> : vector<8x8xf32>
    %160 = tpu.matmul %159, %145, %cst_117 {dimension_numbers = #tpu.dot_dimension_numbers<[1], [0], [0], [1], [0, 0, 1, 1], [], []>} : vector<8x8xf32>, vector<8x8xf32>, vector<8x8xf32> -> vector<8x8xf32>
    %c3_118 = arith.constant 3 : index
    %c0_119 = arith.constant 0 : index
    %c0_120 = arith.constant 0 : index
    %161 = vector.load %arg9[%c3_118, %c0_119, %c0_120] : memref<4x8x32xf32, #tpu.memory_space<vmem>>, vector<1x8x32xf32>
    %162 = vector.shape_cast %161 : vector<1x8x32xf32> to vector<8x32xf32>
    %cst_121 = arith.constant dense<0.000000e+00> : vector<8x32xf32>
    %163 = tpu.matmul %160, %162, %cst_121 {dimension_numbers = #tpu.dot_dimension_numbers<[1], [0], [0], [1], [0, 0, 1, 1], [], []>} : vector<8x8xf32>, vector<8x32xf32>, vector<8x32xf32> -> vector<8x32xf32>
    %164 = arith.addf %124, %163 : vector<8x32xf32>
    %c0_122 = arith.constant 0 : index
    %c0_123 = arith.constant 0 : index
    %165 = vector.load %arg10[%c0_122, %c0_123] : memref<1x32xf32, #tpu.memory_space<vmem>>, vector<1x32xf32>
    %166 = vector.broadcast %165 : vector<1x32xf32> to vector<8x32xf32>
    %167 = arith.addf %164, %166 : vector<8x32xf32>
    %168 = arith.addf %1, %167 : vector<8x32xf32>
    %c0_124 = arith.constant 0 : index
    %c0_125 = arith.constant 0 : index
    %169 = vector.load %arg11[%c0_124, %c0_125] : memref<1x32xf32, #tpu.memory_space<vmem>>, vector<1x32xf32>
    %c0_126 = arith.constant 0 : index
    %c0_127 = arith.constant 0 : index
    %170 = vector.load %arg12[%c0_126, %c0_127] : memref<1x32xf32, #tpu.memory_space<vmem>>, vector<1x32xf32>
    %cst_128 = arith.constant dense<0.000000e+00> : vector<8xf32>
    %171 = vector.multi_reduction <add>, %168, %cst_128 [1] : vector<8x32xf32> to vector<8xf32>
    %172 = vector.shape_cast %171 : vector<8xf32> to vector<8x1xf32>
    %cst_129 = arith.constant 3.200000e+01 : f32
    %173 = vector.broadcast %cst_129 : f32 to vector<8x1xf32>
    %174 = arith.divf %172, %173 : vector<8x1xf32>
    %175 = vector.broadcast %174 : vector<8x1xf32> to vector<8x32xf32>
    %176 = arith.subf %168, %175 : vector<8x32xf32>
    %177 = arith.mulf %176, %176 : vector<8x32xf32>
    %cst_130 = arith.constant dense<0.000000e+00> : vector<8xf32>
    %178 = vector.multi_reduction <add>, %177, %cst_130 [1] : vector<8x32xf32> to vector<8xf32>
    %179 = vector.shape_cast %178 : vector<8xf32> to vector<8x1xf32>
    %cst_131 = arith.constant 3.200000e+01 : f32
    %180 = vector.broadcast %cst_131 : f32 to vector<8x1xf32>
    %181 = arith.divf %179, %180 : vector<8x1xf32>
    %cst_132 = arith.constant 9.99999974E-6 : f32
    %182 = vector.broadcast %cst_132 : f32 to vector<8x1xf32>
    %183 = arith.addf %181, %182 : vector<8x1xf32>
    %184 = math.rsqrt %183 : vector<8x1xf32>
    %185 = vector.broadcast %184 : vector<8x1xf32> to vector<8x32xf32>
    %186 = arith.mulf %176, %185 : vector<8x32xf32>
    %187 = vector.broadcast %169 : vector<1x32xf32> to vector<8x32xf32>
    %188 = arith.mulf %186, %187 : vector<8x32xf32>
    %189 = vector.broadcast %170 : vector<1x32xf32> to vector<8x32xf32>
    %190 = arith.addf %188, %189 : vector<8x32xf32>
    %c0_133 = arith.constant 0 : index
    %c0_134 = arith.constant 0 : index
    %191 = vector.load %arg13[%c0_133, %c0_134] : memref<32x2048xf32, #tpu.memory_space<vmem>>, vector<32x2048xf32>
    %cst_135 = arith.constant dense<0.000000e+00> : vector<8x2048xf32>
    %192 = tpu.matmul %190, %191, %cst_135 {dimension_numbers = #tpu.dot_dimension_numbers<[1], [0], [0], [1], [0, 0, 1, 1], [], []>} : vector<8x32xf32>, vector<32x2048xf32>, vector<8x2048xf32> -> vector<8x2048xf32>
    %c0_136 = arith.constant 0 : index
    %c0_137 = arith.constant 0 : index
    %193 = vector.load %arg14[%c0_136, %c0_137] : memref<1x2048xf32, #tpu.memory_space<vmem>>, vector<1x2048xf32>
    %194 = vector.broadcast %193 : vector<1x2048xf32> to vector<8x2048xf32>
    %195 = arith.addf %192, %194 : vector<8x2048xf32>
    %cst_138 = arith.constant 0.000000e+00 : f32
    %196 = vector.broadcast %cst_138 : f32 to vector<8x2048xf32>
    %197 = arith.maximumf %195, %196 : vector<8x2048xf32>
    %c0_139 = arith.constant 0 : index
    %c0_140 = arith.constant 0 : index
    %198 = vector.load %arg15[%c0_139, %c0_140] : memref<2048x32xf32, #tpu.memory_space<vmem>>, vector<2048x32xf32>
    %cst_141 = arith.constant dense<0.000000e+00> : vector<8x32xf32>
    %199 = tpu.matmul %197, %198, %cst_141 {dimension_numbers = #tpu.dot_dimension_numbers<[1], [0], [0], [1], [0, 0, 1, 1], [], []>} : vector<8x2048xf32>, vector<2048x32xf32>, vector<8x32xf32> -> vector<8x32xf32>
    %c0_142 = arith.constant 0 : index
    %c0_143 = arith.constant 0 : index
    %200 = vector.load %arg16[%c0_142, %c0_143] : memref<1x32xf32, #tpu.memory_space<vmem>>, vector<1x32xf32>
    %201 = vector.broadcast %200 : vector<1x32xf32> to vector<8x32xf32>
    %202 = arith.addf %199, %201 : vector<8x32xf32>
    %203 = arith.addf %190, %202 : vector<8x32xf32>
    %c0_144 = arith.constant 0 : index
    %c0_145 = arith.constant 0 : index
    %204 = vector.load %arg17[%c0_144, %c0_145] : memref<1x32xf32, #tpu.memory_space<vmem>>, vector<1x32xf32>
    %c0_146 = arith.constant 0 : index
    %c0_147 = arith.constant 0 : index
    %205 = vector.load %arg18[%c0_146, %c0_147] : memref<1x32xf32, #tpu.memory_space<vmem>>, vector<1x32xf32>
    %cst_148 = arith.constant dense<0.000000e+00> : vector<8xf32>
    %206 = vector.multi_reduction <add>, %203, %cst_148 [1] : vector<8x32xf32> to vector<8xf32>
    %207 = vector.shape_cast %206 : vector<8xf32> to vector<8x1xf32>
    %cst_149 = arith.constant 3.200000e+01 : f32
    %208 = vector.broadcast %cst_149 : f32 to vector<8x1xf32>
    %209 = arith.divf %207, %208 : vector<8x1xf32>
    %210 = vector.broadcast %209 : vector<8x1xf32> to vector<8x32xf32>
    %211 = arith.subf %203, %210 : vector<8x32xf32>
    %212 = arith.mulf %211, %211 : vector<8x32xf32>
    %cst_150 = arith.constant dense<0.000000e+00> : vector<8xf32>
    %213 = vector.multi_reduction <add>, %212, %cst_150 [1] : vector<8x32xf32> to vector<8xf32>
    %214 = vector.shape_cast %213 : vector<8xf32> to vector<8x1xf32>
    %cst_151 = arith.constant 3.200000e+01 : f32
    %215 = vector.broadcast %cst_151 : f32 to vector<8x1xf32>
    %216 = arith.divf %214, %215 : vector<8x1xf32>
    %cst_152 = arith.constant 9.99999974E-6 : f32
    %217 = vector.broadcast %cst_152 : f32 to vector<8x1xf32>
    %218 = arith.addf %216, %217 : vector<8x1xf32>
    %219 = math.rsqrt %218 : vector<8x1xf32>
    %220 = vector.broadcast %219 : vector<8x1xf32> to vector<8x32xf32>
    %221 = arith.mulf %211, %220 : vector<8x32xf32>
    %222 = vector.broadcast %204 : vector<1x32xf32> to vector<8x32xf32>
    %223 = arith.mulf %221, %222 : vector<8x32xf32>
    %224 = vector.broadcast %205 : vector<1x32xf32> to vector<8x32xf32>
    %225 = arith.addf %223, %224 : vector<8x32xf32>
    %c0_153 = arith.constant 0 : index
    %c0_154 = arith.constant 0 : index
    %c0_155 = arith.constant 0 : index
    %226 = vector.load %arg19[%c0_153, %c0_154, %c0_155] : memref<1x8x32xf32, #tpu.memory_space<vmem>>, vector<1x8x32xf32>
    %227 = vector.shape_cast %226 : vector<1x8x32xf32> to vector<8x32xf32>
    %228 = vector.shape_cast %225 : vector<8x32xf32> to vector<1x8x32xf32>
    tpu.vector_store %arg19[%c0_153, %c0_154, %c0_155], %228 {strides = array<i32>} : memref<1x8x32xf32, #tpu.memory_space<vmem>>, vector<1x8x32xf32>,
    return
  }
  func.func @transform_0(%arg0: i32) -> (i32, i32, i32) {
    %c0_i32 = arith.constant 0 : i32
    %c0_i32_0 = arith.constant 0 : i32
    %c0_i32_1 = arith.constant 0 : i32
    return %arg0, %c0_i32, %c0_i32_0 : i32, i32, i32
  }
  func.func @transform_1(%arg0: i32) -> (i32, i32, i32) {
    %c0_i32 = arith.constant 0 : i32
    %c0_i32_0 = arith.constant 0 : i32
    %c0_i32_1 = arith.constant 0 : i32
    return %arg0, %c0_i32, %c0_i32_0 : i32, i32, i32
  }
  func.func @transform_2(%arg0: i32) -> (i32, i32, i32) {
    %c0_i32 = arith.constant 0 : i32
    %c0_i32_0 = arith.constant 0 : i32
    %c0_i32_1 = arith.constant 0 : i32
    %c0_i32_2 = arith.constant 0 : i32
    return %c0_i32, %c0_i32_0, %c0_i32_1 : i32, i32, i32
  }
  func.func @transform_3(%arg0: i32) -> (i32, i32, i32) {
    %c0_i32 = arith.constant 0 : i32
    %c0_i32_0 = arith.constant 0 : i32
    %c0_i32_1 = arith.constant 0 : i32
    %c0_i32_2 = arith.constant 0 : i32
    return %c0_i32, %c0_i32_0, %c0_i32_1 : i32, i32, i32
  }
  func.func @transform_4(%arg0: i32) -> (i32, i32, i32) {
    %c0_i32 = arith.constant 0 : i32
    %c0_i32_0 = arith.constant 0 : i32
    %c0_i32_1 = arith.constant 0 : i32
    %c0_i32_2 = arith.constant 0 : i32
    return %c0_i32, %c0_i32_0, %c0_i32_1 : i32, i32, i32
  }
  func.func @transform_5(%arg0: i32) -> (i32, i32, i32) {
    %c0_i32 = arith.constant 0 : i32
    %c0_i32_0 = arith.constant 0 : i32
    %c0_i32_1 = arith.constant 0 : i32
    %c0_i32_2 = arith.constant 0 : i32
    return %c0_i32, %c0_i32_0, %c0_i32_1 : i32, i32, i32
  }
  func.func @transform_6(%arg0: i32) -> (i32, i32, i32) {
    %c0_i32 = arith.constant 0 : i32
    %c0_i32_0 = arith.constant 0 : i32
    %c0_i32_1 = arith.constant 0 : i32
    %c0_i32_2 = arith.constant 0 : i32
    return %c0_i32, %c0_i32_0, %c0_i32_1 : i32, i32, i32
  }
  func.func @transform_7(%arg0: i32) -> (i32, i32, i32) {
    %c0_i32 = arith.constant 0 : i32
    %c0_i32_0 = arith.constant 0 : i32
    %c0_i32_1 = arith.constant 0 : i32
    %c0_i32_2 = arith.constant 0 : i32
    return %c0_i32, %c0_i32_0, %c0_i32_1 : i32, i32, i32
  }
  func.func @transform_8(%arg0: i32) -> (i32, i32, i32) {
    %c0_i32 = arith.constant 0 : i32
    %c0_i32_0 = arith.constant 0 : i32
    %c0_i32_1 = arith.constant 0 : i32
    %c0_i32_2 = arith.constant 0 : i32
    return %c0_i32, %c0_i32_0, %c0_i32_1 : i32, i32, i32
  }
  func.func @transform_9(%arg0: i32) -> (i32, i32) {
    %c0_i32 = arith.constant 0 : i32
    %c0_i32_0 = arith.constant 0 : i32
    %c0_i32_1 = arith.constant 0 : i32
    return %c0_i32, %c0_i32_0 : i32, i32
  }
  func.func @transform_10(%arg0: i32) -> (i32, i32) {
    %c0_i32 = arith.constant 0 : i32
    %c0_i32_0 = arith.constant 0 : i32
    %c0_i32_1 = arith.constant 0 : i32
    return %c0_i32, %c0_i32_0 : i32, i32
  }
  func.func @transform_11(%arg0: i32) -> (i32, i32) {
    %c0_i32 = arith.constant 0 : i32
    %c0_i32_0 = arith.constant 0 : i32
    %c0_i32_1 = arith.constant 0 : i32
    return %c0_i32, %c0_i32_0 : i32, i32
  }
  func.func @transform_12(%arg0: i32) -> (i32, i32) {
    %c0_i32 = arith.constant 0 : i32
    %c0_i32_0 = arith.constant 0 : i32
    %c0_i32_1 = arith.constant 0 : i32
    return %c0_i32, %c0_i32_0 : i32, i32
  }
  func.func @transform_13(%arg0: i32) -> (i32, i32) {
    %c0_i32 = arith.constant 0 : i32
    %c0_i32_0 = arith.constant 0 : i32
    %c0_i32_1 = arith.constant 0 : i32
    return %c0_i32, %c0_i32_0 : i32, i32
  }
  func.func @transform_14(%arg0: i32) -> (i32, i32) {
    %c0_i32 = arith.constant 0 : i32
    %c0_i32_0 = arith.constant 0 : i32
    %c0_i32_1 = arith.constant 0 : i32
    return %c0_i32, %c0_i32_0 : i32, i32
  }
  func.func @transform_15(%arg0: i32) -> (i32, i32) {
    %c0_i32 = arith.constant 0 : i32
    %c0_i32_0 = arith.constant 0 : i32
    %c0_i32_1 = arith.constant 0 : i32
    return %c0_i32, %c0_i32_0 : i32, i32
  }
  func.func @transform_16(%arg0: i32) -> (i32, i32) {
    %c0_i32 = arith.constant 0 : i32
    %c0_i32_0 = arith.constant 0 : i32
    %c0_i32_1 = arith.constant 0 : i32
    return %c0_i32, %c0_i32_0 : i32, i32
  }
  func.func @transform_17(%arg0: i32) -> (i32, i32) {
    %c0_i32 = arith.constant 0 : i32
    %c0_i32_0 = arith.constant 0 : i32
    %c0_i32_1 = arith.constant 0 : i32
    return %c0_i32, %c0_i32_0 : i32, i32
  }
  func.func @transform_18(%arg0: i32) -> (i32, i32, i32) {
    %c0_i32 = arith.constant 0 : i32
    %c0_i32_0 = arith.constant 0 : i32
    %c0_i32_1 = arith.constant 0 : i32
    return %arg0, %c0_i32, %c0_i32_0 : i32, i32, i32
  }
}

module attributes {stable_mosaic.version = 11 : i64} {
  func.func @kernel(%arg0: i32, %arg1: memref<1x8x16xf32, #tpu.memory_space<vmem>>, %arg2: memref<8x32xf32, #tpu.memory_space<vmem>>, %arg3: memref<16x32xf32, #tpu.memory_space<vmem>>, %arg4: memref<1x32xf32, #tpu.memory_space<vmem>>, %arg5: memref<1x1x8xf32, #tpu.memory_space<vmem>>, %arg6: memref<4x32x8xf32, #tpu.memory_space<vmem>>, %arg7: memref<4x32x8xf32, #tpu.memory_space<vmem>>, %arg8: memref<4x32x8xf32, #tpu.memory_space<vmem>>, %arg9: memref<4x1x8xf32, #tpu.memory_space<vmem>>, %arg10: memref<4x1x8xf32, #tpu.memory_space<vmem>>, %arg11: memref<4x1x8xf32, #tpu.memory_space<vmem>>, %arg12: memref<4x8x32xf32, #tpu.memory_space<vmem>>, %arg13: memref<1x32xf32, #tpu.memory_space<vmem>>, %arg14: memref<1x32xf32, #tpu.memory_space<vmem>>, %arg15: memref<1x32xf32, #tpu.memory_space<vmem>>, %arg16: memref<32x2048xf32, #tpu.memory_space<vmem>>, %arg17: memref<1x2048xf32, #tpu.memory_space<vmem>>, %arg18: memref<2048x32xf32, #tpu.memory_space<vmem>>, %arg19: memref<1x32xf32, #tpu.memory_space<vmem>>, %arg20: memref<1x32xf32, #tpu.memory_space<vmem>>, %arg21: memref<1x32xf32, #tpu.memory_space<vmem>>, %arg22: memref<1x8x32xf32, #tpu.memory_space<vmem>>) attributes {dimension_semantics = [#tpu.dimension_semantics<parallel>], iteration_bounds = array<i64: 2>, scalar_prefetch = 0 : i64, scratch_operands = 0 : i64, tpu.core_type = #tpu.core_type<tc>, window_params = [{transform_indices = @transform_0, window_bounds = array<i64: 1, 8, 16>}, {pipeline_mode = #tpu.pipeline_mode<synchronous>, transform_indices = @transform_1, window_bounds = array<i64: 8, 32>}, {pipeline_mode = #tpu.pipeline_mode<synchronous>, transform_indices = @transform_2, window_bounds = array<i64: 16, 32>}, {pipeline_mode = #tpu.pipeline_mode<synchronous>, transform_indices = @transform_3, window_bounds = array<i64: 1, 32>}, {transform_indices = @transform_4, window_bounds = array<i64: 1, 1, 8>}, {pipeline_mode = #tpu.pipeline_mode<synchronous>, transform_indices = @transform_5, window_bounds = array<i64: 4, 32, 8>}, {pipeline_mode = #tpu.pipeline_mode<synchronous>, transform_indices = @transform_6, window_bounds = array<i64: 4, 32, 8>}, {pipeline_mode = #tpu.pipeline_mode<synchronous>, transform_indices = @transform_7, window_bounds = array<i64: 4, 32, 8>}, {pipeline_mode = #tpu.pipeline_mode<synchronous>, transform_indices = @transform_8, window_bounds = array<i64: 4, 1, 8>}, {pipeline_mode = #tpu.pipeline_mode<synchronous>, transform_indices = @transform_9, window_bounds = array<i64: 4, 1, 8>}, {pipeline_mode = #tpu.pipeline_mode<synchronous>, transform_indices = @transform_10, window_bounds = array<i64: 4, 1, 8>}, {pipeline_mode = #tpu.pipeline_mode<synchronous>, transform_indices = @transform_11, window_bounds = array<i64: 4, 8, 32>}, {pipeline_mode = #tpu.pipeline_mode<synchronous>, transform_indices = @transform_12, window_bounds = array<i64: 1, 32>}, {pipeline_mode = #tpu.pipeline_mode<synchronous>, transform_indices = @transform_13, window_bounds = array<i64: 1, 32>}, {pipeline_mode = #tpu.pipeline_mode<synchronous>, transform_indices = @transform_14, window_bounds = array<i64: 1, 32>}, {pipeline_mode = #tpu.pipeline_mode<synchronous>, transform_indices = @transform_15, window_bounds = array<i64: 32, 2048>}, {pipeline_mode = #tpu.pipeline_mode<synchronous>, transform_indices = @transform_16, window_bounds = array<i64: 1, 2048>}, {pipeline_mode = #tpu.pipeline_mode<synchronous>, transform_indices = @transform_17, window_bounds = array<i64: 2048, 32>}, {pipeline_mode = #tpu.pipeline_mode<synchronous>, transform_indices = @transform_18, window_bounds = array<i64: 1, 32>}, {pipeline_mode = #tpu.pipeline_mode<synchronous>, transform_indices = @transform_19, window_bounds = array<i64: 1, 32>}, {pipeline_mode = #tpu.pipeline_mode<synchronous>, transform_indices = @transform_20, window_bounds = array<i64: 1, 32>}, {transform_indices = @transform_21, window_bounds = array<i64: 1, 8, 32>}]} {
    %c0 = arith.constant 0 : index
    %c0_0 = arith.constant 0 : index
    %c0_1 = arith.constant 0 : index
    %0 = vector.load %arg1[%c0, %c0_0, %c0_1] : memref<1x8x16xf32, #tpu.memory_space<vmem>>, vector<1x8x16xf32>
    %1 = vector.shape_cast %0 : vector<1x8x16xf32> to vector<8x16xf32>
    %c0_2 = arith.constant 0 : index
    %c0_3 = arith.constant 0 : index
    %2 = vector.load %arg3[%c0_2, %c0_3] : memref<16x32xf32, #tpu.memory_space<vmem>>, vector<16x32xf32>
    %cst = arith.constant dense<0.000000e+00> : vector<8x32xf32>
    %3 = tpu.matmul %1, %2, %cst {dimension_numbers = #tpu.dot_dimension_numbers<[1], [0], [0], [1], [0, 0, 1, 1], [], []>} : vector<8x16xf32>, vector<16x32xf32>, vector<8x32xf32> -> vector<8x32xf32>
    %c0_4 = arith.constant 0 : index
    %c0_5 = arith.constant 0 : index
    %4 = vector.load %arg4[%c0_4, %c0_5] : memref<1x32xf32, #tpu.memory_space<vmem>>, vector<1x32xf32>
    %5 = vector.broadcast %4 : vector<1x32xf32> to vector<8x32xf32>
    %6 = arith.addf %3, %5 : vector<8x32xf32>
    %c0_6 = arith.constant 0 : index
    %c0_7 = arith.constant 0 : index
    %7 = vector.load %arg2[%c0_6, %c0_7] : memref<8x32xf32, #tpu.memory_space<vmem>>, vector<8x32xf32>
    %8 = arith.addf %6, %7 : vector<8x32xf32>
    %c0_8 = arith.constant 0 : index
    %c0_9 = arith.constant 0 : index
    %c0_10 = arith.constant 0 : index
    %9 = vector.load %arg5[%c0_8, %c0_9, %c0_10] : memref<1x1x8xf32, #tpu.memory_space<vmem>>, vector<1x1x8xf32>
    %10 = vector.shape_cast %9 : vector<1x1x8xf32> to vector<1x8xf32>
    %cst_11 = arith.constant 0.000000e+00 : f32
    %11 = vector.broadcast %cst_11 : f32 to vector<8x32xf32>
    %c0_12 = arith.constant 0 : index
    %c0_13 = arith.constant 0 : index
    %c0_14 = arith.constant 0 : index
    %12 = vector.load %arg6[%c0_12, %c0_13, %c0_14] : memref<4x32x8xf32, #tpu.memory_space<vmem>>, vector<1x32x8xf32>
    %13 = vector.shape_cast %12 : vector<1x32x8xf32> to vector<32x8xf32>
    %cst_15 = arith.constant dense<0.000000e+00> : vector<8x8xf32>
    %14 = tpu.matmul %8, %13, %cst_15 {dimension_numbers = #tpu.dot_dimension_numbers<[1], [0], [0], [1], [0, 0, 1, 1], [], []>} : vector<8x32xf32>, vector<32x8xf32>, vector<8x8xf32> -> vector<8x8xf32>
    %c0_16 = arith.constant 0 : index
    %c0_17 = arith.constant 0 : index
    %c0_18 = arith.constant 0 : index
    %15 = vector.load %arg9[%c0_16, %c0_17, %c0_18] : memref<4x1x8xf32, #tpu.memory_space<vmem>>, vector<1x1x8xf32>
    %16 = vector.shape_cast %15 : vector<1x1x8xf32> to vector<1x8xf32>
    %17 = vector.broadcast %16 : vector<1x8xf32> to vector<8x8xf32>
    %18 = arith.addf %14, %17 : vector<8x8xf32>
    %c0_19 = arith.constant 0 : index
    %c0_20 = arith.constant 0 : index
    %c0_21 = arith.constant 0 : index
    %19 = vector.load %arg7[%c0_19, %c0_20, %c0_21] : memref<4x32x8xf32, #tpu.memory_space<vmem>>, vector<1x32x8xf32>
    %20 = vector.shape_cast %19 : vector<1x32x8xf32> to vector<32x8xf32>
    %cst_22 = arith.constant dense<0.000000e+00> : vector<8x8xf32>
    %21 = tpu.matmul %8, %20, %cst_22 {dimension_numbers = #tpu.dot_dimension_numbers<[1], [0], [0], [1], [0, 0, 1, 1], [], []>} : vector<8x32xf32>, vector<32x8xf32>, vector<8x8xf32> -> vector<8x8xf32>
    %c0_23 = arith.constant 0 : index
    %c0_24 = arith.constant 0 : index
    %c0_25 = arith.constant 0 : index
    %22 = vector.load %arg10[%c0_23, %c0_24, %c0_25] : memref<4x1x8xf32, #tpu.memory_space<vmem>>, vector<1x1x8xf32>
    %23 = vector.shape_cast %22 : vector<1x1x8xf32> to vector<1x8xf32>
    %24 = vector.broadcast %23 : vector<1x8xf32> to vector<8x8xf32>
    %25 = arith.addf %21, %24 : vector<8x8xf32>
    %c0_26 = arith.constant 0 : index
    %c0_27 = arith.constant 0 : index
    %c0_28 = arith.constant 0 : index
    %26 = vector.load %arg8[%c0_26, %c0_27, %c0_28] : memref<4x32x8xf32, #tpu.memory_space<vmem>>, vector<1x32x8xf32>
    %27 = vector.shape_cast %26 : vector<1x32x8xf32> to vector<32x8xf32>
    %cst_29 = arith.constant dense<0.000000e+00> : vector<8x8xf32>
    %28 = tpu.matmul %8, %27, %cst_29 {dimension_numbers = #tpu.dot_dimension_numbers<[1], [0], [0], [1], [0, 0, 1, 1], [], []>} : vector<8x32xf32>, vector<32x8xf32>, vector<8x8xf32> -> vector<8x8xf32>
    %c0_30 = arith.constant 0 : index
    %c0_31 = arith.constant 0 : index
    %c0_32 = arith.constant 0 : index
    %29 = vector.load %arg11[%c0_30, %c0_31, %c0_32] : memref<4x1x8xf32, #tpu.memory_space<vmem>>, vector<1x1x8xf32>
    %30 = vector.shape_cast %29 : vector<1x1x8xf32> to vector<1x8xf32>
    %31 = vector.broadcast %30 : vector<1x8xf32> to vector<8x8xf32>
    %32 = arith.addf %28, %31 : vector<8x8xf32>
    %cst_33 = arith.constant dense<0.000000e+00> : vector<8x8xf32>
    %33 = tpu.matmul %18, %25, %cst_33 {dimension_numbers = #tpu.dot_dimension_numbers<[1], [1], [0], [0], [0, 0, 1, 0], [], []>} : vector<8x8xf32>, vector<8x8xf32>, vector<8x8xf32> -> vector<8x8xf32>
    %cst_34 = arith.constant 0.353553385 : f32
    %34 = vector.broadcast %cst_34 : f32 to vector<8x8xf32>
    %35 = arith.mulf %33, %34 : vector<8x8xf32>
    %36 = vector.broadcast %10 : vector<1x8xf32> to vector<8x8xf32>
    %37 = arith.addf %35, %36 : vector<8x8xf32>
    %cst_35 = arith.constant dense<0xFF800000> : vector<8xf32>
    %38 = vector.multi_reduction <maximumf>, %37, %cst_35 [1] : vector<8x8xf32> to vector<8xf32>
    %39 = vector.shape_cast %38 : vector<8xf32> to vector<8x1xf32>
    %40 = vector.broadcast %39 : vector<8x1xf32> to vector<8x8xf32>
    %41 = arith.subf %37, %40 : vector<8x8xf32>
    %42 = math.exp %41 : vector<8x8xf32>
    %cst_36 = arith.constant dense<0.000000e+00> : vector<8xf32>
    %43 = vector.multi_reduction <add>, %42, %cst_36 [1] : vector<8x8xf32> to vector<8xf32>
    %44 = vector.shape_cast %43 : vector<8xf32> to vector<8x1xf32>
    %45 = vector.broadcast %44 : vector<8x1xf32> to vector<8x8xf32>
    %46 = arith.divf %42, %45 : vector<8x8xf32>
    %cst_37 = arith.constant dense<0.000000e+00> : vector<8x8xf32>
    %47 = tpu.matmul %46, %32, %cst_37 {dimension_numbers = #tpu.dot_dimension_numbers<[1], [0], [0], [1], [0, 0, 1, 1], [], []>} : vector<8x8xf32>, vector<8x8xf32>, vector<8x8xf32> -> vector<8x8xf32>
    %c0_38 = arith.constant 0 : index
    %c0_39 = arith.constant 0 : index
    %c0_40 = arith.constant 0 : index
    %48 = vector.load %arg12[%c0_38, %c0_39, %c0_40] : memref<4x8x32xf32, #tpu.memory_space<vmem>>, vector<1x8x32xf32>
    %49 = vector.shape_cast %48 : vector<1x8x32xf32> to vector<8x32xf32>
    %cst_41 = arith.constant dense<0.000000e+00> : vector<8x32xf32>
    %50 = tpu.matmul %47, %49, %cst_41 {dimension_numbers = #tpu.dot_dimension_numbers<[1], [0], [0], [1], [0, 0, 1, 1], [], []>} : vector<8x8xf32>, vector<8x32xf32>, vector<8x32xf32> -> vector<8x32xf32>
    %51 = arith.addf %11, %50 : vector<8x32xf32>
    %c1 = arith.constant 1 : index
    %c0_42 = arith.constant 0 : index
    %c0_43 = arith.constant 0 : index
    %52 = vector.load %arg6[%c1, %c0_42, %c0_43] : memref<4x32x8xf32, #tpu.memory_space<vmem>>, vector<1x32x8xf32>
    %53 = vector.shape_cast %52 : vector<1x32x8xf32> to vector<32x8xf32>
    %cst_44 = arith.constant dense<0.000000e+00> : vector<8x8xf32>
    %54 = tpu.matmul %8, %53, %cst_44 {dimension_numbers = #tpu.dot_dimension_numbers<[1], [0], [0], [1], [0, 0, 1, 1], [], []>} : vector<8x32xf32>, vector<32x8xf32>, vector<8x8xf32> -> vector<8x8xf32>
    %c1_45 = arith.constant 1 : index
    %c0_46 = arith.constant 0 : index
    %c0_47 = arith.constant 0 : index
    %55 = vector.load %arg9[%c1_45, %c0_46, %c0_47] : memref<4x1x8xf32, #tpu.memory_space<vmem>>, vector<1x1x8xf32>
    %56 = vector.shape_cast %55 : vector<1x1x8xf32> to vector<1x8xf32>
    %57 = vector.broadcast %56 : vector<1x8xf32> to vector<8x8xf32>
    %58 = arith.addf %54, %57 : vector<8x8xf32>
    %c1_48 = arith.constant 1 : index
    %c0_49 = arith.constant 0 : index
    %c0_50 = arith.constant 0 : index
    %59 = vector.load %arg7[%c1_48, %c0_49, %c0_50] : memref<4x32x8xf32, #tpu.memory_space<vmem>>, vector<1x32x8xf32>
    %60 = vector.shape_cast %59 : vector<1x32x8xf32> to vector<32x8xf32>
    %cst_51 = arith.constant dense<0.000000e+00> : vector<8x8xf32>
    %61 = tpu.matmul %8, %60, %cst_51 {dimension_numbers = #tpu.dot_dimension_numbers<[1], [0], [0], [1], [0, 0, 1, 1], [], []>} : vector<8x32xf32>, vector<32x8xf32>, vector<8x8xf32> -> vector<8x8xf32>
    %c1_52 = arith.constant 1 : index
    %c0_53 = arith.constant 0 : index
    %c0_54 = arith.constant 0 : index
    %62 = vector.load %arg10[%c1_52, %c0_53, %c0_54] : memref<4x1x8xf32, #tpu.memory_space<vmem>>, vector<1x1x8xf32>
    %63 = vector.shape_cast %62 : vector<1x1x8xf32> to vector<1x8xf32>
    %64 = vector.broadcast %63 : vector<1x8xf32> to vector<8x8xf32>
    %65 = arith.addf %61, %64 : vector<8x8xf32>
    %c1_55 = arith.constant 1 : index
    %c0_56 = arith.constant 0 : index
    %c0_57 = arith.constant 0 : index
    %66 = vector.load %arg8[%c1_55, %c0_56, %c0_57] : memref<4x32x8xf32, #tpu.memory_space<vmem>>, vector<1x32x8xf32>
    %67 = vector.shape_cast %66 : vector<1x32x8xf32> to vector<32x8xf32>
    %cst_58 = arith.constant dense<0.000000e+00> : vector<8x8xf32>
    %68 = tpu.matmul %8, %67, %cst_58 {dimension_numbers = #tpu.dot_dimension_numbers<[1], [0], [0], [1], [0, 0, 1, 1], [], []>} : vector<8x32xf32>, vector<32x8xf32>, vector<8x8xf32> -> vector<8x8xf32>
    %c1_59 = arith.constant 1 : index
    %c0_60 = arith.constant 0 : index
    %c0_61 = arith.constant 0 : index
    %69 = vector.load %arg11[%c1_59, %c0_60, %c0_61] : memref<4x1x8xf32, #tpu.memory_space<vmem>>, vector<1x1x8xf32>
    %70 = vector.shape_cast %69 : vector<1x1x8xf32> to vector<1x8xf32>
    %71 = vector.broadcast %70 : vector<1x8xf32> to vector<8x8xf32>
    %72 = arith.addf %68, %71 : vector<8x8xf32>
    %cst_62 = arith.constant dense<0.000000e+00> : vector<8x8xf32>
    %73 = tpu.matmul %58, %65, %cst_62 {dimension_numbers = #tpu.dot_dimension_numbers<[1], [1], [0], [0], [0, 0, 1, 0], [], []>} : vector<8x8xf32>, vector<8x8xf32>, vector<8x8xf32> -> vector<8x8xf32>
    %cst_63 = arith.constant 0.353553385 : f32
    %74 = vector.broadcast %cst_63 : f32 to vector<8x8xf32>
    %75 = arith.mulf %73, %74 : vector<8x8xf32>
    %76 = vector.broadcast %10 : vector<1x8xf32> to vector<8x8xf32>
    %77 = arith.addf %75, %76 : vector<8x8xf32>
    %cst_64 = arith.constant dense<0xFF800000> : vector<8xf32>
    %78 = vector.multi_reduction <maximumf>, %77, %cst_64 [1] : vector<8x8xf32> to vector<8xf32>
    %79 = vector.shape_cast %78 : vector<8xf32> to vector<8x1xf32>
    %80 = vector.broadcast %79 : vector<8x1xf32> to vector<8x8xf32>
    %81 = arith.subf %77, %80 : vector<8x8xf32>
    %82 = math.exp %81 : vector<8x8xf32>
    %cst_65 = arith.constant dense<0.000000e+00> : vector<8xf32>
    %83 = vector.multi_reduction <add>, %82, %cst_65 [1] : vector<8x8xf32> to vector<8xf32>
    %84 = vector.shape_cast %83 : vector<8xf32> to vector<8x1xf32>
    %85 = vector.broadcast %84 : vector<8x1xf32> to vector<8x8xf32>
    %86 = arith.divf %82, %85 : vector<8x8xf32>
    %cst_66 = arith.constant dense<0.000000e+00> : vector<8x8xf32>
    %87 = tpu.matmul %86, %72, %cst_66 {dimension_numbers = #tpu.dot_dimension_numbers<[1], [0], [0], [1], [0, 0, 1, 1], [], []>} : vector<8x8xf32>, vector<8x8xf32>, vector<8x8xf32> -> vector<8x8xf32>
    %c1_67 = arith.constant 1 : index
    %c0_68 = arith.constant 0 : index
    %c0_69 = arith.constant 0 : index
    %88 = vector.load %arg12[%c1_67, %c0_68, %c0_69] : memref<4x8x32xf32, #tpu.memory_space<vmem>>, vector<1x8x32xf32>
    %89 = vector.shape_cast %88 : vector<1x8x32xf32> to vector<8x32xf32>
    %cst_70 = arith.constant dense<0.000000e+00> : vector<8x32xf32>
    %90 = tpu.matmul %87, %89, %cst_70 {dimension_numbers = #tpu.dot_dimension_numbers<[1], [0], [0], [1], [0, 0, 1, 1], [], []>} : vector<8x8xf32>, vector<8x32xf32>, vector<8x32xf32> -> vector<8x32xf32>
    %91 = arith.addf %51, %90 : vector<8x32xf32>
    %c2 = arith.constant 2 : index
    %c0_71 = arith.constant 0 : index
    %c0_72 = arith.constant 0 : index
    %92 = vector.load %arg6[%c2, %c0_71, %c0_72] : memref<4x32x8xf32, #tpu.memory_space<vmem>>, vector<1x32x8xf32>
    %93 = vector.shape_cast %92 : vector<1x32x8xf32> to vector<32x8xf32>
    %cst_73 = arith.constant dense<0.000000e+00> : vector<8x8xf32>
    %94 = tpu.matmul %8, %93, %cst_73 {dimension_numbers = #tpu.dot_dimension_numbers<[1], [0], [0], [1], [0, 0, 1, 1], [], []>} : vector<8x32xf32>, vector<32x8xf32>, vector<8x8xf32> -> vector<8x8xf32>
    %c2_74 = arith.constant 2 : index
    %c0_75 = arith.constant 0 : index
    %c0_76 = arith.constant 0 : index
    %95 = vector.load %arg9[%c2_74, %c0_75, %c0_76] : memref<4x1x8xf32, #tpu.memory_space<vmem>>, vector<1x1x8xf32>
    %96 = vector.shape_cast %95 : vector<1x1x8xf32> to vector<1x8xf32>
    %97 = vector.broadcast %96 : vector<1x8xf32> to vector<8x8xf32>
    %98 = arith.addf %94, %97 : vector<8x8xf32>
    %c2_77 = arith.constant 2 : index
    %c0_78 = arith.constant 0 : index
    %c0_79 = arith.constant 0 : index
    %99 = vector.load %arg7[%c2_77, %c0_78, %c0_79] : memref<4x32x8xf32, #tpu.memory_space<vmem>>, vector<1x32x8xf32>
    %100 = vector.shape_cast %99 : vector<1x32x8xf32> to vector<32x8xf32>
    %cst_80 = arith.constant dense<0.000000e+00> : vector<8x8xf32>
    %101 = tpu.matmul %8, %100, %cst_80 {dimension_numbers = #tpu.dot_dimension_numbers<[1], [0], [0], [1], [0, 0, 1, 1], [], []>} : vector<8x32xf32>, vector<32x8xf32>, vector<8x8xf32> -> vector<8x8xf32>
    %c2_81 = arith.constant 2 : index
    %c0_82 = arith.constant 0 : index
    %c0_83 = arith.constant 0 : index
    %102 = vector.load %arg10[%c2_81, %c0_82, %c0_83] : memref<4x1x8xf32, #tpu.memory_space<vmem>>, vector<1x1x8xf32>
    %103 = vector.shape_cast %102 : vector<1x1x8xf32> to vector<1x8xf32>
    %104 = vector.broadcast %103 : vector<1x8xf32> to vector<8x8xf32>
    %105 = arith.addf %101, %104 : vector<8x8xf32>
    %c2_84 = arith.constant 2 : index
    %c0_85 = arith.constant 0 : index
    %c0_86 = arith.constant 0 : index
    %106 = vector.load %arg8[%c2_84, %c0_85, %c0_86] : memref<4x32x8xf32, #tpu.memory_space<vmem>>, vector<1x32x8xf32>
    %107 = vector.shape_cast %106 : vector<1x32x8xf32> to vector<32x8xf32>
    %cst_87 = arith.constant dense<0.000000e+00> : vector<8x8xf32>
    %108 = tpu.matmul %8, %107, %cst_87 {dimension_numbers = #tpu.dot_dimension_numbers<[1], [0], [0], [1], [0, 0, 1, 1], [], []>} : vector<8x32xf32>, vector<32x8xf32>, vector<8x8xf32> -> vector<8x8xf32>
    %c2_88 = arith.constant 2 : index
    %c0_89 = arith.constant 0 : index
    %c0_90 = arith.constant 0 : index
    %109 = vector.load %arg11[%c2_88, %c0_89, %c0_90] : memref<4x1x8xf32, #tpu.memory_space<vmem>>, vector<1x1x8xf32>
    %110 = vector.shape_cast %109 : vector<1x1x8xf32> to vector<1x8xf32>
    %111 = vector.broadcast %110 : vector<1x8xf32> to vector<8x8xf32>
    %112 = arith.addf %108, %111 : vector<8x8xf32>
    %cst_91 = arith.constant dense<0.000000e+00> : vector<8x8xf32>
    %113 = tpu.matmul %98, %105, %cst_91 {dimension_numbers = #tpu.dot_dimension_numbers<[1], [1], [0], [0], [0, 0, 1, 0], [], []>} : vector<8x8xf32>, vector<8x8xf32>, vector<8x8xf32> -> vector<8x8xf32>
    %cst_92 = arith.constant 0.353553385 : f32
    %114 = vector.broadcast %cst_92 : f32 to vector<8x8xf32>
    %115 = arith.mulf %113, %114 : vector<8x8xf32>
    %116 = vector.broadcast %10 : vector<1x8xf32> to vector<8x8xf32>
    %117 = arith.addf %115, %116 : vector<8x8xf32>
    %cst_93 = arith.constant dense<0xFF800000> : vector<8xf32>
    %118 = vector.multi_reduction <maximumf>, %117, %cst_93 [1] : vector<8x8xf32> to vector<8xf32>
    %119 = vector.shape_cast %118 : vector<8xf32> to vector<8x1xf32>
    %120 = vector.broadcast %119 : vector<8x1xf32> to vector<8x8xf32>
    %121 = arith.subf %117, %120 : vector<8x8xf32>
    %122 = math.exp %121 : vector<8x8xf32>
    %cst_94 = arith.constant dense<0.000000e+00> : vector<8xf32>
    %123 = vector.multi_reduction <add>, %122, %cst_94 [1] : vector<8x8xf32> to vector<8xf32>
    %124 = vector.shape_cast %123 : vector<8xf32> to vector<8x1xf32>
    %125 = vector.broadcast %124 : vector<8x1xf32> to vector<8x8xf32>
    %126 = arith.divf %122, %125 : vector<8x8xf32>
    %cst_95 = arith.constant dense<0.000000e+00> : vector<8x8xf32>
    %127 = tpu.matmul %126, %112, %cst_95 {dimension_numbers = #tpu.dot_dimension_numbers<[1], [0], [0], [1], [0, 0, 1, 1], [], []>} : vector<8x8xf32>, vector<8x8xf32>, vector<8x8xf32> -> vector<8x8xf32>
    %c2_96 = arith.constant 2 : index
    %c0_97 = arith.constant 0 : index
    %c0_98 = arith.constant 0 : index
    %128 = vector.load %arg12[%c2_96, %c0_97, %c0_98] : memref<4x8x32xf32, #tpu.memory_space<vmem>>, vector<1x8x32xf32>
    %129 = vector.shape_cast %128 : vector<1x8x32xf32> to vector<8x32xf32>
    %cst_99 = arith.constant dense<0.000000e+00> : vector<8x32xf32>
    %130 = tpu.matmul %127, %129, %cst_99 {dimension_numbers = #tpu.dot_dimension_numbers<[1], [0], [0], [1], [0, 0, 1, 1], [], []>} : vector<8x8xf32>, vector<8x32xf32>, vector<8x32xf32> -> vector<8x32xf32>
    %131 = arith.addf %91, %130 : vector<8x32xf32>
    %c3 = arith.constant 3 : index
    %c0_100 = arith.constant 0 : index
    %c0_101 = arith.constant 0 : index
    %132 = vector.load %arg6[%c3, %c0_100, %c0_101] : memref<4x32x8xf32, #tpu.memory_space<vmem>>, vector<1x32x8xf32>
    %133 = vector.shape_cast %132 : vector<1x32x8xf32> to vector<32x8xf32>
    %cst_102 = arith.constant dense<0.000000e+00> : vector<8x8xf32>
    %134 = tpu.matmul %8, %133, %cst_102 {dimension_numbers = #tpu.dot_dimension_numbers<[1], [0], [0], [1], [0, 0, 1, 1], [], []>} : vector<8x32xf32>, vector<32x8xf32>, vector<8x8xf32> -> vector<8x8xf32>
    %c3_103 = arith.constant 3 : index
    %c0_104 = arith.constant 0 : index
    %c0_105 = arith.constant 0 : index
    %135 = vector.load %arg9[%c3_103, %c0_104, %c0_105] : memref<4x1x8xf32, #tpu.memory_space<vmem>>, vector<1x1x8xf32>
    %136 = vector.shape_cast %135 : vector<1x1x8xf32> to vector<1x8xf32>
    %137 = vector.broadcast %136 : vector<1x8xf32> to vector<8x8xf32>
    %138 = arith.addf %134, %137 : vector<8x8xf32>
    %c3_106 = arith.constant 3 : index
    %c0_107 = arith.constant 0 : index
    %c0_108 = arith.constant 0 : index
    %139 = vector.load %arg7[%c3_106, %c0_107, %c0_108] : memref<4x32x8xf32, #tpu.memory_space<vmem>>, vector<1x32x8xf32>
    %140 = vector.shape_cast %139 : vector<1x32x8xf32> to vector<32x8xf32>
    %cst_109 = arith.constant dense<0.000000e+00> : vector<8x8xf32>
    %141 = tpu.matmul %8, %140, %cst_109 {dimension_numbers = #tpu.dot_dimension_numbers<[1], [0], [0], [1], [0, 0, 1, 1], [], []>} : vector<8x32xf32>, vector<32x8xf32>, vector<8x8xf32> -> vector<8x8xf32>
    %c3_110 = arith.constant 3 : index
    %c0_111 = arith.constant 0 : index
    %c0_112 = arith.constant 0 : index
    %142 = vector.load %arg10[%c3_110, %c0_111, %c0_112] : memref<4x1x8xf32, #tpu.memory_space<vmem>>, vector<1x1x8xf32>
    %143 = vector.shape_cast %142 : vector<1x1x8xf32> to vector<1x8xf32>
    %144 = vector.broadcast %143 : vector<1x8xf32> to vector<8x8xf32>
    %145 = arith.addf %141, %144 : vector<8x8xf32>
    %c3_113 = arith.constant 3 : index
    %c0_114 = arith.constant 0 : index
    %c0_115 = arith.constant 0 : index
    %146 = vector.load %arg8[%c3_113, %c0_114, %c0_115] : memref<4x32x8xf32, #tpu.memory_space<vmem>>, vector<1x32x8xf32>
    %147 = vector.shape_cast %146 : vector<1x32x8xf32> to vector<32x8xf32>
    %cst_116 = arith.constant dense<0.000000e+00> : vector<8x8xf32>
    %148 = tpu.matmul %8, %147, %cst_116 {dimension_numbers = #tpu.dot_dimension_numbers<[1], [0], [0], [1], [0, 0, 1, 1], [], []>} : vector<8x32xf32>, vector<32x8xf32>, vector<8x8xf32> -> vector<8x8xf32>
    %c3_117 = arith.constant 3 : index
    %c0_118 = arith.constant 0 : index
    %c0_119 = arith.constant 0 : index
    %149 = vector.load %arg11[%c3_117, %c0_118, %c0_119] : memref<4x1x8xf32, #tpu.memory_space<vmem>>, vector<1x1x8xf32>
    %150 = vector.shape_cast %149 : vector<1x1x8xf32> to vector<1x8xf32>
    %151 = vector.broadcast %150 : vector<1x8xf32> to vector<8x8xf32>
    %152 = arith.addf %148, %151 : vector<8x8xf32>
    %cst_120 = arith.constant dense<0.000000e+00> : vector<8x8xf32>
    %153 = tpu.matmul %138, %145, %cst_120 {dimension_numbers = #tpu.dot_dimension_numbers<[1], [1], [0], [0], [0, 0, 1, 0], [], []>} : vector<8x8xf32>, vector<8x8xf32>, vector<8x8xf32> -> vector<8x8xf32>
    %cst_121 = arith.constant 0.353553385 : f32
    %154 = vector.broadcast %cst_121 : f32 to vector<8x8xf32>
    %155 = arith.mulf %153, %154 : vector<8x8xf32>
    %156 = vector.broadcast %10 : vector<1x8xf32> to vector<8x8xf32>
    %157 = arith.addf %155, %156 : vector<8x8xf32>
    %cst_122 = arith.constant dense<0xFF800000> : vector<8xf32>
    %158 = vector.multi_reduction <maximumf>, %157, %cst_122 [1] : vector<8x8xf32> to vector<8xf32>
    %159 = vector.shape_cast %158 : vector<8xf32> to vector<8x1xf32>
    %160 = vector.broadcast %159 : vector<8x1xf32> to vector<8x8xf32>
    %161 = arith.subf %157, %160 : vector<8x8xf32>
    %162 = math.exp %161 : vector<8x8xf32>
    %cst_123 = arith.constant dense<0.000000e+00> : vector<8xf32>
    %163 = vector.multi_reduction <add>, %162, %cst_123 [1] : vector<8x8xf32> to vector<8xf32>
    %164 = vector.shape_cast %163 : vector<8xf32> to vector<8x1xf32>
    %165 = vector.broadcast %164 : vector<8x1xf32> to vector<8x8xf32>
    %166 = arith.divf %162, %165 : vector<8x8xf32>
    %cst_124 = arith.constant dense<0.000000e+00> : vector<8x8xf32>
    %167 = tpu.matmul %166, %152, %cst_124 {dimension_numbers = #tpu.dot_dimension_numbers<[1], [0], [0], [1], [0, 0, 1, 1], [], []>} : vector<8x8xf32>, vector<8x8xf32>, vector<8x8xf32> -> vector<8x8xf32>
    %c3_125 = arith.constant 3 : index
    %c0_126 = arith.constant 0 : index
    %c0_127 = arith.constant 0 : index
    %168 = vector.load %arg12[%c3_125, %c0_126, %c0_127] : memref<4x8x32xf32, #tpu.memory_space<vmem>>, vector<1x8x32xf32>
    %169 = vector.shape_cast %168 : vector<1x8x32xf32> to vector<8x32xf32>
    %cst_128 = arith.constant dense<0.000000e+00> : vector<8x32xf32>
    %170 = tpu.matmul %167, %169, %cst_128 {dimension_numbers = #tpu.dot_dimension_numbers<[1], [0], [0], [1], [0, 0, 1, 1], [], []>} : vector<8x8xf32>, vector<8x32xf32>, vector<8x32xf32> -> vector<8x32xf32>
    %171 = arith.addf %131, %170 : vector<8x32xf32>
    %c0_129 = arith.constant 0 : index
    %c0_130 = arith.constant 0 : index
    %172 = vector.load %arg13[%c0_129, %c0_130] : memref<1x32xf32, #tpu.memory_space<vmem>>, vector<1x32xf32>
    %173 = vector.broadcast %172 : vector<1x32xf32> to vector<8x32xf32>
    %174 = arith.addf %171, %173 : vector<8x32xf32>
    %175 = arith.addf %8, %174 : vector<8x32xf32>
    %c0_131 = arith.constant 0 : index
    %c0_132 = arith.constant 0 : index
    %176 = vector.load %arg14[%c0_131, %c0_132] : memref<1x32xf32, #tpu.memory_space<vmem>>, vector<1x32xf32>
    %c0_133 = arith.constant 0 : index
    %c0_134 = arith.constant 0 : index
    %177 = vector.load %arg15[%c0_133, %c0_134] : memref<1x32xf32, #tpu.memory_space<vmem>>, vector<1x32xf32>
    %cst_135 = arith.constant dense<0.000000e+00> : vector<8xf32>
    %178 = vector.multi_reduction <add>, %175, %cst_135 [1] : vector<8x32xf32> to vector<8xf32>
    %179 = vector.shape_cast %178 : vector<8xf32> to vector<8x1xf32>
    %cst_136 = arith.constant 3.200000e+01 : f32
    %180 = vector.broadcast %cst_136 : f32 to vector<8x1xf32>
    %181 = arith.divf %179, %180 : vector<8x1xf32>
    %182 = vector.broadcast %181 : vector<8x1xf32> to vector<8x32xf32>
    %183 = arith.subf %175, %182 : vector<8x32xf32>
    %184 = arith.mulf %183, %183 : vector<8x32xf32>
    %cst_137 = arith.constant dense<0.000000e+00> : vector<8xf32>
    %185 = vector.multi_reduction <add>, %184, %cst_137 [1] : vector<8x32xf32> to vector<8xf32>
    %186 = vector.shape_cast %185 : vector<8xf32> to vector<8x1xf32>
    %cst_138 = arith.constant 3.200000e+01 : f32
    %187 = vector.broadcast %cst_138 : f32 to vector<8x1xf32>
    %188 = arith.divf %186, %187 : vector<8x1xf32>
    %cst_139 = arith.constant 9.99999974E-6 : f32
    %189 = vector.broadcast %cst_139 : f32 to vector<8x1xf32>
    %190 = arith.addf %188, %189 : vector<8x1xf32>
    %191 = math.rsqrt %190 : vector<8x1xf32>
    %192 = vector.broadcast %191 : vector<8x1xf32> to vector<8x32xf32>
    %193 = arith.mulf %183, %192 : vector<8x32xf32>
    %194 = vector.broadcast %176 : vector<1x32xf32> to vector<8x32xf32>
    %195 = arith.mulf %193, %194 : vector<8x32xf32>
    %196 = vector.broadcast %177 : vector<1x32xf32> to vector<8x32xf32>
    %197 = arith.addf %195, %196 : vector<8x32xf32>
    %c0_140 = arith.constant 0 : index
    %c0_141 = arith.constant 0 : index
    %198 = vector.load %arg16[%c0_140, %c0_141] : memref<32x2048xf32, #tpu.memory_space<vmem>>, vector<32x2048xf32>
    %cst_142 = arith.constant dense<0.000000e+00> : vector<8x2048xf32>
    %199 = tpu.matmul %197, %198, %cst_142 {dimension_numbers = #tpu.dot_dimension_numbers<[1], [0], [0], [1], [0, 0, 1, 1], [], []>} : vector<8x32xf32>, vector<32x2048xf32>, vector<8x2048xf32> -> vector<8x2048xf32>
    %c0_143 = arith.constant 0 : index
    %c0_144 = arith.constant 0 : index
    %200 = vector.load %arg17[%c0_143, %c0_144] : memref<1x2048xf32, #tpu.memory_space<vmem>>, vector<1x2048xf32>
    %201 = vector.broadcast %200 : vector<1x2048xf32> to vector<8x2048xf32>
    %202 = arith.addf %199, %201 : vector<8x2048xf32>
    %cst_145 = arith.constant 0.000000e+00 : f32
    %203 = vector.broadcast %cst_145 : f32 to vector<8x2048xf32>
    %204 = arith.maximumf %202, %203 : vector<8x2048xf32>
    %c0_146 = arith.constant 0 : index
    %c0_147 = arith.constant 0 : index
    %205 = vector.load %arg18[%c0_146, %c0_147] : memref<2048x32xf32, #tpu.memory_space<vmem>>, vector<2048x32xf32>
    %cst_148 = arith.constant dense<0.000000e+00> : vector<8x32xf32>
    %206 = tpu.matmul %204, %205, %cst_148 {dimension_numbers = #tpu.dot_dimension_numbers<[1], [0], [0], [1], [0, 0, 1, 1], [], []>} : vector<8x2048xf32>, vector<2048x32xf32>, vector<8x32xf32> -> vector<8x32xf32>
    %c0_149 = arith.constant 0 : index
    %c0_150 = arith.constant 0 : index
    %207 = vector.load %arg19[%c0_149, %c0_150] : memref<1x32xf32, #tpu.memory_space<vmem>>, vector<1x32xf32>
    %208 = vector.broadcast %207 : vector<1x32xf32> to vector<8x32xf32>
    %209 = arith.addf %206, %208 : vector<8x32xf32>
    %210 = arith.addf %197, %209 : vector<8x32xf32>
    %c0_151 = arith.constant 0 : index
    %c0_152 = arith.constant 0 : index
    %211 = vector.load %arg20[%c0_151, %c0_152] : memref<1x32xf32, #tpu.memory_space<vmem>>, vector<1x32xf32>
    %c0_153 = arith.constant 0 : index
    %c0_154 = arith.constant 0 : index
    %212 = vector.load %arg21[%c0_153, %c0_154] : memref<1x32xf32, #tpu.memory_space<vmem>>, vector<1x32xf32>
    %cst_155 = arith.constant dense<0.000000e+00> : vector<8xf32>
    %213 = vector.multi_reduction <add>, %210, %cst_155 [1] : vector<8x32xf32> to vector<8xf32>
    %214 = vector.shape_cast %213 : vector<8xf32> to vector<8x1xf32>
    %cst_156 = arith.constant 3.200000e+01 : f32
    %215 = vector.broadcast %cst_156 : f32 to vector<8x1xf32>
    %216 = arith.divf %214, %215 : vector<8x1xf32>
    %217 = vector.broadcast %216 : vector<8x1xf32> to vector<8x32xf32>
    %218 = arith.subf %210, %217 : vector<8x32xf32>
    %219 = arith.mulf %218, %218 : vector<8x32xf32>
    %cst_157 = arith.constant dense<0.000000e+00> : vector<8xf32>
    %220 = vector.multi_reduction <add>, %219, %cst_157 [1] : vector<8x32xf32> to vector<8xf32>
    %221 = vector.shape_cast %220 : vector<8xf32> to vector<8x1xf32>
    %cst_158 = arith.constant 3.200000e+01 : f32
    %222 = vector.broadcast %cst_158 : f32 to vector<8x1xf32>
    %223 = arith.divf %221, %222 : vector<8x1xf32>
    %cst_159 = arith.constant 9.99999974E-6 : f32
    %224 = vector.broadcast %cst_159 : f32 to vector<8x1xf32>
    %225 = arith.addf %223, %224 : vector<8x1xf32>
    %226 = math.rsqrt %225 : vector<8x1xf32>
    %227 = vector.broadcast %226 : vector<8x1xf32> to vector<8x32xf32>
    %228 = arith.mulf %218, %227 : vector<8x32xf32>
    %229 = vector.broadcast %211 : vector<1x32xf32> to vector<8x32xf32>
    %230 = arith.mulf %228, %229 : vector<8x32xf32>
    %231 = vector.broadcast %212 : vector<1x32xf32> to vector<8x32xf32>
    %232 = arith.addf %230, %231 : vector<8x32xf32>
    %c0_160 = arith.constant 0 : index
    %c0_161 = arith.constant 0 : index
    %c0_162 = arith.constant 0 : index
    %233 = vector.load %arg22[%c0_160, %c0_161, %c0_162] : memref<1x8x32xf32, #tpu.memory_space<vmem>>, vector<1x8x32xf32>
    %234 = vector.shape_cast %233 : vector<1x8x32xf32> to vector<8x32xf32>
    %235 = vector.shape_cast %232 : vector<8x32xf32> to vector<1x8x32xf32>
    tpu.vector_store %arg22[%c0_160, %c0_161, %c0_162], %235 {strides = array<i32>} : memref<1x8x32xf32, #tpu.memory_space<vmem>>, vector<1x8x32xf32>,
    return
  }
  func.func @transform_0(%arg0: i32) -> (i32, i32, i32) {
    %c0_i32 = arith.constant 0 : i32
    %c0_i32_0 = arith.constant 0 : i32
    %c0_i32_1 = arith.constant 0 : i32
    return %arg0, %c0_i32, %c0_i32_0 : i32, i32, i32
  }
  func.func @transform_1(%arg0: i32) -> (i32, i32) {
    %c0_i32 = arith.constant 0 : i32
    %c0_i32_0 = arith.constant 0 : i32
    %c0_i32_1 = arith.constant 0 : i32
    return %c0_i32, %c0_i32_0 : i32, i32
  }
  func.func @transform_2(%arg0: i32) -> (i32, i32) {
    %c0_i32 = arith.constant 0 : i32
    %c0_i32_0 = arith.constant 0 : i32
    %c0_i32_1 = arith.constant 0 : i32
    return %c0_i32, %c0_i32_0 : i32, i32
  }
  func.func @transform_3(%arg0: i32) -> (i32, i32) {
    %c0_i32 = arith.constant 0 : i32
    %c0_i32_0 = arith.constant 0 : i32
    %c0_i32_1 = arith.constant 0 : i32
    return %c0_i32, %c0_i32_0 : i32, i32
  }
  func.func @transform_4(%arg0: i32) -> (i32, i32, i32) {
    %c0_i32 = arith.constant 0 : i32
    %c0_i32_0 = arith.constant 0 : i32
    %c0_i32_1 = arith.constant 0 : i32
    return %arg0, %c0_i32, %c0_i32_0 : i32, i32, i32
  }
  func.func @transform_5(%arg0: i32) -> (i32, i32, i32) {
    %c0_i32 = arith.constant 0 : i32
    %c0_i32_0 = arith.constant 0 : i32
    %c0_i32_1 = arith.constant 0 : i32
    %c0_i32_2 = arith.constant 0 : i32
    return %c0_i32, %c0_i32_0, %c0_i32_1 : i32, i32, i32
  }
  func.func @transform_6(%arg0: i32) -> (i32, i32, i32) {
    %c0_i32 = arith.constant 0 : i32
    %c0_i32_0 = arith.constant 0 : i32
    %c0_i32_1 = arith.constant 0 : i32
    %c0_i32_2 = arith.constant 0 : i32
    return %c0_i32, %c0_i32_0, %c0_i32_1 : i32, i32, i32
  }
  func.func @transform_7(%arg0: i32) -> (i32, i32, i32) {
    %c0_i32 = arith.constant 0 : i32
    %c0_i32_0 = arith.constant 0 : i32
    %c0_i32_1 = arith.constant 0 : i32
    %c0_i32_2 = arith.constant 0 : i32
    return %c0_i32, %c0_i32_0, %c0_i32_1 : i32, i32, i32
  }
  func.func @transform_8(%arg0: i32) -> (i32, i32, i32) {
    %c0_i32 = arith.constant 0 : i32
    %c0_i32_0 = arith.constant 0 : i32
    %c0_i32_1 = arith.constant 0 : i32
    %c0_i32_2 = arith.constant 0 : i32
    return %c0_i32, %c0_i32_0, %c0_i32_1 : i32, i32, i32
  }
  func.func @transform_9(%arg0: i32) -> (i32, i32, i32) {
    %c0_i32 = arith.constant 0 : i32
    %c0_i32_0 = arith.constant 0 : i32
    %c0_i32_1 = arith.constant 0 : i32
    %c0_i32_2 = arith.constant 0 : i32
    return %c0_i32, %c0_i32_0, %c0_i32_1 : i32, i32, i32
  }
  func.func @transform_10(%arg0: i32) -> (i32, i32, i32) {
    %c0_i32 = arith.constant 0 : i32
    %c0_i32_0 = arith.constant 0 : i32
    %c0_i32_1 = arith.constant 0 : i32
    %c0_i32_2 = arith.constant 0 : i32
    return %c0_i32, %c0_i32_0, %c0_i32_1 : i32, i32, i32
  }
  func.func @transform_11(%arg0: i32) -> (i32, i32, i32) {
    %c0_i32 = arith.constant 0 : i32
    %c0_i32_0 = arith.constant 0 : i32
    %c0_i32_1 = arith.constant 0 : i32
    %c0_i32_2 = arith.constant 0 : i32
    return %c0_i32, %c0_i32_0, %c0_i32_1 : i32, i32, i32
  }
  func.func @transform_12(%arg0: i32) -> (i32, i32) {
    %c0_i32 = arith.constant 0 : i32
    %c0_i32_0 = arith.constant 0 : i32
    %c0_i32_1 = arith.constant 0 : i32
    return %c0_i32, %c0_i32_0 : i32, i32
  }
  func.func @transform_13(%arg0: i32) -> (i32, i32) {
    %c0_i32 = arith.constant 0 : i32
    %c0_i32_0 = arith.constant 0 : i32
    %c0_i32_1 = arith.constant 0 : i32
    return %c0_i32, %c0_i32_0 : i32, i32
  }
  func.func @transform_14(%arg0: i32) -> (i32, i32) {
    %c0_i32 = arith.constant 0 : i32
    %c0_i32_0 = arith.constant 0 : i32
    %c0_i32_1 = arith.constant 0 : i32
    return %c0_i32, %c0_i32_0 : i32, i32
  }
  func.func @transform_15(%arg0: i32) -> (i32, i32) {
    %c0_i32 = arith.constant 0 : i32
    %c0_i32_0 = arith.constant 0 : i32
    %c0_i32_1 = arith.constant 0 : i32
    return %c0_i32, %c0_i32_0 : i32, i32
  }
  func.func @transform_16(%arg0: i32) -> (i32, i32) {
    %c0_i32 = arith.constant 0 : i32
    %c0_i32_0 = arith.constant 0 : i32
    %c0_i32_1 = arith.constant 0 : i32
    return %c0_i32, %c0_i32_0 : i32, i32
  }
  func.func @transform_17(%arg0: i32) -> (i32, i32) {
    %c0_i32 = arith.constant 0 : i32
    %c0_i32_0 = arith.constant 0 : i32
    %c0_i32_1 = arith.constant 0 : i32
    return %c0_i32, %c0_i32_0 : i32, i32
  }
  func.func @transform_18(%arg0: i32) -> (i32, i32) {
    %c0_i32 = arith.constant 0 : i32
    %c0_i32_0 = arith.constant 0 : i32
    %c0_i32_1 = arith.constant 0 : i32
    return %c0_i32, %c0_i32_0 : i32, i32
  }
  func.func @transform_19(%arg0: i32) -> (i32, i32) {
    %c0_i32 = arith.constant 0 : i32
    %c0_i32_0 = arith.constant 0 : i32
    %c0_i32_1 = arith.constant 0 : i32
    return %c0_i32, %c0_i32_0 : i32, i32
  }
  func.func @transform_20(%arg0: i32) -> (i32, i32) {
    %c0_i32 = arith.constant 0 : i32
    %c0_i32_0 = arith.constant 0 : i32
    %c0_i32_1 = arith.constant 0 : i32
    return %c0_i32, %c0_i32_0 : i32, i32
  }
  func.func @transform_21(%arg0: i32) -> (i32, i32, i32) {
    %c0_i32 = arith.constant 0 : i32
    %c0_i32_0 = arith.constant 0 : i32
    %c0_i32_1 = arith.constant 0 : i32
    return %arg0, %c0_i32, %c0_i32_0 : i32, i32, i32
  }
}

module attributes {stable_mosaic.version = 11 : i64} {
  func.func @_pool_fc_kernel(%arg0: i32, %arg1: memref<1x8x32xf32, #tpu.memory_space<vmem>>, %arg2: memref<1x8x32xf32, #tpu.memory_space<vmem>>, %arg3: memref<1x1x8xf32, #tpu.memory_space<vmem>>, %arg4: memref<1x1x1xf32, #tpu.memory_space<vmem>>, %arg5: memref<32x3xf32, #tpu.memory_space<vmem>>, %arg6: memref<1x3xf32, #tpu.memory_space<vmem>>, %arg7: memref<1x1x32xf32, #tpu.memory_space<vmem>>, %arg8: memref<1x1x32xf32, #tpu.memory_space<vmem>>, %arg9: memref<1x1x3xf32, #tpu.memory_space<vmem>>) attributes {dimension_semantics = [#tpu.dimension_semantics<parallel>], iteration_bounds = array<i64: 2>, scalar_prefetch = 0 : i64, scratch_operands = 0 : i64, tpu.core_type = #tpu.core_type<tc>, window_params = [{transform_indices = @transform_0, window_bounds = array<i64: 1, 8, 32>}, {transform_indices = @transform_1, window_bounds = array<i64: 1, 8, 32>}, {transform_indices = @transform_2, window_bounds = array<i64: 1, 1, 8>}, {transform_indices = @transform_3, window_bounds = array<i64: 1, 1, 1>}, {pipeline_mode = #tpu.pipeline_mode<synchronous>, transform_indices = @transform_4, window_bounds = array<i64: 32, 3>}, {pipeline_mode = #tpu.pipeline_mode<synchronous>, transform_indices = @transform_5, window_bounds = array<i64: 1, 3>}, {transform_indices = @transform_6, window_bounds = array<i64: 1, 1, 32>}, {transform_indices = @transform_7, window_bounds = array<i64: 1, 1, 32>}, {transform_indices = @transform_8, window_bounds = array<i64: 1, 1, 3>}]} {
    %c0 = arith.constant 0 : index
    %c0_0 = arith.constant 0 : index
    %c0_1 = arith.constant 0 : index
    %0 = vector.load %arg3[%c0, %c0_0, %c0_1] : memref<1x1x8xf32, #tpu.memory_space<vmem>>, vector<1x1x8xf32>
    %1 = vector.shape_cast %0 : vector<1x1x8xf32> to vector<1x8xf32>
    %c0_2 = arith.constant 0 : index
    %c0_3 = arith.constant 0 : index
    %c0_4 = arith.constant 0 : index
    %2 = vector.load %arg4[%c0_2, %c0_3, %c0_4] : memref<1x1x1xf32, #tpu.memory_space<vmem>>, vector<1x1x1xf32>
    %3 = vector.shape_cast %2 : vector<1x1x1xf32> to vector<1x1xf32>
    %c0_5 = arith.constant 0 : index
    %c0_6 = arith.constant 0 : index
    %c0_7 = arith.constant 0 : index
    %4 = vector.load %arg1[%c0_5, %c0_6, %c0_7] : memref<1x8x32xf32, #tpu.memory_space<vmem>>, vector<1x8x32xf32>
    %5 = vector.shape_cast %4 : vector<1x8x32xf32> to vector<8x32xf32>
    %cst = arith.constant dense<0.000000e+00> : vector<1x32xf32>
    %6 = tpu.matmul %1, %5, %cst {dimension_numbers = #tpu.dot_dimension_numbers<[1], [0], [0], [1], [0, 0, 1, 1], [], []>} : vector<1x8xf32>, vector<8x32xf32>, vector<1x32xf32> -> vector<1x32xf32>
    %7 = vector.broadcast %3 : vector<1x1xf32> to vector<1x32xf32>
    %8 = arith.mulf %6, %7 : vector<1x32xf32>
    %c0_8 = arith.constant 0 : index
    %c0_9 = arith.constant 0 : index
    %c0_10 = arith.constant 0 : index
    %9 = vector.load %arg2[%c0_8, %c0_9, %c0_10] : memref<1x8x32xf32, #tpu.memory_space<vmem>>, vector<1x8x32xf32>
    %10 = vector.shape_cast %9 : vector<1x8x32xf32> to vector<8x32xf32>
    %cst_11 = arith.constant dense<0.000000e+00> : vector<1x32xf32>
    %11 = tpu.matmul %1, %10, %cst_11 {dimension_numbers = #tpu.dot_dimension_numbers<[1], [0], [0], [1], [0, 0, 1, 1], [], []>} : vector<1x8xf32>, vector<8x32xf32>, vector<1x32xf32> -> vector<1x32xf32>
    %12 = vector.broadcast %3 : vector<1x1xf32> to vector<1x32xf32>
    %13 = arith.mulf %11, %12 : vector<1x32xf32>
    %c0_12 = arith.constant 0 : index
    %c0_13 = arith.constant 0 : index
    %c0_14 = arith.constant 0 : index
    %14 = vector.load %arg7[%c0_12, %c0_13, %c0_14] : memref<1x1x32xf32, #tpu.memory_space<vmem>>, vector<1x1x32xf32>
    %15 = vector.shape_cast %14 : vector<1x1x32xf32> to vector<1x32xf32>
    %16 = vector.shape_cast %8 : vector<1x32xf32> to vector<1x1x32xf32>
    tpu.vector_store %arg7[%c0_12, %c0_13, %c0_14], %16 {strides = array<i32>} : memref<1x1x32xf32, #tpu.memory_space<vmem>>, vector<1x1x32xf32>,
    %c0_15 = arith.constant 0 : index
    %c0_16 = arith.constant 0 : index
    %c0_17 = arith.constant 0 : index
    %17 = vector.load %arg8[%c0_15, %c0_16, %c0_17] : memref<1x1x32xf32, #tpu.memory_space<vmem>>, vector<1x1x32xf32>
    %18 = vector.shape_cast %17 : vector<1x1x32xf32> to vector<1x32xf32>
    %19 = vector.shape_cast %13 : vector<1x32xf32> to vector<1x1x32xf32>
    tpu.vector_store %arg8[%c0_15, %c0_16, %c0_17], %19 {strides = array<i32>} : memref<1x1x32xf32, #tpu.memory_space<vmem>>, vector<1x1x32xf32>,
    %c0_18 = arith.constant 0 : index
    %c0_19 = arith.constant 0 : index
    %20 = vector.load %arg5[%c0_18, %c0_19] : memref<32x3xf32, #tpu.memory_space<vmem>>, vector<32x3xf32>
    %cst_20 = arith.constant dense<0.000000e+00> : vector<1x3xf32>
    %21 = tpu.matmul %13, %20, %cst_20 {dimension_numbers = #tpu.dot_dimension_numbers<[1], [0], [0], [1], [0, 0, 1, 1], [], []>} : vector<1x32xf32>, vector<32x3xf32>, vector<1x3xf32> -> vector<1x3xf32>
    %c0_21 = arith.constant 0 : index
    %c0_22 = arith.constant 0 : index
    %22 = vector.load %arg6[%c0_21, %c0_22] : memref<1x3xf32, #tpu.memory_space<vmem>>, vector<1x3xf32>
    %23 = arith.addf %21, %22 : vector<1x3xf32>
    %24 = arith.negf %23 : vector<1x3xf32>
    %25 = math.exp %24 : vector<1x3xf32>
    %cst_23 = arith.constant 1.000000e+00 : f32
    %26 = vector.broadcast %cst_23 : f32 to vector<1x3xf32>
    %27 = arith.addf %26, %25 : vector<1x3xf32>
    %28 = arith.divf %26, %27 : vector<1x3xf32>
    %c0_24 = arith.constant 0 : index
    %c0_25 = arith.constant 0 : index
    %c0_26 = arith.constant 0 : index
    %29 = vector.load %arg9[%c0_24, %c0_25, %c0_26] : memref<1x1x3xf32, #tpu.memory_space<vmem>>, vector<1x1x3xf32>
    %30 = vector.shape_cast %29 : vector<1x1x3xf32> to vector<1x3xf32>
    %31 = vector.shape_cast %28 : vector<1x3xf32> to vector<1x1x3xf32>
    tpu.vector_store %arg9[%c0_24, %c0_25, %c0_26], %31 {strides = array<i32>} : memref<1x1x3xf32, #tpu.memory_space<vmem>>, vector<1x1x3xf32>,
    return
  }
  func.func @transform_0(%arg0: i32) -> (i32, i32, i32) {
    %c0_i32 = arith.constant 0 : i32
    %c0_i32_0 = arith.constant 0 : i32
    %c0_i32_1 = arith.constant 0 : i32
    return %arg0, %c0_i32, %c0_i32_0 : i32, i32, i32
  }
  func.func @transform_1(%arg0: i32) -> (i32, i32, i32) {
    %c0_i32 = arith.constant 0 : i32
    %c0_i32_0 = arith.constant 0 : i32
    %c0_i32_1 = arith.constant 0 : i32
    return %arg0, %c0_i32, %c0_i32_0 : i32, i32, i32
  }
  func.func @transform_2(%arg0: i32) -> (i32, i32, i32) {
    %c0_i32 = arith.constant 0 : i32
    %c0_i32_0 = arith.constant 0 : i32
    %c0_i32_1 = arith.constant 0 : i32
    return %arg0, %c0_i32, %c0_i32_0 : i32, i32, i32
  }
  func.func @transform_3(%arg0: i32) -> (i32, i32, i32) {
    %c0_i32 = arith.constant 0 : i32
    %c0_i32_0 = arith.constant 0 : i32
    %c0_i32_1 = arith.constant 0 : i32
    return %arg0, %c0_i32, %c0_i32_0 : i32, i32, i32
  }
  func.func @transform_4(%arg0: i32) -> (i32, i32) {
    %c0_i32 = arith.constant 0 : i32
    %c0_i32_0 = arith.constant 0 : i32
    %c0_i32_1 = arith.constant 0 : i32
    return %c0_i32, %c0_i32_0 : i32, i32
  }
  func.func @transform_5(%arg0: i32) -> (i32, i32) {
    %c0_i32 = arith.constant 0 : i32
    %c0_i32_0 = arith.constant 0 : i32
    %c0_i32_1 = arith.constant 0 : i32
    return %c0_i32, %c0_i32_0 : i32, i32
  }
  func.func @transform_6(%arg0: i32) -> (i32, i32, i32) {
    %c0_i32 = arith.constant 0 : i32
    %c0_i32_0 = arith.constant 0 : i32
    %c0_i32_1 = arith.constant 0 : i32
    return %arg0, %c0_i32, %c0_i32_0 : i32, i32, i32
  }
  func.func @transform_7(%arg0: i32) -> (i32, i32, i32) {
    %c0_i32 = arith.constant 0 : i32
    %c0_i32_0 = arith.constant 0 : i32
    %c0_i32_1 = arith.constant 0 : i32
    return %arg0, %c0_i32, %c0_i32_0 : i32, i32, i32
  }
  func.func @transform_8(%arg0: i32) -> (i32, i32, i32) {
    %c0_i32 = arith.constant 0 : i32
    %c0_i32_0 = arith.constant 0 : i32
    %c0_i32_1 = arith.constant 0 : i32
    return %arg0, %c0_i32, %c0_i32_0 : i32, i32, i32
  }
}

</mosaic_0001>

<bundles_post_ra>
// kernel: ehr_transformer_forward.7
= control target key start
LH: loop header
LB: loop body
LE: loop exit
PB: predicated region body
PF: predicated region fallthrough
CT: control target
= control target key end

     0   :  { %14 = vsyncpa [#allocation3], 0  ;;  %s1281_s0 = inlined_call_operand.vmem [shape: f32[2,8,32], index: 0, kind: input, shape index: {}]   ;;  %s1282_s1 = inlined_call_operand.vmem [shape: f32[2,8,32], index: 1, kind: input, shape index: {}]   ;;  %s1283_s2 = inlined_call_operand.vmem [shape: f32[2,1,8], index: 2, kind: input, shape index: {}]   ;;  %s1284_s3 = inlined_call_operand.vmem [shape: f32[2,1,1], index: 3, kind: input, shape index: {}]   ;;  %s1285_s4 = inlined_call_operand.vmem [shape: f32[32,3], index: 4, kind: input, shape index: {}]   ;;  %s1286_s5 = inlined_call_operand.vmem [shape: f32[1,3], index: 5, kind: input, shape index: {}]   ;;  %s1287_s6 = inlined_call_operand.hbm [shape: f32[2,1,32], index: 6, kind: output, shape index: {0}]   ;;  %s1288_s7 = inlined_call_operand.hbm [shape: f32[2,1,32], index: 7, kind: output, shape index: {1}]   ;;  %s1289_s8 = inlined_call_operand.hbm [shape: f32[2,1,3], index: 8, kind: output, shape index: {2}]  }
   0x1   :  { %16 = vsyncpa [#allocation3 + $0x1], 0 }
   0x2   :  { %17 = vsyncpa [#allocation5], 0 }
   0x3   :  { %19 = vsyncpa [#allocation5 + $0x1], 0  ;;  %s1080_s27 = smov 0   ;;  %s1082_s28 = smov 0  }
   0x4   :  { %s1084_s29 = smov 0   ;;  %s1086_s30 = smov 0  }
   0x5 LB: > { %s1101_s9 = sadd.s32 4294967295, %s1026_s30   ;;  %s1290_s10 = sadd.s32 4294967294, %s1026_s30   ;;  %s1026_s30 = sphi %s1086_s30, %s1299_s30   ;;  %s1022_s29 = sphi %s1084_s29, %s1298_s29   ;;  %s1018_s28 = sphi %s1082_s28, %s1297_s28   ;;  %s1014_s27 = sphi %s1080_s27, %s1296_s27  }
   0x6   : > { %s1105_s11 = sadd.s32 1, %s1026_s30   ;;  %s178_s12 = sadd.s32 1, %s1022_s29 }
   0x7   : > { %s175_s13 = ssub.s32 %s1026_s30, %s1105_s11  ;;  %p188_p0 = scmp.ne.s32.totalorder %s1022_s29, %s1018_s28 }
   0x8   : > { %p176_p1 = scmp.eq.s32.totalorder %s175_s13, 0  ;;  %p189_p2 = scmp.eq.s32.totalorder %s1101_s9, 1 }
   0x9   : > { %p194_p3 = scmp.ne.s32.totalorder %s1018_s28, %s1014_s27  ;;  %p195_p4 = scmp.eq.s32.totalorder %s1290_s10, 1 }
   0xa   : > { %s1118_s14 = scalar_select %p176_p1, %s1022_s29, %s178_s12  }
   0xb   : > { %p1120_p5 = por %p189_p2, %p188_p0  ;;  %p1124_p6 = por %p195_p4, %p194_p3 }
   0xc   : > { %1291 = sst [smem:[#allocation9_spill]] %s1118_s14  ;;  %p798_p7 = scmp.ge.s32.totalorder %s1026_s30, 1 }
   0xd   : > { %p297_p8 = scmp.lt.s32.totalorder %s1026_s30, 3 }
   0xf   : > { %p298_p9 = pnand %p798_p7, %p297_p8 }
  0x10   : > { %p347_p10 = scmp.lt.s32.totalorder (!%p298_p9), %s1101_s9, 1  ;;  %v1028_v0 = vmov (!%p298_p9), 0.0   ;;  %vm1029_vm0 = vmmov (!%p298_p9), 0   ;;  %v1030_v1 = vmov (!%p298_p9), 0   ;;  %v1031_v2 = vmov (!%p298_p9), 0.0|0.0   ;;  %v523_v7 = vld [vmem:[%s1285_s4] sm:$0xff] (!%p298_p9) }
  0x11   : > { %301 = sbr.rel (%p298_p9) target bundleno = 502 (0x1f6), region = 44  ;;  %819 = vmatprep.subr.mxu1 (!%p298_p9), %v1028_v0  ;;  %821 = vmatprep.mubr.msk.f32.mxu1 (!%p298_p9), %vm1029_vm0, %v1028_v0  ;;  %vm364_vm1 = vcmask (!%p298_p9), 64512   ;;  %v524_v8 = vld [vmem:[%s1285_s4 + $0x8] sm:$0xff] (!%p298_p9)  ;;  %v525_v10 = vld [vmem:[%s1285_s4 + $0x10] sm:$0xff] (!%p298_p9)  ;;  %v526_v11 = vld [vmem:[%s1285_s4 + $0x18] sm:$0xff] (!%p298_p9)  ;;  %v443_v13 = vlaneseq (!%p298_p9)  ;;  %s1160_s23 = sand.u32 (!%p298_p9), 1, %s1018_s28  }
  0x12   : > { %899 = vset.pattern.permute.xlu0 (!%p298_p9), %v1030_v1  ;;  %840 = vmatprep.subr.bf16.mxu0 (!%p298_p9), %v1031_v2  ;;  %v841_v9 = vpack.c.bf16 (!%p298_p9), %v524_v8, %v523_v7  ;;  %v844_v12 = vpack.c.bf16 (!%p298_p9), %v526_v11, %v525_v10  ;;  %vm520_vm2 = vcmask (!%p298_p9), 253952   ;;  %vm528_vm3 = vcmask (!%p298_p9), 261120   ;;  %s340_s25 = scalar_lea.vmem (!%p298_p9), [#allocation4], %s1160_s23  ;;  %s614_s26 = sand.u32 (!%p298_p9), 1, %s1101_s9  }
  0x13   : > { %837 = vmatprep.mubr.msk.f32.mxu0 (!%p298_p9), %vm1029_vm0, %v1028_v0  ;;  %v444_v14 = vshrl.u32 (!%p298_p9), %v443_v13, 7  ;;  %s644_s20 = sshll.u32 (!%p298_p9), %s340_s25, 4  ;;  %s1032_s22 = smov (!%p298_p9), [#allocation4]   ;;  %s1176_s20 = int_to_ptr.vmem [resolvable:$true] %s644_s20 }
  0x14   : > { %842 = vmatpush3.bf16.msra.mxu0 (!%p298_p9), %v841_v9  ;;  %s908_s13 = sshll.u32 (!%p298_p9), %s1032_s22, 4  ;;  %s909_s13 = int_to_ptr.vmem [resolvable:$false] %s908_s13 }
  0x15   : > { %843 = vmatprep.subr.bf16.mxu0 (!%p298_p9), %v1031_v2  ;;  %v445_v15 = vsub.s32 (!%p298_p9), 0, %v444_v14  ;;  %p911_p0 = scmp.lt.s32.totalorder (!%p298_p9), %s1176_s20, %s909_s13 }
  0x18   : > { %s348_s17 = scalar_select %p347_p10, %s1101_s9, 1  ;;  %845 = vmatpush3.bf16.msra.mxu0 %v844_v12 }
  0x1a   : > { %s799_s18 = sshll.u32 %s348_s17, 3  ;;  %s357_s21 = scalar_lea.vmem %s1283_s2, %s348_s17 }
  0x1b   : > { %s350_s24 = scalar_lea.vmem %s1281_s0, %s799_s18  ;;  %s354_s12 = scalar_lea.vmem %s1282_s1, %s799_s18  ;;  %v361_v3 = vld [vmem:[%s357_s21] sm:$0x1] }
  0x1c   : > { %v363_v4 = vld [vmem:[%s350_s24] sm:$0xff]  ;;  %s360_s14 = scalar_lea.vmem %s1284_s3, %s348_s17  ;;  %s334_s24 = scalar_lea.vmem [#allocation2], %s1160_s23 }
  0x1d   : > { %v448_v5 = vld [vmem:[%s354_s12] sm:$0xff]  ;;  %820 = vmatpush3.msra.mxu1 %v363_v4  ;;  %s1168_s12 = sshll.u32 %s1101_s9, 4  ;;  %s1184_s9 = scalar_lea.sflag [#allocation5], %s614_s26 }
  0x1e   : > { %v362_v6 = vld [vmem:[%s360_s14] sm:$0x1]  ;;  %822 = vmatmul.mubr.msk.f32.vlgmr.msra.gmra.mrb[0].mxu1 %vm364_vm1, %v361_v3  ;;  %824 = vmatprep.subr.mxu1 %v1028_v0  ;;  %s1174_s18 = scalar_lea.hbm %s1288_s7, %s1168_s12  ;;  %s1182_s14 = scalar_lea.hbm %s1287_s6, %s1168_s12 }
  0x1f   : > { %825 = vmatpush3.msra.mxu1 %v448_v5  ;;  %826 = vmatprep.mubr.msk.f32.mxu1 %vm1029_vm0, %v1028_v0  ;;  %s904_s17 = scalar_lea.vmem %s1176_s20, 16 }
  0x20   : > { %440 = vperm.xlu0 %899, %v362_v6   ;;  %p905_p11 = scmp.ne.s32.totalorder %s1176_s20, %s904_s17 }
  0x22   : > { %827 = vmatmul.mubr.msk.f32.vlgmr.msra.gmra.mrb[2].mxu1 %vm364_vm1, %v361_v3  ;;  %p906_p12 = pnand %p905_p11, %p1120_p5 }
  0x24   : > { %p907_p13 = pneg %p906_p12 }
  0x9f   : > { %v441_v16 = vpop.permute.xlu0 %440 }
  0xa0   : > { %v446_v17 = vrot.slane %v441_v16, %v445_v15 }
  0xf1   : > { %v434_v18 = vpop.f32.mrb[0].mxu1 }
  0xf2   : > { %v447_v19 = vmul.f32 %v446_v17, %v434_v18  ;;  %v823_v20 = vpop.f32.mrb[1].mxu1 }
  0xf4   : > { %521 = vst.msk [vmem:[%s334_s24] sm:$0x1] %vm520_vm2, %v447_v19 }
  0xf5   : > { %v515_v21 = vpop.f32.mrb[2].mxu1 }
  0xf6   : > { %v519_v22 = vmul.f32 %v515_v21, %v446_v17  ;;  %v828_v23 = vpop.f32.mrb[3].mxu1 }
  0xf8   : > { %838 = vmatmul.mubr.msk.f32.vlgmr.msra.gmra.mrb[0].mxu0 %vm528_vm3, %v519_v22  ;;  %522 = vst.msk [vmem:[%s340_s25] sm:$0x1] %vm520_vm2, %v519_v22  ;;  %s910_s25 = scalar_lea.vmem %s909_s13, 32 }
  0xf9   : > { %p912_p1 = scmp.lt.s32.totalorder %s910_s25, %s904_s17 }
  0xfb   : > { %p913_p2 = por %p912_p1, %p911_p0 }
  0xfd   : > { %p914_p3 = pnand %p913_p2, %p907_p13 }
  0xff   : > { %917 = shalt.err (!%p914_p3)
}
 0x100   : > { %s918_s26 = scalar_lea.hbm %s1174_s18, 16  ;;  %s922_s10 = scalar_lea.hbm %s1288_s7, 32 }
 0x101   : > { %p919_p4 = scmp.ne.s32.totalorder %s1174_s18, %s918_s26  ;;  %p923_p9 = scmp.lt.u32.totalorder %s1174_s18, %s1288_s7 }
 0x102   : > { %p924_p10 = scmp.lt.u32.totalorder %s922_s10, %s918_s26  ;;  %p926_p12 = scmp.lt.u32.totalorder %s918_s26, %s1174_s18 }
 0x103   : > { %p920_p7 = pnand %p919_p4, %p1120_p5 }
 0x104   : > { %p925_p11 = por %p924_p10, %p923_p9 }
 0x105   : > { %p921_p8 = pneg %p920_p7 }
 0x106   : > { %p927_p13 = por %p926_p12, %p925_p11 }
 0x108   : > { %p928_p0 = pnand %p927_p13, %p921_p8 }
 0x10a   : > { %931 = shalt.err (!%p928_p0)
}
 0x10b   : > { %847 = dma.vmem_to_hbm [thread:$0]  (%p1120_p5), %s1176_s20, 16, %s1174_s18, %s1184_s9  }
 0x10c   : > { %s631_s17 = sshll.u32 %s334_s24, 4  ;;  %s611_s25 = scalar_lea.sflag [#allocation3], %s1160_s23  ;;  %s632_s17 = int_to_ptr.vmem [resolvable:$true] %s631_s17 }
 0x10d   : > { %s932_s19 = scalar_lea.vmem %s632_s17, 16  ;;  %s1033_s26 = smov [#allocation2]  }
 0x10e   : > { %p933_p1 = scmp.ne.s32.totalorder %s632_s17, %s932_s19  ;;  %s936_s21 = sshll.u32 %s1033_s26, 4  ;;  %s937_s21 = int_to_ptr.vmem [resolvable:$false] %s936_s21 }
 0x10f   : > { %s938_s10 = scalar_lea.vmem %s937_s21, 32  ;;  %p939_p4 = scmp.lt.s32.totalorder %s632_s17, %s937_s21 }
 0x110   : > { %p934_p2 = pnand %p933_p1, %p1120_p5  ;;  %p940_p7 = scmp.lt.s32.totalorder %s938_s10, %s932_s19 }
 0x112   : > { %p935_p3 = pneg %p934_p2  ;;  %p941_p8 = por %p940_p7, %p939_p4 }
 0x114   : > { %p942_p9 = pnand %p941_p8, %p935_p3 }
 0x116   : > { %945 = shalt.err (!%p942_p9)
}
 0x117   : > { %s946_s24 = scalar_lea.hbm %s1182_s14, 16  ;;  %s950_s22 = scalar_lea.hbm %s1287_s6, 32 }
 0x118   : > { %p947_p10 = scmp.ne.s32.totalorder %s1182_s14, %s946_s24  ;;  %p951_p13 = scmp.lt.u32.totalorder %s1182_s14, %s1287_s6 }
 0x119   : > { %p952_p0 = scmp.lt.u32.totalorder %s950_s22, %s946_s24  ;;  %p954_p2 = scmp.lt.u32.totalorder %s946_s24, %s1182_s14 }
 0x11a   : > { %p948_p11 = pnand %p947_p10, %p1120_p5 }
 0x11b   : > { %p953_p1 = por %p952_p0, %p951_p13 }
 0x11c   : > { %p949_p12 = pneg %p948_p11 }
 0x11d   : > { %p955_p3 = por %p954_p2, %p953_p1 }
 0x11f   : > { %p956_p4 = pnand %p955_p3, %p949_p12 }
 0x121   : > { %959 = shalt.err (!%p956_p4)
}
 0x122   : > { %846 = dma.vmem_to_hbm [thread:$0]  (%p1120_p5), %s632_s17, 16, %s1182_s14, %s611_s25   ;;  %v527_v24 = vld [vmem:[%s1286_s5] sm:$0x1]  ;;  %vm608_vm4 = vcmask 16384  }
 0x123   : > { %s346_s10 = scalar_lea.vmem [#allocation6], %s1160_s23  ;;  %s1236_s14 = scalar_lea.hbm %s1289_s8, %s1168_s12 }
 0x124   : > { %s657_s24 = sshll.u32 %s346_s10, 4  ;;  %s1034_s23 = smov [#allocation6]   ;;  %s1238_s24 = int_to_ptr.vmem [resolvable:$true] %s657_s24 }
 0x125   : > { %s960_s17 = scalar_lea.vmem %s1238_s24, 16  ;;  %s964_s25 = sshll.u32 %s1034_s23, 4  ;;  %s965_s25 = int_to_ptr.vmem [resolvable:$false] %s964_s25 }
 0x126   : > { %p961_p7 = scmp.ne.s32.totalorder %s1238_s24, %s960_s17  ;;  %s966_s22 = scalar_lea.vmem %s965_s25, 32 }
 0x127   : > { %p967_p10 = scmp.lt.s32.totalorder %s1238_s24, %s965_s25  ;;  %p968_p11 = scmp.lt.s32.totalorder %s966_s22, %s960_s17 }
 0x128   : > { %p962_p8 = pnand %p961_p7, %p1120_p5 }
 0x129   : > { %p969_p12 = por %p968_p11, %p967_p10 }
 0x12a   : > { %p963_p9 = pneg %p962_p8 }
 0x12c   : > { %p970_p13 = pnand %p969_p12, %p963_p9 }
 0x1cb   : > { %v598_v25 = vpop.f32.mrb[0].mxu0 }
 0x1cc   : > { %v599_v26 = vadd.f32 %v598_v25, %v527_v24  ;;  %v839_v27 = vpop.f32.mrb[1].mxu0 }
 0x1ce   : > { %v804_v28 = vmul.f32 -1.442695, %v599_v26 }
 0x1d0   : > { %900 = vpow2.f32 %v804_v28 }
 0x1da   : > { %v901_v29 = vpop.eup %900 }
 0x1db   : > { %v605_v30 = vadd.f32 1.0, %v901_v29 }
 0x1dd   : > { %902 = vrcp.f32 %v605_v30 }
 0x1e7   : > { %v903_v31 = vpop.eup %902 }
 0x1e8   : > { %609 = vst.msk [vmem:[%s346_s10] sm:$0x1] %vm608_vm4, %v903_v31 }
 0x1e9   : > { %973 = shalt.err (!%p970_p13)
}
 0x1ea   : > { %s974_s12 = scalar_lea.hbm %s1236_s14, 16  ;;  %s978_s19 = scalar_lea.hbm %s1289_s8, 32 }
 0x1eb   : > { %p975_p0 = scmp.ne.s32.totalorder %s1236_s14, %s974_s12  ;;  %p979_p3 = scmp.lt.u32.totalorder %s1236_s14, %s1289_s8 }
 0x1ec   : > { %p980_p4 = scmp.lt.u32.totalorder %s978_s19, %s974_s12  ;;  %p982_p8 = scmp.lt.u32.totalorder %s974_s12, %s1236_s14 }
 0x1ed   : > { %p976_p1 = pnand %p975_p0, %p1120_p5 }
 0x1ee   : > { %p981_p7 = por %p980_p4, %p979_p3 }
 0x1ef   : > { %p977_p2 = pneg %p976_p1 }
 0x1f0   : > { %p983_p9 = por %p982_p8, %p981_p7 }
 0x1f2   : > { %p984_p10 = pnand %p983_p9, %p977_p2 }
 0x1f4   : > { %987 = shalt.err (!%p984_p10)
}
 0x1f5   : > { %848 = dma.vmem_to_hbm [thread:$0]  (%p1120_p5), %s1238_s24, 16, %s1236_s14, %s1184_s9  }
 0x1f6 PF: > { %p862_p11 = scmp.ge.s32.totalorder %s1026_s30, 2  ;;  %s669_s18 = sand.u32 1, %s1014_s27  }
 0x1f7   : > { %s670_s20 = scalar_lea.sflag [#allocation3], %s669_s18 }
 0x1f8   : > { %p853_p12 = pnand %p862_p11, %p1124_p6 }
 0x1fa   : > { %1005 = dma.done.wait (!%p853_p12), %s670_s20, 16  }
 0x1fb   : > { %1007 = vsyncadd (!%p853_p12), %s670_s20, 4294967280  ;;  %s1294_s17 = sadd.s32 4294967294, %s1026_s30  }
 0x1fc   : > { %s677_s23 = sand.u32 1, %s1294_s17  }
 0x1fd   : > { %s678_s25 = scalar_lea.sflag [#allocation5], %s677_s23 }
 0x1fe   : > { %1009 = dma.done.wait (!%p853_p12), %s678_s25, 32  }
 0x1ff   : > { %1011 = vsyncadd (!%p853_p12), %s678_s25, 4294967264  ;;  %s1295_s15 = sld [smem:[#allocation9_spill]]  ;;  %p22_p5 = scmp.ge.s32.totalorder %s1105_s11, 4  }
 0x200   : > { %s1296_s27 = smov %s1018_s28  ;;  %s1297_s28 = smov %s1022_s29 }
 0x201   : > { %s1299_s30 = smov %s1105_s11  ;;  %24 = sbr.rel (!%p22_p5) target bundleno = 5 (0x5), region = 120 }
 0x205   : > { %s1298_s29 = smov %s1295_s15 }
 0x208   :  { %690 = vsyncpa [#allocation3], 1 }
 0x209   :  { %692 = vsyncpa [#allocation3 + $0x1], 1 }
 0x20a   :  { %693 = vsyncpa [#allocation5], 1 }
 0x20b   :  { %695 = vsyncpa [#allocation5 + $0x1], 1 }

// kernel: ehr_transformer_forward.6
= control target key start
LH: loop header
LB: loop body
LE: loop exit
PB: predicated region body
PF: predicated region fallthrough
CT: control target
= control target key end

     0   :  { %s5424_s27 = smov 0   ;;  %s6895_s0 = inlined_call_operand.vmem [shape: f32[2,8,32], index: 0, kind: input, shape index: {}]   ;;  %s6896_s1 = inlined_call_operand.vmem [shape: f32[2,1,8], index: 1, kind: input, shape index: {}]   ;;  %s6897_s2 = inlined_call_operand.vmem [shape: f32[4,32,8], index: 2, kind: input, shape index: {}]   ;;  %s6898_s3 = inlined_call_operand.vmem [shape: f32[4,32,8], index: 3, kind: input, shape index: {}]   ;;  %s6899_s4 = inlined_call_operand.vmem [shape: f32[4,32,8], index: 4, kind: input, shape index: {}]   ;;  %s6900_s5 = inlined_call_operand.vmem [shape: f32[4,1,8], index: 5, kind: input, shape index: {}]   ;;  %s6901_s6 = inlined_call_operand.vmem [shape: f32[4,1,8], index: 6, kind: input, shape index: {}]   ;;  %s6902_s7 = inlined_call_operand.vmem [shape: f32[4,1,8], index: 7, kind: input, shape index: {}]   ;;  %s6903_s8 = inlined_call_operand.vmem [shape: f32[4,8,32], index: 8, kind: input, shape index: {}]   ;;  %s6904_s9 = inlined_call_operand.vmem [shape: f32[1,32], index: 9, kind: input, shape index: {}]   ;;  %s6905_s10 = inlined_call_operand.vmem [shape: f32[1,32], index: 10, kind: input, shape index: {}]   ;;  %s6906_s11 = inlined_call_operand.vmem [shape: f32[1,32], index: 11, kind: input, shape index: {}]   ;;  %s6907_s12 = inlined_call_operand.vmem [shape: f32[32,2048], index: 12, kind: input, shape index: {}]   ;;  %s6908_s13 = inlined_call_operand.vmem [shape: f32[1,2048], index: 13, kind: input, shape index: {}]   ;;  %s6909_s14 = inlined_call_operand.vmem [shape: f32[2048,32], index: 14, kind: input, shape index: {}]   ;;  %s6910_s15 = inlined_call_operand.vmem [shape: f32[1,32], index: 15, kind: input, shape index: {}]   ;;  %s6911_s16 = inlined_call_operand.vmem [shape: f32[1,32], index: 16, kind: input, shape index: {}]   ;;  %s6912_s17 = inlined_call_operand.vmem [shape: f32[1,32], index: 17, kind: input, shape index: {}]   ;;  %s6913_s18 = inlined_call_operand.vmem [shape: f32[2,8,32], index: 18, kind: output, shape index: {}]  }
   0x1   :  { %6916 = sst [smem:[#allocation2_spill]] %s6895_s0 }
   0x2   :  { %6917 = sst [smem:[#allocation3_spill]] %s6896_s1 }
   0x3   :  { %6918 = sst [smem:[#allocation4_spill]] %s6897_s2 }
   0x4 LB: > { %s4227_s28 = sadd.s32 4294967295, %s5324_s27   ;;  %p4231_p0 = scmp.ge.s32.totalorder %s5324_s27, 1  ;;  %s5324_s27 = sphi %s5424_s27, %s28_s27  }
   0x5   : > { %p519_p1 = scmp.lt.s32.totalorder %s5324_s27, 3 }
   0x7   : > { %p520_p2 = pnand %p4231_p0, %p519_p1 }
   0x8   : > { %v672_v0 = vld [vmem:[%s6898_s3] sm:$0xff] (!%p520_p2)  ;;  %v673_v1 = vld [vmem:[%s6898_s3 + $0x8] sm:$0xff] (!%p520_p2)  ;;  %s6919_s21 = sld [smem:[#allocation4_spill]] (!%p520_p2)  ;;  %v5326_v3 = vmov (!%p520_p2), 0.0|0.0   ;;  %v674_v6 = vld [vmem:[%s6898_s3 + $0x10] sm:$0xff] (!%p520_p2)  ;;  %p574_p3 = scmp.lt.s32.totalorder (!%p520_p2), %s4227_s28, 1 }
   0x9   : > { %523 = sbr.rel (%p520_p2) target bundleno = 5046 (0x13b6), region = 92  ;;  %4901 = vmatprep.subr.bf16.mxu1 (!%p520_p2), %v5326_v3  ;;  %v4902_v4 = vpack.c.bf16 (!%p520_p2), %v673_v1, %v672_v0  ;;  %4895 = vmatprep.subr.bf16.mxu0 (!%p520_p2), %v5326_v3  ;;  %v675_v7 = vld [vmem:[%s6898_s3 + $0x18] sm:$0xff] (!%p520_p2)  ;;  %vm5327_vm0 = vmmov (!%p520_p2), 0   ;;  %v5328_v11 = vmov (!%p520_p2), 0.0   ;;  %s6920_s2 = sld [smem:[#allocation2_spill]] (!%p520_p2)  ;;  %vm598_vm1 = vcmask (!%p520_p2), 261120  }
   0xa   : > { %4722 = vmatprep.mubr.msk.f32.mxu1 (!%p520_p2), %vm5327_vm0, %v5328_v11  ;;  %4711 = vmatprep.mubr.msk.f32.mxu0 (!%p520_p2), %vm5327_vm0, %v5328_v11  ;;  %v4905_v12 = vpack.c.bf16 (!%p520_p2), %v675_v7, %v674_v6  ;;  %v4236_v15 = vld [vmem:[%s6901_s6] ss:$0 sm:$0xff] (!%p520_p2)  ;;  %vm834_vm2 = vcmask (!%p520_p2), 64512   ;;  %v754_v24 = vld [vmem:[%s6899_s4 + $0x8] sm:$0xff] (!%p520_p2)  ;;  %v755_v25 = vld [vmem:[%s6899_s4 + $0x10] sm:$0xff] (!%p520_p2)  ;;  %s6921_s29 = sld [smem:[#allocation3_spill]] (!%p520_p2) }
   0xb   : > { %4903 = vmatpush3.bf16.msra.mxu1 (!%p520_p2), %v4902_v4  ;;  %v4234_v16 = vld [vmem:[%s6900_s5] ss:$0 sm:$0xff] (!%p520_p2)  ;;  %v756_v27 = vld [vmem:[%s6899_s4 + $0x18] sm:$0xff] (!%p520_p2)  ;;  %v4252_v52 = vld [vmem:[%s6898_s3 + $0x28] sm:$0xff] (!%p520_p2) }
   0xc   : > { %4904 = vmatprep.subr.bf16.mxu1 (!%p520_p2), %v5326_v3  ;;  %v753_v23 = vld [vmem:[%s6899_s4] sm:$0xff] (!%p520_p2)  ;;  %v4911_v28 = vpack.c.bf16 (!%p520_p2), %v756_v27, %v755_v25  ;;  %v4253_v56 = vld [vmem:[%s6898_s3 + $0x30] sm:$0xff] (!%p520_p2)  ;;  %v4254_v57 = vld [vmem:[%s6898_s3 + $0x38] sm:$0xff] (!%p520_p2) }
   0xd   : > { %v4908_v26 = vpack.c.bf16 (!%p520_p2), %v754_v24, %v753_v23  ;;  %v4238_v41 = vld [vmem:[%s6902_s7] ss:$0 sm:$0xff] (!%p520_p2)  ;;  %v4923_v58 = vpack.c.bf16 (!%p520_p2), %v4254_v57, %v4253_v56  ;;  %v4256_v63 = vld [vmem:[%s6901_s6 + $0x1] ss:$0 sm:$0xff] (!%p520_p2)  ;;  %v4259_v7 = vld [vmem:[%s6899_s4 + $0x28] sm:$0xff] (!%p520_p2) }
   0xe   : > { %v587_v2 = vld [vmem:[%s6919_s21] sm:$0xff] (!%p520_p2)  ;;  %v588_v5 = vld [vmem:[%s6919_s21 + $0x8] sm:$0xff] (!%p520_p2)  ;;  %v589_v9 = vld [vmem:[%s6919_s21 + $0x10] sm:$0xff] (!%p520_p2) }
   0xf   : > { %v4896_v8 = vpack.c.bf16 (!%p520_p2), %v588_v5, %v587_v2  ;;  %v590_v10 = vld [vmem:[%s6919_s21 + $0x18] sm:$0xff] (!%p520_p2)  ;;  %4906 = vmatpush3.bf16.msra.mxu1 (!%p520_p2), %v4905_v12  ;;  %v4244_v44 = vld [vmem:[%s6919_s21 + $0x20] sm:$0xff] (!%p520_p2)  ;;  %v4245_v45 = vld [vmem:[%s6919_s21 + $0x28] sm:$0xff] (!%p520_p2) }
  0x10   : > { %s6924_s28 = smov (!%p574_p3, %s4227_s28), 1  ;;  %v4899_v13 = vpack.c.bf16 %v590_v10, %v589_v9  ;;  %4736 = vmatprep.subr.mxu1 %v5328_v11  ;;  %v4914_v46 = vpack.c.bf16 %v4245_v45, %v4244_v44  ;;  %v4246_v47 = vld [vmem:[%s6919_s21 + $0x30] sm:$0xff]  ;;  %v4247_v48 = vld [vmem:[%s6919_s21 + $0x38] sm:$0xff]  ;;  %v4251_v51 = vld [vmem:[%s6898_s3 + $0x20] sm:$0xff] }
  0x11   : > { %4897 = vmatpush3.bf16.msra.mxu0 %v4896_v8  ;;  %s6915_s1 = sshll.u32 %s6924_s28, 3  ;;  %s580_s30 = scalar_lea.vmem %s6921_s29, %s6924_s28  ;;  %v4917_v49 = vpack.c.bf16 %v4247_v48, %v4246_v47  ;;  %v4920_v54 = vpack.c.bf16 %v4252_v52, %v4251_v51  ;;  %v4249_v0 = vld [vmem:[%s6900_s5 + $0x1] ss:$0 sm:$0xff]  ;;  %v4260_v8 = vld [vmem:[%s6899_s4 + $0x30] sm:$0xff]  ;;  %v4261_v10 = vld [vmem:[%s6899_s4 + $0x38] sm:$0xff] }
  0x12   : > { %4898 = vmatprep.subr.bf16.mxu0 %v5326_v3  ;;  %s577_s23 = scalar_lea.vmem %s6920_s2, %s6915_s1  ;;  %v5517_v30 = vld [vmem:[%s580_s30] ss:$0 sm:$0xff]  ;;  %v4929_v12 = vpack.c.bf16 %v4261_v10, %v4260_v8  ;;  %v4263_v25 = vld [vmem:[%s6902_s7 + $0x1] ss:$0 sm:$0xff]  ;;  %v4274_v44 = vld [vmem:[%s6919_s21 + $0x58] sm:$0xff]  ;;  %s6922_s1 = sshll.u32 %s6924_s28, 3 }
  0x13   : > { %v5472_v14 = vld [vmem:[%s577_s23] sm:$0xff]  ;;  %s584_s2 = scalar_lea.vmem %s6913_s18, %s6922_s1 }
  0x14   : > { %4723 = vmatmul.mubr.msk.f32.vlgmr.msra.gmra.mrb[0].mxu1 %vm598_vm1, %v5472_v14  ;;  %v4258_v6 = vld [vmem:[%s6899_s4 + $0x20] sm:$0xff] }
  0x15   : > { %4900 = vmatpush3.bf16.msra.mxu0 %v4899_v13  ;;  %4738 = vmatprep.mubr.msk.f32.mxu1 %vm5327_vm0, %v5328_v11  ;;  %v4926_v9 = vpack.c.bf16 %v4259_v7, %v4258_v6  ;;  %v4276_v57 = vld [vmem:[%s6900_s5 + $0x2] ss:$0 sm:$0xff] }
  0x16   : > { %4907 = vmatprep.subr.bf16.mxu0 %v5326_v3 }
  0x18   : > { %4712 = vmatmul.mubr.msk.f32.vlgmr.msra.gmra.mrb[0].mxu0 %vm598_vm1, %v5472_v14 }
  0x19   : > { %4733 = vmatprep.mubr.msk.f32.mxu0 %vm5327_vm0, %v5328_v11  ;;  %4909 = vmatpush3.bf16.msra.mxu0 %v4908_v26 }
  0x1a   : > { %4910 = vmatprep.subr.bf16.mxu0 %v5326_v3 }
  0x1d   : > { %4912 = vmatpush3.bf16.msra.mxu0 %v4911_v28  ;;  %v4268_v28 = vld [vmem:[%s6903_s8 + $0x8] sm:$0xff] }
  0x1e   : > { %4913 = vmatprep.subr.bf16.mxu0 %v5326_v3 }
  0x20   : > { %4734 = vmatmul.mubr.msk.f32.vlgmr.msra.gmra.mrb[2].mxu0 %vm598_vm1, %v5472_v14 }
  0x21   : > { %4754 = vmatprep.mubr.msk.f32.mxu0 %vm5327_vm0, %v5328_v11  ;;  %4915 = vmatpush3.bf16.msra.mxu0 %v4914_v46 }
  0x22   : > { %4916 = vmatprep.subr.bf16.mxu0 %v5326_v3 }
  0x25   : > { %4918 = vmatpush3.bf16.msra.mxu0 %v4917_v49 }
  0x26   : > { %4925 = vmatprep.subr.bf16.mxu0 %v5326_v3 }
  0x28   : > { %4755 = vmatmul.mubr.msk.f32.vlgmr.msra.gmra.mrb[4].mxu0 %vm598_vm1, %v5472_v14 }
  0x29   : > { %4776 = vmatprep.mubr.msk.f32.mxu0 %vm5327_vm0, %v5328_v11  ;;  %4927 = vmatpush3.bf16.msra.mxu0 %v4926_v9 }
  0x2a   : > { %4928 = vmatprep.subr.bf16.mxu0 %v5326_v3 }
  0x2d   : > { %4930 = vmatpush3.bf16.msra.mxu0 %v4929_v12 }
  0x2e   : > { %4789 = vmatprep.subr.mxu0 %v5328_v11 }
  0x30   : > { %4777 = vmatmul.mubr.msk.f32.vlgmr.msra.gmra.mrb[6].mxu0 %vm598_vm1, %v5472_v14 }
  0x31   : > { %4791 = vmatprep.mubr.msk.f32.mxu0 %vm5327_vm0, %v5328_v11  ;;  %4790 = vmatpush3.msra.mxu0 %v4268_v28  ;;  %v4300_v28 = vld [vmem:[%s6919_s21 + $0x78] sm:$0xff] }
  0x32   : > { %4931 = vmatprep.subr.bf16.mxu0 %v5326_v3 }
  0xe7   : > { %v749_v17 = vpop.f32.mrb[0].mxu1 }
  0xe8   : > { %v750_v18 = vadd.f32 %v4236_v15, %v749_v17  ;;  %v4724_v19 = vpop.f32.mrb[1].mxu1 }
  0xea   : > { %4737 = vmatpush3.xpose.msk.msra.mxu1 %vm834_vm2, %v750_v18 }
  0xeb   : > { %v668_v20 = vpop.f32.mrb[0].mxu0  ;;  %4741 = vmatprep.subr.mxu1 %v5328_v11 }
  0xec   : > { %v669_v21 = vadd.f32 %v4234_v16, %v668_v20  ;;  %v4713_v22 = vpop.f32.mrb[1].mxu0 }
  0xee   : > { %4739 = vmatmul.mubr.msk.f32.vlgmr.msra.gmra.mrb[2].mxu1 %vm834_vm2, %v669_v21 }
  0xef   : > { %4743 = vmatprep.mubr.msk.f32.mxu1 %vm5327_vm0, %v5328_v11 }
  0xf3   : > { %v830_v40 = vpop.f32.mrb[2].mxu0 }
  0xf4   : > { %v4735_v42 = vpop.f32.mrb[3].mxu0  ;;  %v831_v43 = vadd.f32 %v4238_v41, %v830_v40  ;;  %v4271_v40 = vld [vmem:[%s6919_s21 + $0x40] sm:$0xff]  ;;  %v4272_v41 = vld [vmem:[%s6919_s21 + $0x48] sm:$0xff] }
  0xf5   : > { %v4932_v42 = vpack.c.bf16 %v4272_v41, %v4271_v40 }
  0xf6   : > { %4742 = vmatpush3.msra.mxu1 %v831_v43  ;;  %v4273_v43 = vld [vmem:[%s6919_s21 + $0x50] sm:$0xff] }
  0xf7   : > { %4919 = vmatprep.subr.bf16.mxu1 %v5326_v3  ;;  %v4935_v47 = vpack.c.bf16 %v4274_v44, %v4273_v43  ;;  %v4309_v44 = vld [vmem:[%s6901_s6 + $0x3] ss:$0 sm:$0xff] }
  0xfb   : > { %v1083_v59 = vpop.f32.mrb[4].mxu0 }
  0xfc   : > { %v4756_v60 = vpop.f32.mrb[5].mxu0  ;;  %v1084_v5 = vadd.f32 %v4249_v0, %v1083_v59 }
 0x103   : > { %v1249_v24 = vpop.f32.mrb[6].mxu0 }
 0x104   : > { %v4778_v26 = vpop.f32.mrb[7].mxu0  ;;  %v1250_v27 = vadd.f32 %v4263_v25, %v1249_v24  ;;  %v4297_v24 = vld [vmem:[%s6919_s21 + $0x60] sm:$0xff]  ;;  %v4298_v25 = vld [vmem:[%s6919_s21 + $0x68] sm:$0xff] }
 0x105   : > { %v4950_v26 = vpack.c.bf16 %v4298_v25, %v4297_v24  ;;  %v2577_v25 = vld [vmem:[%s6907_s12 + $0x8] sm:$0xff] }
 0x1c1   : > { %v907_v29 = vpop.f32.mrb[2].mxu1 }
 0x1c2   : > { %v911_v31 = vmul.f32 0.35355338, %v907_v29  ;;  %v4740_v32 = vpop.f32.mrb[3].mxu1 }
 0x1c4   : > { %v918_v33 = vadd.f32 %v5517_v30, %v911_v31 }
 0x1c6   : > { %v919_v34 = vsel %vm834_vm2, %v918_v33, -inf }
 0x1c7   : > { %920 = vmax.xlane.f32.xlu0 %v919_v34  ;;  %v4278_v34 = vld [vmem:[%s6898_s3 + $0x40] sm:$0xff] }
 0x254   : > { %v921_v35 = vpop.xlane.xlu0 %920 }
 0x255   : > { %v922_v36 = vsub.f32 %v918_v33, %v921_v35  ;;  %v1003_v33 = vld [vmem:[%s6903_s8] sm:$0xff]  ;;  %v4279_v35 = vld [vmem:[%s6898_s3 + $0x48] sm:$0xff] }
 0x257   : > { %v923_v37 = vmul.f32 1.442695, %v922_v36  ;;  %v4938_v36 = vpack.c.bf16 %v4279_v35, %v4278_v34  ;;  %v4306_v34 = vld [vmem:[%s6898_s3 + $0x70] sm:$0xff]  ;;  %v4307_v35 = vld [vmem:[%s6898_s3 + $0x78] sm:$0xff] }
 0x259   : > { %5298 = vpow2.f32 %v923_v37  ;;  %v4280_v37 = vld [vmem:[%s6898_s3 + $0x50] sm:$0xff] }
 0x263   : > { %v5299_v38 = vpop.eup %5298 }
 0x264   : > { %v925_v39 = vsel %vm834_vm2, %v5299_v38, 0.0 }
 0x265   : > { %926 = vadd.xlane.f32.xlu0 %v925_v39 }
 0x2f2   : > { %v927_v50 = vpop.xlane.xlu0 %926 }
 0x2f3   : > { %5300 = vrcp.f32 %v927_v50  ;;  %v4283_v50 = vld [vmem:[%s6901_s6 + $0x2] ss:$0 sm:$0xff] }
 0x2fd   : > { %v5301_v53 = vpop.eup %5300 }
 0x2fe   : > { %v929_v55 = vmul.f32 %v5301_v53, %v5299_v38  ;;  %v4281_v38 = vld [vmem:[%s6898_s3 + $0x58] sm:$0xff] }
 0x2ff   : > { %v4941_v39 = vpack.c.bf16 %v4281_v38, %v4280_v37  ;;  %v4959_v38 = vpack.c.bf16 %v4307_v35, %v4306_v34  ;;  %v2578_v34 = vld [vmem:[%s6907_s12 + $0x10] sm:$0xff] }
 0x300   : > { %4744 = vmatmul.mubr.msk.f32.vlgmr.msra.gmra.mrb[4].mxu1 %vm834_vm2, %v929_v55  ;;  %v2594_v35 = vld [vmem:[%s6907_s12 + $0x90] sm:$0xff] }
 0x301   : > { %4921 = vmatpush3.bf16.msra.mxu1 %v4920_v54  ;;  %4765 = vmatprep.mubr.msk.f32.mxu1 %vm5327_vm0, %v5328_v11 }
 0x302   : > { %4922 = vmatprep.subr.bf16.mxu1 %v5326_v3 }
 0x305   : > { %4924 = vmatpush3.bf16.msra.mxu1 %v4923_v58 }
 0x306   : > { %4779 = vmatprep.subr.mxu1 %v5328_v11 }
 0x308   : > { %4766 = vmatmul.mubr.msk.f32.vlgmr.msra.gmra.mrb[6].mxu1 %vm598_vm1, %v5472_v14 }
 0x309   : > { %4781 = vmatprep.mubr.msk.f32.mxu1 %vm5327_vm0, %v5328_v11 }
 0x3d3   : > { %v999_v61 = vpop.f32.mrb[4].mxu1 }
 0x3d4   : > { %v4745_v62 = vpop.f32.mrb[5].mxu1 }
 0x3d5   : > { %v4286_v62 = vld [vmem:[%s6899_s4 + $0x48] sm:$0xff] }
 0x3db   : > { %v1166_v1 = vpop.f32.mrb[6].mxu1 }
 0x3dc   : > { %v1167_v2 = vadd.f32 %v4256_v63, %v1166_v1  ;;  %v4767_v4 = vpop.f32.mrb[7].mxu1  ;;  %v4287_v63 = vld [vmem:[%s6899_s4 + $0x50] sm:$0xff]  ;;  %v4288_v1 = vld [vmem:[%s6899_s4 + $0x58] sm:$0xff] }
 0x3de   : > { %4780 = vmatpush3.xpose.msk.msra.mxu1 %vm834_vm2, %v1167_v2  ;;  %v4947_v2 = vpack.c.bf16 %v4288_v1, %v4287_v63 }
 0x3df   : > { %4784 = vmatprep.subr.mxu1 %v5328_v11 }
 0x3e1   : > { %4782 = vmatmul.mubr.msk.f32.vlgmr.msra.gmra.mrb[8].mxu1 %vm834_vm2, %v1084_v5 }
 0x3e2   : > { %4786 = vmatprep.mubr.msk.f32.mxu1 %vm5327_vm0, %v5328_v11  ;;  %4785 = vmatpush3.msra.mxu1 %v1250_v27  ;;  %v4299_v27 = vld [vmem:[%s6919_s21 + $0x70] sm:$0xff] }
 0x3e3   : > { %4794 = vmatprep.subr.mxu1 %v5328_v11 }
 0x4b4   : > { %v1325_v13 = vpop.f32.mrb[8].mxu1 }
 0x4b5   : > { %v1329_v15 = vmul.f32 0.35355338, %v1325_v13  ;;  %v4783_v16 = vpop.f32.mrb[9].mxu1 }
 0x4b7   : > { %v1330_v17 = vadd.f32 %v5517_v30, %v1329_v15 }
 0x4b9   : > { %v1331_v18 = vsel %vm834_vm2, %v1330_v17, -inf }
 0x4ba   : > { %1332 = vmax.xlane.f32.xlu1 %v1331_v18 }
 0x547   : > { %v1333_v19 = vpop.xlane.xlu1 %1332 }
 0x548   : > { %v1334_v20 = vsub.f32 %v1330_v17, %v1333_v19  ;;  %v4290_v17 = vld [vmem:[%s6902_s7 + $0x2] ss:$0 sm:$0xff] }
 0x54a   : > { %v1335_v21 = vmul.f32 1.442695, %v1334_v20  ;;  %v4295_v20 = vld [vmem:[%s6903_s8 + $0x10] sm:$0xff] }
 0x54c   : > { %5302 = vpow2.f32 %v1335_v21 }
 0x556   : > { %v5303_v22 = vpop.eup %5302 }
 0x557   : > { %v1337_v23 = vsel %vm834_vm2, %v5303_v22, 0.0 }
 0x558   : > { %1338 = vadd.xlane.f32.xlu1 %v1337_v23 }
 0x5e5   : > { %v1339_v29 = vpop.xlane.xlu1 %1338 }
 0x5e6   : > { %5304 = vrcp.f32 %v1339_v29  ;;  %v4953_v29 = vpack.c.bf16 %v4300_v28, %v4299_v27  ;;  %v2595_v28 = vld [vmem:[%s6907_s12 + $0x98] sm:$0xff] }
 0x5f0   : > { %v5305_v31 = vpop.eup %5304 }
 0x5f1   : > { %v1341_v32 = vmul.f32 %v5305_v31, %v5303_v22  ;;  %v4304_v31 = vld [vmem:[%s6898_s3 + $0x60] sm:$0xff] }
 0x5f3   : > { %4787 = vmatmul.mubr.msk.f32.vlgmr.msra.gmra.mrb[10].mxu1 %vm834_vm2, %v1341_v32  ;;  %v4305_v32 = vld [vmem:[%s6898_s3 + $0x68] sm:$0xff] }
 0x5f4   : > { %4795 = vmatpush3.msra.mxu1 %v1003_v33  ;;  %4796 = vmatprep.mubr.msk.f32.mxu1 %vm5327_vm0, %v5328_v11  ;;  %v4956_v33 = vpack.c.bf16 %v4305_v32, %v4304_v31  ;;  %v2592_v31 = vld [vmem:[%s6907_s12 + $0x80] sm:$0xff] }
 0x5f5   : > { %4937 = vmatprep.subr.bf16.mxu1 %v5326_v3 }
 0x5f7   : > { %4797 = vmatmul.mubr.msk.f32.vlgmr.msra.gmra.mrb[12].mxu1 %vm834_vm2, %v999_v61  ;;  %v4285_v61 = vld [vmem:[%s6899_s4 + $0x40] sm:$0xff] }
 0x5f8   : > { %4939 = vmatpush3.bf16.msra.mxu1 %v4938_v36  ;;  %4818 = vmatprep.mubr.msk.f32.mxu1 %vm5327_vm0, %v5328_v11  ;;  %v4944_v0 = vpack.c.bf16 %v4286_v62, %v4285_v61 }
 0x5f9   : > { %4940 = vmatprep.subr.bf16.mxu1 %v5326_v3 }
 0x5fc   : > { %4942 = vmatpush3.bf16.msra.mxu1 %v4941_v39 }
 0x5fd   : > { %4832 = vmatprep.subr.mxu1 %v5328_v11 }
 0x5ff   : > { %4819 = vmatmul.mubr.msk.f32.vlgmr.msra.gmra.mrb[14].mxu1 %vm598_vm1, %v5472_v14 }
 0x600   : > { %4834 = vmatprep.mubr.msk.f32.mxu1 %vm5327_vm0, %v5328_v11 }
 0x6c6   : > { %v1411_v45 = vpop.f32.mrb[10].mxu1 }
 0x6c7   : > { %v4788_v46 = vpop.f32.mrb[11].mxu1  ;;  %4792 = vmatmul.mubr.msk.f32.vlgmr.msra.gmra.mrb[8].mxu0 %vm834_vm2, %v1411_v45  ;;  %v4302_v45 = vld [vmem:[%s6900_s5 + $0x3] ss:$0 sm:$0xff] }
 0x6c8   : > { %4933 = vmatpush3.bf16.msra.mxu0 %v4932_v42  ;;  %4807 = vmatprep.mubr.msk.f32.mxu0 %vm5327_vm0, %v5328_v11 }
 0x6c9   : > { %4934 = vmatprep.subr.bf16.mxu0 %v5326_v3 }
 0x6ca   : > { %v1559_v48 = vpop.f32.mrb[12].mxu1 }
 0x6cb   : > { %v4798_v49 = vpop.f32.mrb[13].mxu1 }
 0x6cc   : > { %4936 = vmatpush3.bf16.msra.mxu0 %v4935_v47 }
 0x6cd   : > { %4943 = vmatprep.subr.bf16.mxu0 %v5326_v3 }
 0x6cf   : > { %4808 = vmatmul.mubr.msk.f32.vlgmr.msra.gmra.mrb[10].mxu0 %vm598_vm1, %v5472_v14 }
 0x6d0   : > { %4829 = vmatprep.mubr.msk.f32.mxu0 %vm5327_vm0, %v5328_v11  ;;  %4945 = vmatpush3.bf16.msra.mxu0 %v4944_v0 }
 0x6d1   : > { %4946 = vmatprep.subr.bf16.mxu0 %v5326_v3 }
 0x6d2   : > { %v1725_v51 = vpop.f32.mrb[14].mxu1 }
 0x6d3   : > { %v1726_v52 = vadd.f32 %v4283_v50, %v1725_v51  ;;  %v4820_v53 = vpop.f32.mrb[15].mxu1  ;;  %v4311_v50 = vld [vmem:[%s6899_s4 + $0x60] sm:$0xff]  ;;  %v4312_v51 = vld [vmem:[%s6899_s4 + $0x68] sm:$0xff] }
 0x6d4   : > { %4948 = vmatpush3.bf16.msra.mxu0 %v4947_v2  ;;  %v4962_v53 = vpack.c.bf16 %v4312_v51, %v4311_v50  ;;  %v4316_v2 = vld [vmem:[%s6902_s7 + $0x3] ss:$0 sm:$0xff]  ;;  %v2597_v50 = vld [vmem:[%s6907_s12 + $0xa8] sm:$0xff]  ;;  %v2583_v51 = vld [vmem:[%s6907_s12 + $0x38] sm:$0xff] }
 0x6d5   : > { %4833 = vmatpush3.xpose.msk.msra.mxu1 %vm834_vm2, %v1726_v52  ;;  %4842 = vmatprep.subr.mxu0 %v5328_v11  ;;  %v4313_v52 = vld [vmem:[%s6899_s4 + $0x70] sm:$0xff] }
 0x6d6   : > { %4837 = vmatprep.subr.mxu1 %v5328_v11 }
 0x6d7   : > { %4830 = vmatmul.mubr.msk.f32.vlgmr.msra.gmra.mrb[12].mxu0 %vm598_vm1, %v5472_v14 }
 0x6d8   : > { %4844 = vmatprep.mubr.msk.f32.mxu0 %vm5327_vm0, %v5328_v11  ;;  %4843 = vmatpush3.msra.mxu0 %v4295_v20 }
 0x6d9   : > { %4955 = vmatprep.subr.bf16.mxu0 %v5326_v3 }
 0x79a   : > { %v1486_v54 = vpop.f32.mrb[8].mxu0 }
 0x79b   : > { %v5659_v55 = vadd.f32 %v1559_v48, %v1486_v54  ;;  %v4793_v56 = vpop.f32.mrb[9].mxu0  ;;  %v4314_v54 = vld [vmem:[%s6899_s4 + $0x78] sm:$0xff] }
 0x7a2   : > { %v1642_v58 = vpop.f32.mrb[10].mxu0 }
 0x7a3   : > { %v1643_v59 = vadd.f32 %v4276_v57, %v1642_v58  ;;  %v4809_v60 = vpop.f32.mrb[11].mxu0 }
 0x7a5   : > { %4835 = vmatmul.mubr.msk.f32.vlgmr.msra.gmra.mrb[16].mxu1 %vm834_vm2, %v1643_v59 }
 0x7a6   : > { %4839 = vmatprep.mubr.msk.f32.mxu1 %vm5327_vm0, %v5328_v11 }
 0x7aa   : > { %v1808_v16 = vpop.f32.mrb[12].mxu0 }
 0x7ab   : > { %v4831_v18 = vpop.f32.mrb[13].mxu0  ;;  %v1809_v19 = vadd.f32 %v4290_v17, %v1808_v16 }
 0x7ad   : > { %4838 = vmatpush3.msra.mxu1 %v1809_v19 }
 0x7ae   : > { %4949 = vmatprep.subr.bf16.mxu1 %v5326_v3 }
 0x878   : > { %v1884_v4 = vpop.f32.mrb[16].mxu1 }
 0x879   : > { %v1888_v5 = vmul.f32 0.35355338, %v1884_v4  ;;  %v4836_v6 = vpop.f32.mrb[17].mxu1 }
 0x87b   : > { %v1889_v7 = vadd.f32 %v5517_v30, %v1888_v5 }
 0x87d   : > { %v1890_v8 = vsel %vm834_vm2, %v1889_v7, -inf }
 0x87e   : > { %1891 = vmax.xlane.f32.xlu0 %v1890_v8 }
 0x90b   : > { %v1892_v9 = vpop.xlane.xlu0 %1891 }
 0x90c   : > { %v1893_v10 = vsub.f32 %v1889_v7, %v1892_v9 }
 0x90e   : > { %v1894_v12 = vmul.f32 1.442695, %v1893_v10 }
 0x910   : > { %5306 = vpow2.f32 %v1894_v12 }
 0x91a   : > { %v5307_v13 = vpop.eup %5306 }
 0x91b   : > { %v1896_v15 = vsel %vm834_vm2, %v5307_v13, 0.0 }
 0x91c   : > { %1897 = vadd.xlane.f32.xlu1 %v1896_v15 }
 0x9a9   : > { %v1898_v21 = vpop.xlane.xlu1 %1897 }
 0x9aa   : > { %5308 = vrcp.f32 %v1898_v21 }
 0x9b4   : > { %v5309_v22 = vpop.eup %5308 }
 0x9b5   : > { %v1900_v23 = vmul.f32 %v5309_v22, %v5307_v13  ;;  %v4323_v13 = vld [vmem:[%s6904_s9] ss:$0 sm:$0xff] }
 0x9b7   : > { %4840 = vmatmul.mubr.msk.f32.vlgmr.msra.gmra.mrb[18].mxu1 %vm834_vm2, %v1900_v23 }
 0x9b8   : > { %4855 = vmatprep.mubr.msk.f32.mxu1 %vm5327_vm0, %v5328_v11  ;;  %4951 = vmatpush3.bf16.msra.mxu1 %v4950_v26  ;;  %v2593_v26 = vld [vmem:[%s6907_s12 + $0x88] sm:$0xff] }
 0x9b9   : > { %4952 = vmatprep.subr.bf16.mxu1 %v5326_v3  ;;  %v4967_v27 = vpack.c.bf16 %v2593_v26, %v2577_v25 }
 0x9bc   : > { %4954 = vmatpush3.bf16.msra.mxu1 %v4953_v29  ;;  %v2576_v29 = vld [vmem:[%s6907_s12] sm:$0xff] }
 0x9bd   : > { %4961 = vmatprep.subr.bf16.mxu1 %v5326_v3 }
 0x9bf   : > { %4856 = vmatmul.mubr.msk.f32.vlgmr.msra.gmra.mrb[20].mxu1 %vm598_vm1, %v5472_v14 }
 0x9c0   : > { %4877 = vmatprep.mubr.msk.f32.mxu1 %vm5327_vm0, %v5328_v11  ;;  %4963 = vmatpush3.bf16.msra.mxu1 %v4962_v53  ;;  %v2599_v53 = vld [vmem:[%s6907_s12 + $0xb8] sm:$0xff] }
 0x9c1   : > { %4964 = vmatprep.subr.bf16.mxu1 %v5326_v3 }
 0xa8a   : > { %v1970_v36 = vpop.f32.mrb[18].mxu1 }
 0xa8b   : > { %v4841_v37 = vpop.f32.mrb[19].mxu1  ;;  %4845 = vmatmul.mubr.msk.f32.vlgmr.msra.gmra.mrb[14].mxu0 %vm834_vm2, %v1970_v36  ;;  %v4977_v36 = vpack.c.bf16 %v2594_v35, %v2578_v34  ;;  %v2616_v35 = vld [vmem:[%s6907_s12 + $0x140] sm:$0xff] }
 0xa8c   : > { %4957 = vmatpush3.bf16.msra.mxu0 %v4956_v33  ;;  %4866 = vmatprep.mubr.msk.f32.mxu0 %vm5327_vm0, %v5328_v11  ;;  %v4969_v33 = vpack.c.bf16 %v2592_v31, %v2576_v29  ;;  %v2609_v37 = vld [vmem:[%s6907_s12 + $0x108] sm:$0xff]  ;;  %v2619_v31 = vld [vmem:[%s6907_s12 + $0x158] sm:$0xff] }
 0xa8d   : > { %4958 = vmatprep.subr.bf16.mxu0 %v5326_v3  ;;  %v2633_v29 = vld [vmem:[%s6907_s12 + $0x1c8] sm:$0xff] }
 0xa90   : > { %4960 = vmatpush3.bf16.msra.mxu0 %v4959_v38  ;;  %v2625_v38 = vld [vmem:[%s6907_s12 + $0x188] sm:$0xff] }
 0xa91   : > { %4880 = vmatprep.subr.mxu0 %v5328_v11 }
 0xa92   : > { %v2129_v39 = vpop.f32.mrb[20].mxu1 }
 0xa93   : > { %4867 = vmatmul.mubr.msk.f32.vlgmr.msra.gmra.mrb[16].mxu0 %vm598_vm1, %v5472_v14  ;;  %v4857_v40 = vpop.f32.mrb[21].mxu1  ;;  %v2130_v49 = vadd.f32 %v4302_v45, %v2129_v39  ;;  %v2611_v39 = vld [vmem:[%s6907_s12 + $0x118] sm:$0xff] }
 0xa94   : > { %4882 = vmatprep.mubr.msk.f32.mxu0 %vm5327_vm0, %v5328_v11  ;;  %v4971_v40 = vpack.c.bf16 %v2625_v38, %v2609_v37 }
 0xb5e   : > { %v2045_v41 = vpop.f32.mrb[14].mxu0 }
 0xb5f   : > { %v2049_v42 = vadd.f32 %v2045_v41, %v5659_v55  ;;  %v4846_v43 = vpop.f32.mrb[15].mxu0  ;;  %v4965_v55 = vpack.c.bf16 %v4314_v54, %v4313_v52  ;;  %v2627_v41 = vld [vmem:[%s6907_s12 + $0x198] sm:$0xff]  ;;  %v4991_v54 = vpack.c.bf16 %v2599_v53, %v2583_v51  ;;  %v2590_v51 = vld [vmem:[%s6907_s12 + $0x70] sm:$0xff]  ;;  %v2621_v53 = vld [vmem:[%s6907_s12 + $0x168] sm:$0xff] }
 0xb60   : > { %v2624_v43 = vld [vmem:[%s6907_s12 + $0x180] sm:$0xff] }
 0xb61   : > { %4966 = vmatpush3.bf16.msra.mxu1 %v4965_v55 }
 0xb62   : > { %4890 = vmatprep.subr.mxu1 %v5328_v11 }
 0xb64   : > { %4878 = vmatmul.mubr.msk.f32.vlgmr.msra.gmra.mrb[22].mxu1 %vm598_vm1, %v5472_v14 }
 0xb65   : > { %4892 = vmatprep.mubr.msk.f32.mxu1 %vm5327_vm0, %v5328_v11 }
 0xb66   : > { %v2212_v46 = vpop.f32.mrb[16].mxu0 }
 0xb67   : > { %v2213_v47 = vadd.f32 %v4309_v44, %v2212_v46  ;;  %v4868_v48 = vpop.f32.mrb[17].mxu0  ;;  %v4979_v44 = vpack.c.bf16 %v2627_v41, %v2611_v39  ;;  %v2610_v46 = vld [vmem:[%s6907_s12 + $0x110] sm:$0xff]  ;;  %v2589_v41 = vld [vmem:[%s6907_s12 + $0x68] sm:$0xff] }
 0xb68   : > { %v2618_v39 = vld [vmem:[%s6907_s12 + $0x150] sm:$0xff] }
 0xb69   : > { %4881 = vmatpush3.xpose.msk.msra.mxu0 %vm834_vm2, %v2213_v47  ;;  %v2626_v47 = vld [vmem:[%s6907_s12 + $0x190] sm:$0xff] }
 0xb6a   : > { %4885 = vmatprep.subr.mxu0 %v5328_v11  ;;  %v4981_v48 = vpack.c.bf16 %v2626_v47, %v2610_v46  ;;  %v2588_v47 = vld [vmem:[%s6907_s12 + $0x60] sm:$0xff] }
 0xb6c   : > { %4883 = vmatmul.mubr.msk.f32.vlgmr.msra.gmra.mrb[18].mxu0 %vm834_vm2, %v2130_v49  ;;  %v2581_v49 = vld [vmem:[%s6907_s12 + $0x28] sm:$0xff] }
 0xb6d   : > { %4887 = vmatprep.mubr.msk.f32.mxu0 %vm5327_vm0, %v5328_v11  ;;  %v4983_v52 = vpack.c.bf16 %v2597_v50, %v2581_v49 }
 0xc37   : > { %v2295_v1 = vpop.f32.mrb[22].mxu1 }
 0xc38   : > { %v4879_v4 = vpop.f32.mrb[23].mxu1  ;;  %v2296_v5 = vadd.f32 %v4316_v2, %v2295_v1  ;;  %v2613_v1 = vld [vmem:[%s6907_s12 + $0x128] sm:$0xff] }
 0xc39   : > { %v2629_v2 = vld [vmem:[%s6907_s12 + $0x1a8] sm:$0xff]  ;;  %v2615_v4 = vld [vmem:[%s6907_s12 + $0x138] sm:$0xff] }
 0xc3a   : > { %4886 = vmatpush3.msra.mxu0 %v2296_v5  ;;  %v2631_v5 = vld [vmem:[%s6907_s12 + $0x1b8] sm:$0xff] }
 0xc3b   : > { %4968 = vmatprep.subr.bf16.mxu0 %v4967_v27  ;;  %v2602_v27 = vld [vmem:[%s6907_s12 + $0xd0] sm:$0xff] }
 0xc3f   : > { %v2371_v56 = vpop.f32.mrb[18].mxu0 }
 0xc40   : > { %v2375_v57 = vmul.f32 0.35355338, %v2371_v56  ;;  %v4884_v58 = vpop.f32.mrb[19].mxu0 }
 0xc41   : > { %v4324_v58 = vld [vmem:[%s6905_s10] ss:$0 sm:$0xff] }
 0xc42   : > { %v2376_v59 = vadd.f32 %v5517_v30, %v2375_v57  ;;  %v4321_v30 = vld [vmem:[%s6903_s8 + $0x18] sm:$0xff] }
 0xc43   : > { %4891 = vmatpush3.msra.mxu1 %v4321_v30 }
 0xc44   : > { %v2377_v60 = vsel %vm834_vm2, %v2376_v59, -inf }
 0xc45   : > { %2378 = vmax.xlane.f32.xlu0 %v2377_v60  ;;  %v4325_v60 = vld [vmem:[%s6906_s11] ss:$0 sm:$0xff] }
 0xcd2   : > { %v2379_v61 = vpop.xlane.xlu0 %2378 }
 0xcd3   : > { %v2380_v62 = vsub.f32 %v2376_v59, %v2379_v61  ;;  %v2580_v61 = vld [vmem:[%s6907_s12 + $0x20] sm:$0xff] }
 0xcd5   : > { %v2381_v3 = vmul.f32 1.442695, %v2380_v62  ;;  %v2596_v62 = vld [vmem:[%s6907_s12 + $0xa0] sm:$0xff] }
 0xcd7   : > { %5310 = vpow2.f32 %v2381_v3 }
 0xce1   : > { %v5311_v63 = vpop.eup %5310 }
 0xce2   : > { %v2383_v0 = vsel %vm834_vm2, %v5311_v63, 0.0 }
 0xce3   : > { %2384 = vadd.xlane.f32.xlu1 %v2383_v0  ;;  %v2598_v0 = vld [vmem:[%s6907_s12 + $0xb0] sm:$0xff] }
 0xd70   : > { %v2385_v6 = vpop.xlane.xlu1 %2384 }
 0xd71   : > { %5312 = vrcp.f32 %v2385_v6  ;;  %v4985_v6 = vpack.c.bf16 %v2596_v62, %v2580_v61 }
 0xd7b   : > { %v5313_v7 = vpop.eup %5312 }
 0xd7c   : > { %v2387_v8 = vmul.f32 %v5313_v7, %v5311_v63  ;;  %v2582_v63 = vld [vmem:[%s6907_s12 + $0x30] sm:$0xff] }
 0xd7d   : > { %v4993_v7 = vpack.c.bf16 %v2598_v0, %v2582_v63  ;;  %v2638_v63 = vld [vmem:[%s6907_s12 + $0x1f0] sm:$0xff]  ;;  %v3327_v0 = vld [vmem:[%s6909_s14 + $0x80] sm:$0xff] }
 0xd7e   : > { %4888 = vmatmul.mubr.msk.f32.vlgmr.msra.gmra.mrb[20].mxu0 %vm834_vm2, %v2387_v8  ;;  %v2612_v8 = vld [vmem:[%s6907_s12 + $0x120] sm:$0xff] }
 0xd7f   : > { %2791 = vmatprep.mubr.f32.mxu0 %v5328_v11  ;;  %4970 = vmatpush1.bf16.msra.mxu0 %v4969_v33 }
 0xd80   : > { %4972 = vmatprep.subr.bf16.mxu0 %v4971_v40  ;;  %v2634_v40 = vld [vmem:[%s6907_s12 + $0x1d0] sm:$0xff] }
 0xd81   : > { %v5013_v46 = vpack.c.bf16 %v2634_v40, %v2618_v39  ;;  %v3334_v39 = vld [vmem:[%s6909_s14 + $0xb8] sm:$0xff]  ;;  %v3365_v40 = vld [vmem:[%s6909_s14 + $0x1b0] sm:$0xff] }
 0xe51   : > { %v2457_v9 = vpop.f32.mrb[20].mxu0 }
 0xe52   : > { %v4889_v10 = vpop.f32.mrb[21].mxu0  ;;  %4893 = vmatmul.mubr.msk.f32.vlgmr.msra.gmra.mrb[24].mxu1 %vm834_vm2, %v2457_v9  ;;  %v2628_v9 = vld [vmem:[%s6907_s12 + $0x1a0] sm:$0xff] }
 0xe53   : > { %2862 = vmatprep.mubr.f32.mxu1 %v5328_v11 }
 0xf25   : > { %v2532_v12 = vpop.f32.mrb[24].mxu1 }
 0xf26   : > { %v2536_v15 = vadd.f32 %v2532_v12, %v2049_v42  ;;  %v4894_v16 = vpop.f32.mrb[25].mxu1  ;;  %v2608_v42 = vld [vmem:[%s6907_s12 + $0x100] sm:$0xff]  ;;  %v4987_v12 = vpack.c.bf16 %v2629_v2, %v2613_v1  ;;  %v3328_v1 = vld [vmem:[%s6909_s14 + $0x88] sm:$0xff] }
 0xf27   : > { %v4973_v45 = vpack.c.bf16 %v2624_v43, %v2608_v42  ;;  %v2630_v16 = vld [vmem:[%s6907_s12 + $0x1b0] sm:$0xff]  ;;  %v2605_v42 = vld [vmem:[%s6907_s12 + $0xe8] sm:$0xff]  ;;  %v2591_v43 = vld [vmem:[%s6907_s12 + $0x78] sm:$0xff] }
 0xf28   : > { %v2544_v17 = vadd.f32 %v4323_v13, %v2536_v15  ;;  %v4995_v13 = vpack.c.bf16 %v2631_v5, %v2615_v4  ;;  %v2614_v15 = vld [vmem:[%s6907_s12 + $0x130] sm:$0xff]  ;;  %v5015_v49 = vpack.c.bf16 %v2605_v42, %v2589_v41  ;;  %v3359_v2 = vld [vmem:[%s6909_s14 + $0x180] sm:$0xff]  ;;  %v3360_v4 = vld [vmem:[%s6909_s14 + $0x188] sm:$0xff] }
 0xf29   : > { %4974 = vmatpush1.bf16.msra.mxu0 %v4973_v45  ;;  %v3366_v41 = vld [vmem:[%s6909_s14 + $0x1b8] sm:$0xff] }
 0xf2a   : > { %v2545_v18 = vadd.f32 %v2544_v17, %v5472_v14  ;;  %v2579_v14 = vld [vmem:[%s6907_s12 + $0x18] sm:$0xff]  ;;  %4984 = vmatprep.subr.bf16.mxu0 %v4983_v52  ;;  %v2585_v17 = vld [vmem:[%s6907_s12 + $0x48] sm:$0xff]  ;;  %v2606_v52 = vld [vmem:[%s6907_s12 + $0xf0] sm:$0xff] }
 0xf2b   : > { %v4975_v32 = vpack.c.bf16 %v2595_v28, %v2579_v14  ;;  %v2586_v14 = vld [vmem:[%s6907_s12 + $0x50] sm:$0xff]  ;;  %v2617_v28 = vld [vmem:[%s6907_s12 + $0x148] sm:$0xff] }
 0xf2c   : > { %v2548_v19 = vsel %vm598_vm1, %v2545_v18, 0.0  ;;  %v5009_v34 = vpack.c.bf16 %v2602_v27, %v2586_v14  ;;  %v5003_v37 = vpack.c.bf16 %v2633_v29, %v2617_v28  ;;  %v3332_v14 = vld [vmem:[%s6909_s14 + $0xa8] sm:$0xff]  ;;  %v3363_v27 = vld [vmem:[%s6909_s14 + $0x1a0] sm:$0xff] }
 0xf2d   : > { %2549 = vadd.xlane.f32.xlu0 %v2548_v19  ;;  %4976 = vmatprep.subr.bf16.mxu1 %v4975_v32  ;;  %v2587_v19 = vld [vmem:[%s6907_s12 + $0x58] sm:$0xff]  ;;  %v3364_v28 = vld [vmem:[%s6909_s14 + $0x1a8] sm:$0xff] }
 0xf2e   : > { %4978 = vmatpush1.bf16.msra.mxu1 %v4977_v36  ;;  %v2635_v32 = vld [vmem:[%s6907_s12 + $0x1d8] sm:$0xff]  ;;  %v2632_v36 = vld [vmem:[%s6907_s12 + $0x1c0] sm:$0xff] }
 0xf2f   : > { %4980 = vmatprep.subr.bf16.mxu1 %v4979_v44  ;;  %v5011_v38 = vpack.c.bf16 %v2635_v32, %v2619_v31  ;;  %v2607_v44 = vld [vmem:[%s6907_s12 + $0xf8] sm:$0xff]  ;;  %v5005_v45 = vpack.c.bf16 %v2632_v36, %v2616_v35  ;;  %v3315_v32 = vld [vmem:[%s6909_s14 + $0x20] sm:$0xff]  ;;  %v5071_v35 = vpack.c.bf16 %v3364_v28, %v3363_v27 }
 0xf30   : > { %v5023_v50 = vpack.c.bf16 %v2607_v44, %v2591_v43  ;;  %v3347_v36 = vld [vmem:[%s6909_s14 + $0x120] sm:$0xff]  ;;  %v3317_v44 = vld [vmem:[%s6909_s14 + $0x30] sm:$0xff]  ;;  %v3374_v28 = vld [vmem:[%s6909_s14 + $0x1f8] sm:$0xff] }
 0xf32   : > { %4982 = vmatpush1.bf16.msra.mxu1 %v4981_v48  ;;  %v2604_v48 = vld [vmem:[%s6907_s12 + $0xe0] sm:$0xff] }
 0xf33   : > { %4992 = vmatprep.subr.bf16.mxu1 %v4991_v54  ;;  %v2637_v54 = vld [vmem:[%s6907_s12 + $0x1e8] sm:$0xff] }
 0xf34   : > { %v5019_v61 = vpack.c.bf16 %v2637_v54, %v2621_v53  ;;  %v3368_v53 = vld [vmem:[%s6909_s14 + $0x1c8] sm:$0xff] }
 0xfba   : > { %v2550_v20 = vpop.xlane.xlu0 %2549 }
 0xfbb   : > { %v2552_v21 = vmul.f32 0.03125, %v2550_v20  ;;  %v2603_v20 = vld [vmem:[%s6907_s12 + $0xd8] sm:$0xff] }
 0xfbc   : > { %v5007_v26 = vpack.c.bf16 %v2603_v20, %v2587_v19 }
 0xfbd   : > { %v2553_v22 = vsub.f32 %v2545_v18, %v2552_v21  ;;  %v2601_v18 = vld [vmem:[%s6907_s12 + $0xc8] sm:$0xff]  ;;  %v4989_v21 = vpack.c.bf16 %v2628_v9, %v2612_v8  ;;  %v5031_v8 = vpack.c.bf16 %v3328_v1, %v3327_v0  ;;  %v5063_v9 = vpack.c.bf16 %v3360_v4, %v3359_v2  ;;  %v3370_v0 = vld [vmem:[%s6909_s14 + $0x1d8] sm:$0xff]  ;;  %v3321_v4 = vld [vmem:[%s6909_s14 + $0x50] sm:$0xff] }
 0xfbe   : > { %v4999_v25 = vpack.c.bf16 %v2601_v18, %v2585_v17  ;;  %v3361_v17 = vld [vmem:[%s6909_s14 + $0x190] sm:$0xff]  ;;  %v3362_v18 = vld [vmem:[%s6909_s14 + $0x198] sm:$0xff] }
 0xfbf   : > { %v2554_v23 = vmul.f32 %v2553_v22, %v2553_v22 }
 0xfc1   : > { %v2555_v24 = vsel %vm598_vm1, %v2554_v23, 0.0  ;;  %v2584_v23 = vld [vmem:[%s6907_s12 + $0x40] sm:$0xff] }
 0xfc2   : > { %2556 = vadd.xlane.f32.xlu1 %v2555_v24  ;;  %v2600_v24 = vld [vmem:[%s6907_s12 + $0xc0] sm:$0xff] }
 0xfc3   : > { %v5001_v33 = vpack.c.bf16 %v2600_v24, %v2584_v23  ;;  %v5067_v23 = vpack.c.bf16 %v3362_v18, %v3361_v17  ;;  %v3345_v24 = vld [vmem:[%s6909_s14 + $0x110] sm:$0xff]  ;;  %v3323_v18 = vld [vmem:[%s6909_s14 + $0x60] sm:$0xff] }
0x104f   : > { %v2557_v55 = vpop.xlane.xlu1 %2556 }
0x1050   : > { %v2558_v56 = vmul.f32 0.03125, %v2557_v55  ;;  %v2623_v55 = vld [vmem:[%s6907_s12 + $0x178] sm:$0xff] }
0x1052   : > { %v2559_v57 = vadd.f32 1e-05, %v2558_v56  ;;  %v2639_v56 = vld [vmem:[%s6907_s12 + $0x1f8] sm:$0xff] }
0x1053   : > { %v5027_v62 = vpack.c.bf16 %v2639_v56, %v2623_v55  ;;  %v3319_v56 = vld [vmem:[%s6909_s14 + $0x40] sm:$0xff] }
0x1054   : > { %5314 = vrsqrt.f32 %v2559_v57  ;;  %v5017_v57 = vpack.c.bf16 %v2604_v48, %v2588_v47  ;;  %v5075_v47 = vpack.c.bf16 %v3366_v41, %v3365_v40  ;;  %v3349_v48 = vld [vmem:[%s6909_s14 + $0x130] sm:$0xff]  ;;  %v3424_v41 = vld [vmem:[%s6909_s14 + $0x388] sm:$0xff] }
0x105e   : > { %v5315_v59 = vpop.eup %5314 }
0x105f   : > { %v2561_v3 = vmul.f32 %v5315_v59, %v2553_v22  ;;  %v4997_v22 = vpack.c.bf16 %v2630_v16, %v2614_v15  ;;  %v2620_v59 = vld [vmem:[%s6907_s12 + $0x160] sm:$0xff]  ;;  %v3329_v15 = vld [vmem:[%s6909_s14 + $0x90] sm:$0xff]  ;;  %v3330_v16 = vld [vmem:[%s6909_s14 + $0x98] sm:$0xff] }
0x1061   : > { %v2568_v30 = vmul.f32 %v4324_v58, %v2561_v3  ;;  %v5025_v58 = vpack.c.bf16 %v2606_v52, %v2590_v51  ;;  %v2622_v3 = vld [vmem:[%s6907_s12 + $0x170] sm:$0xff]  ;;  %v3336_v51 = vld [vmem:[%s6909_s14 + $0xc8] sm:$0xff]  ;;  %v3367_v52 = vld [vmem:[%s6909_s14 + $0x1c0] sm:$0xff] }
0x1063   : > { %v5883_v10 = vadd.f32 %v4325_v60, %v2568_v30  ;;  %v2636_v60 = vld [vmem:[%s6907_s12 + $0x1e0] sm:$0xff]  ;;  %v5029_v30 = vpack.c.bf16 %v2638_v63, %v2622_v3  ;;  %v3338_v3 = vld [vmem:[%s6909_s14 + $0xd8] sm:$0xff]  ;;  %v3369_v63 = vld [vmem:[%s6909_s14 + $0x1d0] sm:$0xff] }
0x1064   : > { %v5021_v5 = vpack.c.bf16 %v2636_v60, %v2620_v59  ;;  %v5079_v59 = vpack.c.bf16 %v3368_v53, %v3367_v52  ;;  %v3351_v60 = vld [vmem:[%s6909_s14 + $0x140] sm:$0xff] }
0x1065   : > { %4326 = vmatmul.mubr.msk.f32.vlgmr.msra.gmra.mrb[22].mxu0 %vm598_vm1, %v5883_v10  ;;  %4327 = vmatmul.mubr.msk.f32.vlgmr.msra.gmra.mrb[26].mxu1 %vm598_vm1, %v5883_v10 }
0x1066   : > { %4986 = vmatpush1.bf16.msra.mxu0 %v4985_v6  ;;  %4994 = vmatpush1.bf16.msra.mxu1 %v4993_v7  ;;  %v3311_v6 = vld [vmem:[%s6909_s14] sm:$0xff]  ;;  %v3312_v7 = vld [vmem:[%s6909_s14 + $0x8] sm:$0xff] }
0x1067   : > { %4988 = vmatprep.subr.bf16.mxu0 %v4987_v12  ;;  %4996 = vmatprep.subr.bf16.mxu1 %v4995_v13  ;;  %v3343_v12 = vld [vmem:[%s6909_s14 + $0x100] sm:$0xff]  ;;  %v3344_v13 = vld [vmem:[%s6909_s14 + $0x108] sm:$0xff]  ;;  %v5033_v19 = vpack.c.bf16 %v3312_v7, %v3311_v6  ;;  %v5083_v6 = vpack.c.bf16 %v3370_v0, %v3369_v63  ;;  %v3353_v7 = vld [vmem:[%s6909_s14 + $0x150] sm:$0xff] }
0x1068   : > { %2933 = vmatprep.mubr.f32.mxu0 %v5328_v11  ;;  %3004 = vmatprep.mubr.f32.mxu1 %v5328_v11  ;;  %v5065_v20 = vpack.c.bf16 %v3344_v13, %v3343_v12  ;;  %v3340_v12 = vld [vmem:[%s6909_s14 + $0xe8] sm:$0xff]  ;;  %v3371_v13 = vld [vmem:[%s6909_s14 + $0x1e0] sm:$0xff] }
0x1069   : > { %v3407_v0 = vld [vmem:[%s6909_s14 + $0x300] sm:$0xff] }
0x106a   : > { %4990 = vmatpush1.bf16.msra.mxu0 %v4989_v21  ;;  %4998 = vmatpush1.bf16.msra.mxu1 %v4997_v22  ;;  %v3314_v21 = vld [vmem:[%s6909_s14 + $0x18] sm:$0xff]  ;;  %v5035_v22 = vpack.c.bf16 %v3330_v16, %v3329_v15  ;;  %v3372_v15 = vld [vmem:[%s6909_s14 + $0x1e8] sm:$0xff] }
0x106b   : > { %5000 = vmatprep.subr.bf16.mxu0 %v4999_v25  ;;  %5008 = vmatprep.subr.bf16.mxu1 %v5007_v26  ;;  %v3346_v25 = vld [vmem:[%s6909_s14 + $0x118] sm:$0xff]  ;;  %v3331_v26 = vld [vmem:[%s6909_s14 + $0xa0] sm:$0xff] }
0x106c   : > { %v5069_v31 = vpack.c.bf16 %v3346_v25, %v3345_v24  ;;  %v3341_v25 = vld [vmem:[%s6909_s14 + $0xf0] sm:$0xff] }
0x106d   : > { %4328 = vmatmul.mubr.msk.f32.vlgmr.msra.gmra.mrb[24].mxu0 %vm598_vm1, %v5883_v10  ;;  %4329 = vmatmul.mubr.msk.f32.vlgmr.msra.gmra.mrb[28].mxu1 %vm598_vm1, %v5883_v10 }
0x106e   : > { %5002 = vmatpush1.bf16.msra.mxu0 %v5001_v33  ;;  %5010 = vmatpush1.bf16.msra.mxu1 %v5009_v34  ;;  %v3316_v33 = vld [vmem:[%s6909_s14 + $0x28] sm:$0xff]  ;;  %v5039_v34 = vpack.c.bf16 %v3332_v14, %v3331_v26  ;;  %v3342_v26 = vld [vmem:[%s6909_s14 + $0xf8] sm:$0xff]  ;;  %v3373_v14 = vld [vmem:[%s6909_s14 + $0x1f0] sm:$0xff] }
0x106f   : > { %5004 = vmatprep.subr.bf16.mxu0 %v5003_v37  ;;  %5012 = vmatprep.subr.bf16.mxu1 %v5011_v38  ;;  %v3348_v37 = vld [vmem:[%s6909_s14 + $0x128] sm:$0xff]  ;;  %v3333_v38 = vld [vmem:[%s6909_s14 + $0xb0] sm:$0xff]  ;;  %v5041_v42 = vpack.c.bf16 %v3316_v33, %v3315_v32  ;;  %v5059_v27 = vpack.c.bf16 %v3342_v26, %v3341_v25  ;;  %v5091_v32 = vpack.c.bf16 %v3374_v28, %v3373_v14 }
0x1070   : > { %3075 = vmatprep.mubr.f32.mxu0 %v5328_v11  ;;  %3146 = vmatprep.mubr.f32.mxu1 %v5328_v11  ;;  %v5073_v43 = vpack.c.bf16 %v3348_v37, %v3347_v36  ;;  %v3391_v37 = vld [vmem:[%s6909_s14 + $0x280] sm:$0xff]  ;;  %v3396_v14 = vld [vmem:[%s6909_s14 + $0x2a8] sm:$0xff] }
0x1071   : > { %v3428_v28 = vld [vmem:[%s6909_s14 + $0x3a8] sm:$0xff] }
0x1072   : > { %5006 = vmatpush1.bf16.msra.mxu0 %v5005_v45  ;;  %5014 = vmatpush1.bf16.msra.mxu1 %v5013_v46  ;;  %v3318_v45 = vld [vmem:[%s6909_s14 + $0x38] sm:$0xff]  ;;  %v5043_v46 = vpack.c.bf16 %v3334_v39, %v3333_v38  ;;  %v3392_v38 = vld [vmem:[%s6909_s14 + $0x288] sm:$0xff]  ;;  %v3423_v39 = vld [vmem:[%s6909_s14 + $0x380] sm:$0xff] }
0x1073   : > { %5016 = vmatprep.subr.bf16.mxu0 %v5015_v49  ;;  %5024 = vmatprep.subr.bf16.mxu1 %v5023_v50  ;;  %v3350_v49 = vld [vmem:[%s6909_s14 + $0x138] sm:$0xff]  ;;  %v3335_v50 = vld [vmem:[%s6909_s14 + $0xc0] sm:$0xff]  ;;  %v5045_v54 = vpack.c.bf16 %v3318_v45, %v3317_v44  ;;  %v5095_v40 = vpack.c.bf16 %v3392_v38, %v3391_v37 }
0x1074   : > { %v5077_v55 = vpack.c.bf16 %v3350_v49, %v3349_v48 }
0x1075   : > { %4330 = vmatmul.mubr.msk.f32.vlgmr.msra.gmra.mrb[26].mxu0 %vm598_vm1, %v5883_v10  ;;  %4331 = vmatmul.mubr.msk.f32.vlgmr.msra.gmra.mrb[30].mxu1 %vm598_vm1, %v5883_v10 }
0x1076   : > { %5018 = vmatpush1.bf16.msra.mxu0 %v5017_v57  ;;  %5026 = vmatpush1.bf16.msra.mxu1 %v5025_v58  ;;  %v3320_v57 = vld [vmem:[%s6909_s14 + $0x48] sm:$0xff]  ;;  %v5047_v58 = vpack.c.bf16 %v3336_v51, %v3335_v50  ;;  %v6231_v50 = vld [vmem:[%s6908_s13] sm:$0xff] }
0x1077   : > { %5020 = vmatprep.subr.bf16.mxu0 %v5019_v61  ;;  %5028 = vmatprep.subr.bf16.mxu1 %v5027_v62  ;;  %v3352_v61 = vld [vmem:[%s6909_s14 + $0x148] sm:$0xff]  ;;  %v3337_v62 = vld [vmem:[%s6909_s14 + $0xd0] sm:$0xff]  ;;  %v5049_v1 = vpack.c.bf16 %v3320_v57, %v3319_v56 }
0x1078   : > { %3217 = vmatprep.mubr.f32.mxu0 %v5328_v11  ;;  %3288 = vmatprep.mubr.f32.mxu1 %v5328_v11  ;;  %v3313_v11 = vld [vmem:[%s6909_s14 + $0x10] sm:$0xff]  ;;  %v5081_v2 = vpack.c.bf16 %v3352_v61, %v3351_v60  ;;  %v3376_v60 = vld [vmem:[%s6909_s14 + $0x208] sm:$0xff] }
0x1079   : > { %v5037_v29 = vpack.c.bf16 %v3314_v21, %v3313_v11  ;;  %v3324_v11 = vld [vmem:[%s6909_s14 + $0x68] sm:$0xff]  ;;  %v3355_v21 = vld [vmem:[%s6909_s14 + $0x160] sm:$0xff] }
0x107a   : > { %5022 = vmatpush1.bf16.msra.mxu0 %v5021_v5  ;;  %5030 = vmatpush1.bf16.msra.mxu1 %v5029_v30  ;;  %v3322_v5 = vld [vmem:[%s6909_s14 + $0x58] sm:$0xff]  ;;  %v5051_v30 = vpack.c.bf16 %v3338_v3, %v3337_v62 }
0x107b   : > { %5032 = vmatprep.subr.bf16.mxu0 %v5031_v8  ;;  %5064 = vmatprep.subr.bf16.mxu1 %v5063_v9  ;;  %v3354_v8 = vld [vmem:[%s6909_s14 + $0x158] sm:$0xff]  ;;  %v3339_v9 = vld [vmem:[%s6909_s14 + $0xe0] sm:$0xff]  ;;  %v5053_v16 = vpack.c.bf16 %v3322_v5, %v3321_v4 }
0x107c   : > { %v5085_v17 = vpack.c.bf16 %v3354_v8, %v3353_v7  ;;  %v3394_v7 = vld [vmem:[%s6909_s14 + $0x298] sm:$0xff]  ;;  %v3425_v8 = vld [vmem:[%s6909_s14 + $0x390] sm:$0xff] }
0x107d   : > { %4332 = vmatmul.mubr.msk.f32.vlgmr.msra.gmra.mrb[28].mxu0 %vm598_vm1, %v5883_v10  ;;  %4333 = vmatmul.mubr.msk.f32.vlgmr.msra.gmra.mrb[32].mxu1 %vm598_vm1, %v5883_v10 }
0x107e   : > { %5034 = vmatpush3.bf16.msra.mxu0 %v5033_v19  ;;  %5066 = vmatpush3.bf16.msra.mxu1 %v5065_v20  ;;  %v5055_v19 = vpack.c.bf16 %v3340_v12, %v3339_v9  ;;  %v5087_v20 = vpack.c.bf16 %v3372_v15, %v3371_v13  ;;  %v3426_v9 = vld [vmem:[%s6909_s14 + $0x398] sm:$0xff] }
0x107f   : > { %5036 = vmatprep.subr.bf16.mxu0 %v5035_v22  ;;  %5068 = vmatprep.subr.bf16.mxu1 %v5067_v23  ;;  %v3356_v22 = vld [vmem:[%s6909_s14 + $0x168] sm:$0xff]  ;;  %v5057_v23 = vpack.c.bf16 %v3324_v11, %v3323_v18  ;;  %v3378_v18 = vld [vmem:[%s6909_s14 + $0x218] sm:$0xff] }
0x1080   : > { %v5089_v24 = vpack.c.bf16 %v3356_v22, %v3355_v21  ;;  %v5131_v21 = vpack.c.bf16 %v3426_v9, %v3425_v8  ;;  %v3409_v22 = vld [vmem:[%s6909_s14 + $0x310] sm:$0xff] }
0x1082   : > { %5038 = vmatpush3.bf16.msra.mxu0 %v5037_v29  ;;  %5070 = vmatpush3.bf16.msra.mxu1 %v5069_v31  ;;  %v3325_v29 = vld [vmem:[%s6909_s14 + $0x70] sm:$0xff]  ;;  %v3326_v31 = vld [vmem:[%s6909_s14 + $0x78] sm:$0xff] }
0x1083   : > { %5040 = vmatprep.subr.bf16.mxu0 %v5039_v34  ;;  %5072 = vmatprep.subr.bf16.mxu1 %v5071_v35  ;;  %v5061_v33 = vpack.c.bf16 %v3326_v31, %v3325_v29  ;;  %v3357_v34 = vld [vmem:[%s6909_s14 + $0x170] sm:$0xff]  ;;  %v3358_v35 = vld [vmem:[%s6909_s14 + $0x178] sm:$0xff] }
0x1084   : > { %v5093_v36 = vpack.c.bf16 %v3358_v35, %v3357_v34  ;;  %v3379_v34 = vld [vmem:[%s6909_s14 + $0x220] sm:$0xff]  ;;  %v3380_v35 = vld [vmem:[%s6909_s14 + $0x228] sm:$0xff] }
0x1086   : > { %5042 = vmatpush3.bf16.msra.mxu0 %v5041_v42  ;;  %5074 = vmatpush3.bf16.msra.mxu1 %v5073_v43  ;;  %v5127_v42 = vpack.c.bf16 %v3424_v41, %v3423_v39  ;;  %v2644_v43 = vlaneseq  ;;  %v3412_v41 = vld [vmem:[%s6909_s14 + $0x328] sm:$0xff] }
0x1087   : > { %5044 = vmatprep.subr.bf16.mxu0 %v5043_v46  ;;  %5076 = vmatprep.subr.bf16.mxu1 %v5075_v47  ;;  %v6219_v46 = vld [vmem:[%s6908_s13 + $0x8] sm:$0xff] }
0x1088   : > { %v6213_v44 = vshrl.u32 %v2644_v43, 7 }
0x108a   : > { %5046 = vmatpush3.bf16.msra.mxu0 %v5045_v54  ;;  %5078 = vmatpush3.bf16.msra.mxu1 %v5077_v55  ;;  %v2670_v45 = vsub.s32 6, %v6213_v44  ;;  %v2646_v48 = vsub.s32 0, %v6213_v44  ;;  %v2654_v49 = vsub.s32 2, %v6213_v44  ;;  %v2650_v51 = vsub.s32 1, %v6213_v44 }
0x108b   : > { %5048 = vmatprep.subr.bf16.mxu0 %v5047_v58  ;;  %5080 = vmatprep.subr.bf16.mxu1 %v5079_v59  ;;  %v2658_v52 = vsub.s32 3, %v6213_v44  ;;  %v3375_v59 = vld [vmem:[%s6909_s14 + $0x200] sm:$0xff] }
0x108c   : > { %v6224_v47 = vrot.slane %v6219_v46, %v2670_v45  ;;  %v2647_v53 = vrot.slane %v6231_v50, %v2646_v48  ;;  %v2655_v54 = vrot.slane %v6231_v50, %v2654_v49  ;;  %v2651_v55 = vrot.slane %v6231_v50, %v2650_v51 }
0x108d   : > { %v2659_v56 = vrot.slane %v6231_v50, %v2658_v52  ;;  %v5097_v15 = vpack.c.bf16 %v3376_v60, %v3375_v59  ;;  %v2679_v60 = vrot.slane %v6219_v46, %v2646_v48 }
0x108e   : > { %5050 = vmatpush3.bf16.msra.mxu0 %v5049_v1  ;;  %5082 = vmatpush3.bf16.msra.mxu1 %v5081_v2  ;;  %v3408_v1 = vld [vmem:[%s6909_s14 + $0x308] sm:$0xff]  ;;  %v3393_v2 = vld [vmem:[%s6909_s14 + $0x290] sm:$0xff] }
0x108f   : > { %5052 = vmatprep.subr.bf16.mxu0 %v5051_v30  ;;  %5084 = vmatprep.subr.bf16.mxu1 %v5083_v6  ;;  %v2666_v30 = vsub.s32 5, %v6213_v44  ;;  %v2674_v6 = vsub.s32 7, %v6213_v44  ;;  %v5099_v11 = vpack.c.bf16 %v3394_v7, %v3393_v2  ;;  %v3414_v2 = vld [vmem:[%s6909_s14 + $0x338] sm:$0xff]  ;;  %v3432_v7 = vld [vmem:[%s6909_s14 + $0x3c8] sm:$0xff] }
0x1091   : > { %v2667_v25 = vrot.slane %v6231_v50, %v2666_v30  ;;  %v2675_v26 = vrot.slane %v6231_v50, %v2674_v6 }
0x1092   : > { %5054 = vmatpush3.bf16.msra.mxu0 %v5053_v16  ;;  %5086 = vmatpush3.bf16.msra.mxu1 %v5085_v17  ;;  %v5129_v16 = vpack.c.bf16 %v3408_v1, %v3407_v0  ;;  %v3377_v17 = vld [vmem:[%s6909_s14 + $0x210] sm:$0xff]  ;;  %v2687_v0 = vrot.slane %v6219_v46, %v2654_v49  ;;  %v3431_v49 = vld [vmem:[%s6909_s14 + $0x3c0] sm:$0xff] }
0x1093   : > { %5056 = vmatprep.subr.bf16.mxu0 %v5055_v19  ;;  %5088 = vmatprep.subr.bf16.mxu1 %v5087_v20 }
0x1096   : > { %5058 = vmatpush3.bf16.msra.mxu0 %v5057_v23  ;;  %5090 = vmatpush3.bf16.msra.mxu1 %v5089_v24  ;;  %v3410_v23 = vld [vmem:[%s6909_s14 + $0x318] sm:$0xff]  ;;  %v3395_v24 = vld [vmem:[%s6909_s14 + $0x2a0] sm:$0xff] }
0x1097   : > { %5060 = vmatprep.subr.bf16.mxu0 %v5059_v27  ;;  %5092 = vmatprep.subr.bf16.mxu1 %v5091_v32  ;;  %v3427_v27 = vld [vmem:[%s6909_s14 + $0x3a0] sm:$0xff]  ;;  %v5101_v32 = vpack.c.bf16 %v3378_v18, %v3377_v17  ;;  %v5103_v38 = vpack.c.bf16 %v3396_v14, %v3395_v24  ;;  %v3384_v17 = vld [vmem:[%s6909_s14 + $0x248] sm:$0xff]  ;;  %v3401_v24 = vld [vmem:[%s6909_s14 + $0x2d0] sm:$0xff] }
0x1098   : > { %v5135_v39 = vpack.c.bf16 %v3428_v28, %v3427_v27  ;;  %v3434_v14 = vld [vmem:[%s6909_s14 + $0x3d8] sm:$0xff]  ;;  %v2662_v27 = vsub.s32 4, %v6213_v44  ;;  %v3535_v44 = vld [vmem:[%s6909_s14 + $0x700] sm:$0xff] }
0x109a   : > { %5062 = vmatpush3.bf16.msra.mxu0 %v5061_v33  ;;  %5094 = vmatpush3.bf16.msra.mxu1 %v5093_v36  ;;  %v5133_v33 = vpack.c.bf16 %v3410_v23, %v3409_v22  ;;  %v3415_v22 = vld [vmem:[%s6909_s14 + $0x340] sm:$0xff]  ;;  %v3416_v23 = vld [vmem:[%s6909_s14 + $0x348] sm:$0xff] }
0x109b   : > { %5096 = vmatprep.subr.bf16.mxu0 %v5095_v40  ;;  %5128 = vmatprep.subr.bf16.mxu1 %v5127_v42  ;;  %v3411_v40 = vld [vmem:[%s6909_s14 + $0x320] sm:$0xff]  ;;  %v3397_v42 = vld [vmem:[%s6909_s14 + $0x2b0] sm:$0xff] }
0x1138   : > { %v2793_v57 = vpop.f32.mrb[22].mxu0  ;;  %v2864_v58 = vpop.f32.mrb[26].mxu1 }
0x1139   : > { %v2794_v61 = vadd.f32 %v2793_v57, %v2647_v53  ;;  %v2865_v62 = vadd.f32 %v2864_v58, %v2655_v54  ;;  %v2795_v3 = vpop.f32.mrb[23].mxu0  ;;  %v2866_v63 = vpop.f32.mrb[27].mxu1  ;;  %v3398_v54 = vld [vmem:[%s6909_s14 + $0x2b8] sm:$0xff]  ;;  %v5105_v57 = vpack.c.bf16 %v3380_v35, %v3379_v34  ;;  %v3417_v35 = vld [vmem:[%s6909_s14 + $0x350] sm:$0xff] }
0x113a   : > { %v2796_v4 = vadd.f32 %v2795_v3, %v2651_v55  ;;  %v2867_v5 = vadd.f32 %v2866_v63, %v2659_v56  ;;  %v3429_v55 = vld [vmem:[%s6909_s14 + $0x3b0] sm:$0xff]  ;;  %v3430_v56 = vld [vmem:[%s6909_s14 + $0x3b8] sm:$0xff]  ;;  %v5107_v48 = vpack.c.bf16 %v3398_v54, %v3397_v42  ;;  %v3435_v42 = vld [vmem:[%s6909_s14 + $0x3e0] sm:$0xff] }
0x113b   : > { %v3295_v19 = vmax.f32 %v2794_v61, 0.0  ;;  %v3297_v20 = vmax.f32 %v2865_v62, 0.0  ;;  %v5137_v61 = vpack.c.bf16 %v3412_v41, %v3411_v40  ;;  %v3381_v62 = vld [vmem:[%s6909_s14 + $0x230] sm:$0xff]  ;;  %v3382_v3 = vld [vmem:[%s6909_s14 + $0x238] sm:$0xff]  ;;  %v5139_v1 = vpack.c.bf16 %v3430_v56, %v3429_v55  ;;  %v3403_v40 = vld [vmem:[%s6909_s14 + $0x2e0] sm:$0xff] }
0x113c   : > { %v3296_v12 = vmax.f32 %v2796_v4, 0.0  ;;  %v3298_v13 = vmax.f32 %v2867_v5, 0.0  ;;  %v3413_v63 = vld [vmem:[%s6909_s14 + $0x330] sm:$0xff]  ;;  %v3399_v4 = vld [vmem:[%s6909_s14 + $0x2c0] sm:$0xff]  ;;  %v3400_v5 = vld [vmem:[%s6909_s14 + $0x2c8] sm:$0xff] }
0x113d   : > { %v3386_v34 = vld [vmem:[%s6909_s14 + $0x258] sm:$0xff]  ;;  %v3404_v41 = vld [vmem:[%s6909_s14 + $0x2e8] sm:$0xff] }
0x113e   : > { %3638 = vmatprep.mubr.f32.mxu0 %v3296_v12  ;;  %3708 = vmatprep.mubr.f32.mxu1 %v3298_v13  ;;  %v5109_v12 = vpack.c.bf16 %v3382_v3, %v3381_v62  ;;  %v5141_v13 = vpack.c.bf16 %v3414_v2, %v3413_v63  ;;  %v3437_v2 = vld [vmem:[%s6909_s14 + $0x3f0] sm:$0xff] }
0x113f   : > { %3639 = vmatmul.mubr.f32.vlgmr.msra.gmra.mrb[30].mxu0 %v3295_v19  ;;  %3709 = vmatmul.mubr.f32.vlgmr.msra.gmra.mrb[34].mxu1 %v3297_v20 }
0x1140   : > { %v6303_v29 = vpop.f32.mrb[24].mxu0  ;;  %v6305_v31 = vpop.f32.mrb[28].mxu1  ;;  %5098 = vmatpush3.bf16.msra.mxu0 %v5097_v15  ;;  %5130 = vmatpush3.bf16.msra.mxu1 %v5129_v16  ;;  %v5111_v15 = vpack.c.bf16 %v3400_v5, %v3399_v4  ;;  %v3383_v16 = vld [vmem:[%s6909_s14 + $0x240] sm:$0xff]  ;;  %v3438_v4 = vld [vmem:[%s6909_s14 + $0x3f8] sm:$0xff]  ;;  %v2663_v5 = vrot.slane %v6231_v50, %v2662_v27 }
0x1141   : > { %v2937_v36 = vpop.f32.mrb[25].mxu0  ;;  %v3008_v37 = vpop.f32.mrb[29].mxu1  ;;  %5100 = vmatprep.subr.bf16.mxu0 %v5099_v11  ;;  %5132 = vmatprep.subr.bf16.mxu1 %v5131_v21  ;;  %v5143_v21 = vpack.c.bf16 %v3432_v7, %v3431_v49  ;;  %v5113_v28 = vpack.c.bf16 %v3384_v17, %v3383_v16  ;;  %v5155_v16 = vpack.c.bf16 %v3438_v4, %v3437_v2  ;;  %v3422_v17 = vld [vmem:[%s6909_s14 + $0x378] sm:$0xff]  ;;  %v3443_v2 = vld [vmem:[%s6909_s14 + $0x420] sm:$0xff]  ;;  %v3444_v4 = vld [vmem:[%s6909_s14 + $0x428] sm:$0xff] }
0x1142   : > { %v2938_v43 = vadd.f32 %v2937_v36, %v2667_v25  ;;  %v3009_v53 = vadd.f32 %v3008_v37, %v2675_v26  ;;  %v3402_v25 = vld [vmem:[%s6909_s14 + $0x2d8] sm:$0xff]  ;;  %v3433_v26 = vld [vmem:[%s6909_s14 + $0x3d0] sm:$0xff]  ;;  %v2695_v36 = vrot.slane %v6219_v46, %v2662_v27  ;;  %v2936_v27 = vadd.f32 %v6303_v29, %v2663_v5  ;;  %v3472_v29 = vld [vmem:[%s6909_s14 + $0x508] sm:$0xff] }
0x1143   : > { %v5115_v37 = vpack.c.bf16 %v3402_v25, %v3401_v24  ;;  %v2691_v24 = vrot.slane %v6219_v46, %v2658_v52  ;;  %v3440_v52 = vld [vmem:[%s6909_s14 + $0x408] sm:$0xff]  ;;  %v3475_v5 = vld [vmem:[%s6909_s14 + $0x520] sm:$0xff] }
0x1144   : > { %v3300_v58 = vmax.f32 %v2938_v43, 0.0  ;;  %v3302_v59 = vmax.f32 %v3009_v53, 0.0  ;;  %5102 = vmatpush3.bf16.msra.mxu0 %v5101_v32  ;;  %5134 = vmatpush3.bf16.msra.mxu1 %v5133_v33  ;;  %v5145_v32 = vpack.c.bf16 %v3416_v23, %v3415_v22  ;;  %v3385_v33 = vld [vmem:[%s6909_s14 + $0x250] sm:$0xff]  ;;  %v3436_v43 = vld [vmem:[%s6909_s14 + $0x3e8] sm:$0xff] }
0x1145   : > { %5104 = vmatprep.subr.bf16.mxu0 %v5103_v38  ;;  %5136 = vmatprep.subr.bf16.mxu1 %v5135_v39  ;;  %v5147_v38 = vpack.c.bf16 %v3434_v14, %v3433_v26  ;;  %v3418_v39 = vld [vmem:[%s6909_s14 + $0x358] sm:$0xff]  ;;  %v5117_v55 = vpack.c.bf16 %v3386_v34, %v3385_v33  ;;  %v5151_v63 = vpack.c.bf16 %v3436_v43, %v3435_v42  ;;  %v3456_v22 = vld [vmem:[%s6909_s14 + $0x488] sm:$0xff]  ;;  %v3471_v34 = vld [vmem:[%s6909_s14 + $0x500] sm:$0xff] }
0x1146   : > { %3778 = vmatprep.mubr.f32.mxu0 %v3300_v58  ;;  %3848 = vmatprep.mubr.f32.mxu1 %v3302_v59  ;;  %v5149_v56 = vpack.c.bf16 %v3418_v39, %v3417_v35  ;;  %v3387_v58 = vld [vmem:[%s6909_s14 + $0x260] sm:$0xff]  ;;  %v3388_v59 = vld [vmem:[%s6909_s14 + $0x268] sm:$0xff]  ;;  %v3299_v39 = vmax.f32 %v2936_v27, 0.0  ;;  %v3442_v42 = vld [vmem:[%s6909_s14 + $0x418] sm:$0xff] }
0x1147   : > { %v5121_v49 = vpack.c.bf16 %v3388_v59, %v3387_v58  ;;  %v3488_v23 = vld [vmem:[%s6909_s14 + $0x588] sm:$0xff]  ;;  %v3473_v43 = vld [vmem:[%s6909_s14 + $0x510] sm:$0xff] }
0x1148   : > { %v3077_v8 = vpop.f32.mrb[26].mxu0  ;;  %v3148_v9 = vpop.f32.mrb[30].mxu1  ;;  %5106 = vmatpush3.bf16.msra.mxu0 %v5105_v57  ;;  %5138 = vmatpush3.bf16.msra.mxu1 %v5137_v61  ;;  %v5119_v57 = vpack.c.bf16 %v3404_v41, %v3403_v40  ;;  %v3441_v41 = vld [vmem:[%s6909_s14 + $0x410] sm:$0xff]  ;;  %v3460_v58 = vld [vmem:[%s6909_s14 + $0x4a8] sm:$0xff] }
0x1149   : > { %v6367_v18 = vadd.f32 %v3077_v8, %v2679_v60  ;;  %v6369_v19 = vadd.f32 %v3148_v9, %v2687_v0  ;;  %v6371_v20 = vpop.f32.mrb[27].mxu0  ;;  %v6373_v11 = vpop.f32.mrb[31].mxu1  ;;  %5108 = vmatprep.subr.bf16.mxu0 %v5107_v48  ;;  %5140 = vmatprep.subr.bf16.mxu1 %v5139_v1  ;;  %v3419_v0 = vld [vmem:[%s6909_s14 + $0x360] sm:$0xff]  ;;  %v3420_v48 = vld [vmem:[%s6909_s14 + $0x368] sm:$0xff]  ;;  %v3406_v1 = vld [vmem:[%s6909_s14 + $0x2f8] sm:$0xff] }
0x114a   : > { %v5153_v7 = vpack.c.bf16 %v3420_v48, %v3419_v0  ;;  %v3389_v8 = vld [vmem:[%s6909_s14 + $0x270] sm:$0xff]  ;;  %v3390_v9 = vld [vmem:[%s6909_s14 + $0x278] sm:$0xff]  ;;  %v3151_v35 = vadd.f32 %v6373_v11, %v2691_v24  ;;  %v5193_v11 = vpack.c.bf16 %v3472_v29, %v3471_v34  ;;  %v3492_v0 = vld [vmem:[%s6909_s14 + $0x5a8] sm:$0xff]  ;;  %v5165_v48 = vpack.c.bf16 %v3442_v42, %v3441_v41 }
0x114b   : > { %v5125_v25 = vpack.c.bf16 %v3390_v9, %v3389_v8  ;;  %v3461_v8 = vld [vmem:[%s6909_s14 + $0x4b0] sm:$0xff]  ;;  %v3462_v9 = vld [vmem:[%s6909_s14 + $0x4b8] sm:$0xff]  ;;  %v3463_v24 = vld [vmem:[%s6909_s14 + $0x4c0] sm:$0xff] }
0x114c   : > { %5110 = vmatpush3.bf16.msra.mxu0 %v5109_v12  ;;  %5142 = vmatpush3.bf16.msra.mxu1 %v5141_v13  ;;  %v3421_v12 = vld [vmem:[%s6909_s14 + $0x370] sm:$0xff]  ;;  %v2671_v13 = vrot.slane %v6231_v50, %v2670_v45  ;;  %v2683_v45 = vrot.slane %v6219_v46, %v2650_v51  ;;  %v3487_v50 = vld [vmem:[%s6909_s14 + $0x580] sm:$0xff]  ;;  %v3306_v59 = vmax.f32 %v3151_v35, 0.0  ;;  %v3480_v29 = vld [vmem:[%s6909_s14 + $0x548] sm:$0xff] }
0x114d   : > { %5112 = vmatprep.subr.bf16.mxu0 %v5111_v15  ;;  %5144 = vmatprep.subr.bf16.mxu1 %v5143_v21  ;;  %v3455_v21 = vld [vmem:[%s6909_s14 + $0x480] sm:$0xff]  ;;  %v5157_v26 = vpack.c.bf16 %v3422_v17, %v3421_v12  ;;  %v3493_v12 = vld [vmem:[%s6909_s14 + $0x5b0] sm:$0xff]  ;;  %v5171_v17 = vpack.c.bf16 %v3462_v9, %v3461_v8  ;;  %v3466_v35 = vld [vmem:[%s6909_s14 + $0x4d8] sm:$0xff] }
0x114e   : > { %v5159_v14 = vpack.c.bf16 %v3456_v22, %v3455_v21  ;;  %v3007_v51 = vadd.f32 %v6305_v31, %v2671_v13  ;;  %v3080_v33 = vadd.f32 %v6371_v20, %v2683_v45  ;;  %v3457_v31 = vld [vmem:[%s6909_s14 + $0x490] sm:$0xff]  ;;  %v3494_v13 = vld [vmem:[%s6909_s14 + $0x5b8] sm:$0xff] }
0x114f   : > { %v3489_v20 = vld [vmem:[%s6909_s14 + $0x590] sm:$0xff]  ;;  %v3446_v22 = vld [vmem:[%s6909_s14 + $0x438] sm:$0xff] }
0x1150   : > { %v3219_v53 = vpop.f32.mrb[28].mxu0  ;;  %v3290_v54 = vpop.f32.mrb[32].mxu1  ;;  %5114 = vmatpush3.bf16.msra.mxu0 %v5113_v28  ;;  %5146 = vmatpush3.bf16.msra.mxu1 %v5145_v32  ;;  %v5191_v28 = vpack.c.bf16 %v3488_v23, %v3487_v50  ;;  %v3439_v32 = vld [vmem:[%s6909_s14 + $0x400] sm:$0xff]  ;;  %v3301_v40 = vmax.f32 %v3007_v51, 0.0  ;;  %v3445_v21 = vld [vmem:[%s6909_s14 + $0x430] sm:$0xff]  ;;  %v5203_v50 = vpack.c.bf16 %v3494_v13, %v3493_v12  ;;  %v3478_v23 = vld [vmem:[%s6909_s14 + $0x538] sm:$0xff] }
0x1151   : > { %v6425_v60 = vadd.f32 %v3219_v53, %v2695_v36  ;;  %v6428_v61 = vadd.f32 %v3290_v54, %v6224_v47  ;;  %v6430_v62 = vpop.f32.mrb[29].mxu0  ;;  %v6432_v3 = vpop.f32.mrb[33].mxu1  ;;  %5116 = vmatprep.subr.bf16.mxu0 %v5115_v37  ;;  %5148 = vmatprep.subr.bf16.mxu1 %v5147_v38  ;;  %v3405_v47 = vld [vmem:[%s6909_s14 + $0x2f0] sm:$0xff]  ;;  %v3458_v36 = vld [vmem:[%s6909_s14 + $0x498] sm:$0xff]  ;;  %v5161_v38 = vpack.c.bf16 %v3440_v52, %v3439_v32  ;;  %v3304_v53 = vmax.f32 %v3080_v33, 0.0  ;;  %v3447_v32 = vld [vmem:[%s6909_s14 + $0x440] sm:$0xff] }
0x1152   : > { %v5123_v15 = vpack.c.bf16 %v3406_v1, %v3405_v47  ;;  %v3490_v37 = vld [vmem:[%s6909_s14 + $0x598] sm:$0xff]  ;;  %v5163_v54 = vpack.c.bf16 %v3458_v36, %v3457_v31  ;;  %v3477_v45 = vld [vmem:[%s6909_s14 + $0x530] sm:$0xff]  ;;  %v5173_v27 = vpack.c.bf16 %v3446_v22, %v3445_v21  ;;  %v3448_v52 = vld [vmem:[%s6909_s14 + $0x448] sm:$0xff] }
0x1153   : > { %v5205_v51 = vpack.c.bf16 %v3478_v23, %v3477_v45  ;;  %v3479_v33 = vld [vmem:[%s6909_s14 + $0x540] sm:$0xff]  ;;  %v3465_v31 = vld [vmem:[%s6909_s14 + $0x4d0] sm:$0xff]  ;;  %v3454_v13 = vld [vmem:[%s6909_s14 + $0x478] sm:$0xff]  ;;  %v2699_v45 = vrot.slane %v6219_v46, %v2666_v30 }
0x1154   : > { %5118 = vmatpush3.bf16.msra.mxu0 %v5117_v55  ;;  %5150 = vmatpush3.bf16.msra.mxu1 %v5149_v56  ;;  %v5195_v55 = vpack.c.bf16 %v3490_v37, %v3489_v20  ;;  %v3474_v56 = vld [vmem:[%s6909_s14 + $0x518] sm:$0xff]  ;;  %v3497_v36 = vld [vmem:[%s6909_s14 + $0x5d0] sm:$0xff]  ;;  %v5177_v37 = vpack.c.bf16 %v3448_v52, %v3447_v32  ;;  %v3519_v21 = vld [vmem:[%s6909_s14 + $0x680] sm:$0xff] }
0x1155   : > { %5120 = vmatprep.subr.bf16.mxu0 %v5119_v57  ;;  %5152 = vmatprep.subr.bf16.mxu1 %v5151_v63  ;;  %v3459_v57 = vld [vmem:[%s6909_s14 + $0x4a0] sm:$0xff]  ;;  %v5197_v47 = vpack.c.bf16 %v3474_v56, %v3473_v43  ;;  %v3498_v20 = vld [vmem:[%s6909_s14 + $0x5d8] sm:$0xff]  ;;  %v3481_v41 = vld [vmem:[%s6909_s14 + $0x550] sm:$0xff] }
0x1156   : > { %v3491_v63 = vld [vmem:[%s6909_s14 + $0x5a0] sm:$0xff]  ;;  %v5167_v1 = vpack.c.bf16 %v3460_v58, %v3459_v57  ;;  %v5211_v42 = vpack.c.bf16 %v3498_v20, %v3497_v36  ;;  %v3482_v43 = vld [vmem:[%s6909_s14 + $0x558] sm:$0xff]  ;;  %v3500_v56 = vld [vmem:[%s6909_s14 + $0x5e8] sm:$0xff]  ;;  %v3305_v20 = vmax.f32 %v6369_v19, 0.0 }
0x1157   : > { %v5213_v58 = vpack.c.bf16 %v3482_v43, %v3481_v41  ;;  %v3453_v12 = vld [vmem:[%s6909_s14 + $0x470] sm:$0xff]  ;;  %v3520_v22 = vld [vmem:[%s6909_s14 + $0x688] sm:$0xff]  ;;  %v3503_v30 = vld [vmem:[%s6909_s14 + $0x600] sm:$0xff] }
0x1158   : > { %5122 = vmatpush3.bf16.msra.mxu0 %v5121_v49  ;;  %5154 = vmatpush3.bf16.msra.mxu1 %v5153_v7  ;;  %v5199_v49 = vpack.c.bf16 %v3492_v0, %v3491_v63  ;;  %v3476_v7 = vld [vmem:[%s6909_s14 + $0x528] sm:$0xff]  ;;  %v3451_v63 = vld [vmem:[%s6909_s14 + $0x460] sm:$0xff]  ;;  %v3522_v32 = vld [vmem:[%s6909_s14 + $0x698] sm:$0xff] }
0x1159   : > { %5124 = vmatprep.subr.bf16.mxu0 %v5123_v15  ;;  %5156 = vmatprep.subr.bf16.mxu1 %v5155_v16  ;;  %v5169_v15 = vpack.c.bf16 %v3444_v4, %v3443_v2  ;;  %v5201_v16 = vpack.c.bf16 %v3476_v7, %v3475_v5  ;;  %v3452_v0 = vld [vmem:[%s6909_s14 + $0x468] sm:$0xff]  ;;  %v3469_v2 = vld [vmem:[%s6909_s14 + $0x4f0] sm:$0xff]  ;;  %v3470_v4 = vld [vmem:[%s6909_s14 + $0x4f8] sm:$0xff] }
0x115a   : > { %v3501_v5 = vld [vmem:[%s6909_s14 + $0x5f0] sm:$0xff]  ;;  %v5185_v7 = vpack.c.bf16 %v3452_v0, %v3451_v63  ;;  %v5187_v9 = vpack.c.bf16 %v3470_v4, %v3469_v2  ;;  %v3552_v23 = vld [vmem:[%s6909_s14 + $0x788] sm:$0xff]  ;;  %v3555_v19 = vld [vmem:[%s6909_s14 + $0x7a0] sm:$0xff] }
0x115b   : > { %v3537_v36 = vld [vmem:[%s6909_s14 + $0x710] sm:$0xff]  ;;  %v3556_v41 = vld [vmem:[%s6909_s14 + $0x7a8] sm:$0xff]  ;;  %v3526_v0 = vld [vmem:[%s6909_s14 + $0x6b8] sm:$0xff] }
0x115c   : > { %5126 = vmatpush3.bf16.msra.mxu0 %v5125_v25  ;;  %5158 = vmatpush3.bf16.msra.mxu1 %v5157_v26  ;;  %v3464_v25 = vld [vmem:[%s6909_s14 + $0x4c8] sm:$0xff]  ;;  %v3495_v26 = vld [vmem:[%s6909_s14 + $0x5c0] sm:$0xff]  ;;  %v3525_v63 = vld [vmem:[%s6909_s14 + $0x6b0] sm:$0xff] }
0x115d   : > { %5160 = vmatprep.subr.bf16.mxu0 %v5159_v14  ;;  %5192 = vmatprep.subr.bf16.mxu1 %v5191_v28  ;;  %v3496_v14 = vld [vmem:[%s6909_s14 + $0x5c8] sm:$0xff]  ;;  %v5175_v28 = vpack.c.bf16 %v3464_v25, %v3463_v24  ;;  %v2707_v24 = vrot.slane %v6219_v46, %v2674_v6  ;;  %v5189_v25 = vpack.c.bf16 %v3454_v13, %v3453_v12  ;;  %v3527_v12 = vld [vmem:[%s6909_s14 + $0x6c0] sm:$0xff] }
0x115e   : > { %v5207_v34 = vpack.c.bf16 %v3496_v14, %v3495_v26  ;;  %v5223_v14 = vpack.c.bf16 %v3520_v22, %v3519_v21  ;;  %v3536_v46 = vld [vmem:[%s6909_s14 + $0x708] sm:$0xff]  ;;  %v3222_v6 = vadd.f32 %v6430_v62, %v2699_v45  ;;  %v3554_v62 = vld [vmem:[%s6909_s14 + $0x798] sm:$0xff]  ;;  %v5235_v4 = vpack.c.bf16 %v3526_v0, %v3525_v63  ;;  %v3511_v45 = vld [vmem:[%s6909_s14 + $0x640] sm:$0xff] }
0x115f   : > { %3779 = vmatmul.mubr.f32.vlgmr.msra.gmra.mrb[32].mxu0 %v3299_v39  ;;  %3849 = vmatmul.mubr.f32.vlgmr.msra.gmra.mrb[36].mxu1 %v3301_v40  ;;  %v5179_v39 = vpack.c.bf16 %v3466_v35, %v3465_v31  ;;  %v3449_v40 = vld [vmem:[%s6909_s14 + $0x450] sm:$0xff]  ;;  %v3293_v52 = vadd.f32 %v6432_v3, %v2707_v24  ;;  %v5257_v31 = vpack.c.bf16 %v3536_v46, %v3535_v44  ;;  %v3506_v3 = vld [vmem:[%s6909_s14 + $0x618] sm:$0xff]  ;;  %v3528_v13 = vld [vmem:[%s6909_s14 + $0x6c8] sm:$0xff]  ;;  %v3307_v0 = vmax.f32 %v6425_v60, 0.0 }
0x1160   : > { %5162 = vmatpush3.bf16.msra.mxu0 %v5161_v38  ;;  %3918 = vmatprep.mubr.f32.mxu0 %v3304_v53  ;;  %v5209_v38 = vpack.c.bf16 %v3480_v29, %v3479_v33  ;;  %v3467_v53 = vld [vmem:[%s6909_s14 + $0x4e0] sm:$0xff]  ;;  %v3303_v29 = vmax.f32 %v6367_v18, 0.0  ;;  %v3505_v35 = vld [vmem:[%s6909_s14 + $0x610] sm:$0xff]  ;;  %v3538_v18 = vld [vmem:[%s6909_s14 + $0x718] sm:$0xff]  ;;  %v5239_v22 = vpack.c.bf16 %v3528_v13, %v3527_v12 }
0x1161   : > { %5194 = vmatpush3.bf16.msra.mxu1 %v5193_v11  ;;  %3988 = vmatprep.mubr.f32.mxu1 %v3306_v59  ;;  %v3450_v11 = vld [vmem:[%s6909_s14 + $0x458] sm:$0xff]  ;;  %v5229_v43 = vpack.c.bf16 %v3506_v3, %v3505_v35 }
0x1162   : > { %5164 = vmatprep.subr.bf16.mxu0 %v5163_v54  ;;  %5196 = vmatprep.subr.bf16.mxu1 %v5195_v55  ;;  %v3468_v54 = vld [vmem:[%s6909_s14 + $0x4e8] sm:$0xff]  ;;  %v3499_v55 = vld [vmem:[%s6909_s14 + $0x5e0] sm:$0xff]  ;;  %v5181_v57 = vpack.c.bf16 %v3450_v11, %v3449_v40  ;;  %v3308_v40 = vmax.f32 %v3222_v6, 0.0  ;;  %v3513_v6 = vld [vmem:[%s6909_s14 + $0x650] sm:$0xff] }
0x1163   : > { %v5183_v59 = vpack.c.bf16 %v3468_v54, %v3467_v53  ;;  %v5261_v53 = vpack.c.bf16 %v3538_v18, %v3537_v36  ;;  %v3547_v18 = vld [vmem:[%s6909_s14 + $0x760] sm:$0xff] }
0x1164   : > { %5166 = vmatpush3.bf16.msra.mxu0 %v5165_v48  ;;  %v3483_v48 = vld [vmem:[%s6909_s14 + $0x560] sm:$0xff] }
0x1165   : > { %5198 = vmatpush3.bf16.msra.mxu1 %v5197_v47  ;;  %5168 = vmatprep.subr.bf16.mxu0 %v5167_v1  ;;  %v5215_v47 = vpack.c.bf16 %v3500_v56, %v3499_v55  ;;  %v3484_v1 = vld [vmem:[%s6909_s14 + $0x568] sm:$0xff]  ;;  %v3507_v55 = vld [vmem:[%s6909_s14 + $0x620] sm:$0xff] }
0x1166   : > { %5200 = vmatprep.subr.bf16.mxu1 %v5199_v49  ;;  %v3502_v49 = vld [vmem:[%s6909_s14 + $0x5f8] sm:$0xff]  ;;  %v5217_v8 = vpack.c.bf16 %v3484_v1, %v3483_v48  ;;  %v3508_v56 = vld [vmem:[%s6909_s14 + $0x628] sm:$0xff]  ;;  %v3557_v48 = vld [vmem:[%s6909_s14 + $0x7b0] sm:$0xff] }
0x1167   : > { %v5233_v1 = vpack.c.bf16 %v3508_v56, %v3507_v55  ;;  %v3518_v55 = vld [vmem:[%s6909_s14 + $0x678] sm:$0xff] }
0x1168   : > { %5170 = vmatpush3.bf16.msra.mxu0 %v5169_v15  ;;  %v3485_v15 = vld [vmem:[%s6909_s14 + $0x570] sm:$0xff] }
0x1169   : > { %5202 = vmatpush3.bf16.msra.mxu1 %v5201_v16  ;;  %5172 = vmatprep.subr.bf16.mxu0 %v5171_v17  ;;  %v5219_v16 = vpack.c.bf16 %v3502_v49, %v3501_v5  ;;  %v3486_v17 = vld [vmem:[%s6909_s14 + $0x578] sm:$0xff]  ;;  %v3509_v5 = vld [vmem:[%s6909_s14 + $0x630] sm:$0xff] }
0x116a   : > { %5204 = vmatprep.subr.bf16.mxu1 %v5203_v50  ;;  %v3551_v50 = vld [vmem:[%s6909_s14 + $0x780] sm:$0xff]  ;;  %v5221_v26 = vpack.c.bf16 %v3486_v17, %v3485_v15  ;;  %v3510_v49 = vld [vmem:[%s6909_s14 + $0x638] sm:$0xff] }
0x116b   : > { %v3559_v15 = vld [vmem:[%s6909_s14 + $0x7c0] sm:$0xff]  ;;  %v5237_v17 = vpack.c.bf16 %v3510_v49, %v3509_v5 }
0x116c   : > { %5174 = vmatpush3.bf16.msra.mxu0 %v5173_v27  ;;  %v3504_v27 = vld [vmem:[%s6909_s14 + $0x608] sm:$0xff] }
0x116d   : > { %5206 = vmatpush3.bf16.msra.mxu1 %v5205_v51  ;;  %5176 = vmatprep.subr.bf16.mxu0 %v5175_v28  ;;  %v5255_v51 = vpack.c.bf16 %v3552_v23, %v3551_v50  ;;  %v3521_v28 = vld [vmem:[%s6909_s14 + $0x690] sm:$0xff]  ;;  %v5225_v33 = vpack.c.bf16 %v3504_v27, %v3503_v30  ;;  %v3512_v50 = vld [vmem:[%s6909_s14 + $0x648] sm:$0xff]  ;;  %v3543_v23 = vld [vmem:[%s6909_s14 + $0x740] sm:$0xff] }
0x116e   : > { %5208 = vmatprep.subr.bf16.mxu1 %v5207_v34  ;;  %v3553_v34 = vld [vmem:[%s6909_s14 + $0x790] sm:$0xff]  ;;  %v3562_v27 = vld [vmem:[%s6909_s14 + $0x7d8] sm:$0xff] }
0x116f   : > { %v5259_v11 = vpack.c.bf16 %v3554_v62, %v3553_v34  ;;  %v3561_v30 = vld [vmem:[%s6909_s14 + $0x7d0] sm:$0xff]  ;;  %v3531_v34 = vld [vmem:[%s6909_s14 + $0x6e0] sm:$0xff]  ;;  %v3532_v62 = vld [vmem:[%s6909_s14 + $0x6e8] sm:$0xff] }
0x1170   : > { %5178 = vmatpush3.bf16.msra.mxu0 %v5177_v37  ;;  %v5227_v37 = vpack.c.bf16 %v3522_v32, %v3521_v28  ;;  %v3514_v28 = vld [vmem:[%s6909_s14 + $0x658] sm:$0xff]  ;;  %v3545_v32 = vld [vmem:[%s6909_s14 + $0x750] sm:$0xff]  ;;  %v5247_v36 = vpack.c.bf16 %v3532_v62, %v3531_v34 }
0x1171   : > { %5210 = vmatpush3.bf16.msra.mxu1 %v5209_v38  ;;  %5180 = vmatprep.subr.bf16.mxu0 %v5179_v39  ;;  %v3523_v38 = vld [vmem:[%s6909_s14 + $0x6a0] sm:$0xff]  ;;  %v3524_v39 = vld [vmem:[%s6909_s14 + $0x6a8] sm:$0xff]  ;;  %v5245_v35 = vpack.c.bf16 %v3514_v28, %v3513_v6 }
0x1172   : > { %5212 = vmatprep.subr.bf16.mxu1 %v5211_v42  ;;  %v3310_v42 = vmax.f32 %v3293_v52, 0.0  ;;  %v5231_v54 = vpack.c.bf16 %v3524_v39, %v3523_v38  ;;  %v5275_v52 = vpack.c.bf16 %v3562_v27, %v3561_v30  ;;  %v3548_v39 = vld [vmem:[%s6909_s14 + $0x768] sm:$0xff] }
0x1174   : > { %5182 = vmatpush3.bf16.msra.mxu0 %v5181_v57  ;;  %v3539_v57 = vld [vmem:[%s6909_s14 + $0x720] sm:$0xff] }
0x1175   : > { %5214 = vmatpush3.bf16.msra.mxu1 %v5213_v58  ;;  %5184 = vmatprep.subr.bf16.mxu0 %v5183_v59  ;;  %v5263_v58 = vpack.c.bf16 %v3556_v41, %v3555_v19  ;;  %v3540_v59 = vld [vmem:[%s6909_s14 + $0x728] sm:$0xff]  ;;  %v3565_v19 = vld [vmem:[%s6909_s14 + $0x7f0] sm:$0xff]  ;;  %v3566_v41 = vld [vmem:[%s6909_s14 + $0x7f8] sm:$0xff] }
0x1176   : > { %5216 = vmatprep.subr.bf16.mxu1 %v5215_v47  ;;  %v3558_v47 = vld [vmem:[%s6909_s14 + $0x7b8] sm:$0xff]  ;;  %v5265_v2 = vpack.c.bf16 %v3540_v59, %v3539_v57  ;;  %v5283_v56 = vpack.c.bf16 %v3566_v41, %v3565_v19  ;;  %v3549_v57 = vld [vmem:[%s6909_s14 + $0x770] sm:$0xff] }
0x1178   : > { %5186 = vmatpush3.bf16.msra.mxu0 %v5185_v7  ;;  %v3541_v7 = vld [vmem:[%s6909_s14 + $0x730] sm:$0xff] }
0x1179   : > { %5218 = vmatpush3.bf16.msra.mxu1 %v5217_v8  ;;  %5188 = vmatprep.subr.bf16.mxu0 %v5187_v9  ;;  %v5267_v8 = vpack.c.bf16 %v3558_v47, %v3557_v48  ;;  %v3542_v9 = vld [vmem:[%s6909_s14 + $0x738] sm:$0xff]  ;;  %v3309_v48 = vmax.f32 %v6428_v61, 0.0 }
0x117a   : > { %5220 = vmatprep.subr.bf16.mxu1 %v5219_v16  ;;  %v3560_v16 = vld [vmem:[%s6909_s14 + $0x7c8] sm:$0xff]  ;;  %v5269_v21 = vpack.c.bf16 %v3542_v9, %v3541_v7 }
0x117b   : > { %v5271_v24 = vpack.c.bf16 %v3560_v16, %v3559_v15 }
0x117c   : > { %5190 = vmatpush3.bf16.msra.mxu0 %v5189_v25  ;;  %v3544_v25 = vld [vmem:[%s6909_s14 + $0x748] sm:$0xff] }
0x117d   : > { %5222 = vmatpush3.bf16.msra.mxu1 %v5221_v26  ;;  %5224 = vmatprep.subr.bf16.mxu0 %v5223_v14  ;;  %v3529_v26 = vld [vmem:[%s6909_s14 + $0x6d0] sm:$0xff]  ;;  %v3530_v14 = vld [vmem:[%s6909_s14 + $0x6d8] sm:$0xff]  ;;  %v5273_v44 = vpack.c.bf16 %v3544_v25, %v3543_v23 }
0x117e   : > { %5256 = vmatprep.subr.bf16.mxu1 %v5255_v51  ;;  %v5241_v51 = vpack.c.bf16 %v3512_v50, %v3511_v45  ;;  %v5243_v46 = vpack.c.bf16 %v3530_v14, %v3529_v26 }
0x117f   : > { %3919 = vmatmul.mubr.f32.vlgmr.msra.gmra.mrb[34].mxu0 %v3303_v29  ;;  %v3563_v29 = vld [vmem:[%s6909_s14 + $0x7e0] sm:$0xff] }
0x1180   : > { %3989 = vmatmul.mubr.f32.vlgmr.msra.gmra.mrb[38].mxu1 %v3305_v20  ;;  %5226 = vmatpush3.bf16.msra.mxu0 %v5225_v33  ;;  %v3546_v33 = vld [vmem:[%s6909_s14 + $0x758] sm:$0xff]  ;;  %v3515_v20 = vld [vmem:[%s6909_s14 + $0x660] sm:$0xff] }
0x1181   : > { %4058 = vmatprep.mubr.f32.mxu0 %v3308_v40  ;;  %5258 = vmatpush3.bf16.msra.mxu1 %v5257_v31  ;;  %v3564_v31 = vld [vmem:[%s6909_s14 + $0x7e8] sm:$0xff]  ;;  %v5277_v3 = vpack.c.bf16 %v3546_v33, %v3545_v32  ;;  %v3533_v40 = vld [vmem:[%s6909_s14 + $0x6f0] sm:$0xff] }
0x1182   : > { %4128 = vmatprep.mubr.f32.mxu1 %v3310_v42  ;;  %5228 = vmatprep.subr.bf16.mxu0 %v5227_v37  ;;  %v3516_v37 = vld [vmem:[%s6909_s14 + $0x668] sm:$0xff]  ;;  %v5279_v38 = vpack.c.bf16 %v3564_v31, %v3563_v29 }
0x1183   : > { %5260 = vmatprep.subr.bf16.mxu1 %v5259_v11  ;;  %v3534_v11 = vld [vmem:[%s6909_s14 + $0x6f8] sm:$0xff]  ;;  %v5249_v42 = vpack.c.bf16 %v3516_v37, %v3515_v20 }
0x1184   : > { %5230 = vmatpush3.bf16.msra.mxu0 %v5229_v43  ;;  %v5281_v43 = vpack.c.bf16 %v3548_v39, %v3547_v18 }
0x1185   : > { %5262 = vmatpush3.bf16.msra.mxu1 %v5261_v53  ;;  %5232 = vmatprep.subr.bf16.mxu0 %v5231_v54  ;;  %v5251_v53 = vpack.c.bf16 %v3534_v11, %v3533_v40  ;;  %v3517_v54 = vld [vmem:[%s6909_s14 + $0x670] sm:$0xff] }
0x1186   : > { %5264 = vmatprep.subr.bf16.mxu1 %v5263_v58  ;;  %v3550_v58 = vld [vmem:[%s6909_s14 + $0x778] sm:$0xff]  ;;  %v5253_v59 = vpack.c.bf16 %v3518_v55, %v3517_v54 }
0x1187   : > { %v5285_v63 = vpack.c.bf16 %v3550_v58, %v3549_v57 }
0x1188   : > { %5234 = vmatpush3.bf16.msra.mxu0 %v5233_v1 }
0x1189   : > { %5266 = vmatpush3.bf16.msra.mxu1 %v5265_v2  ;;  %5236 = vmatprep.subr.bf16.mxu0 %v5235_v4  ;;  %v4334_v2 = vld [vmem:[%s6910_s15] ss:$0 sm:$0xff] }
0x118a   : > { %5268 = vmatprep.subr.bf16.mxu1 %v5267_v8 }
0x118c   : > { %5238 = vmatpush3.bf16.msra.mxu0 %v5237_v17 }
0x118d   : > { %5270 = vmatpush3.bf16.msra.mxu1 %v5269_v21  ;;  %5240 = vmatprep.subr.bf16.mxu0 %v5239_v22 }
0x118e   : > { %5272 = vmatprep.subr.bf16.mxu1 %v5271_v24 }
0x1190   : > { %5242 = vmatpush3.bf16.msra.mxu0 %v5241_v51 }
0x1191   : > { %5274 = vmatpush3.bf16.msra.mxu1 %v5273_v44  ;;  %5244 = vmatprep.subr.bf16.mxu0 %v5243_v46 }
0x1192   : > { %5276 = vmatprep.subr.bf16.mxu1 %v5275_v52 }
0x1194   : > { %5246 = vmatpush3.bf16.msra.mxu0 %v5245_v35 }
0x1195   : > { %5278 = vmatpush3.bf16.msra.mxu1 %v5277_v3  ;;  %5248 = vmatprep.subr.bf16.mxu0 %v5247_v36 }
0x1196   : > { %5280 = vmatprep.subr.bf16.mxu1 %v5279_v38  ;;  %v4336_v38 = vld [vmem:[%s6912_s17] ss:$0 sm:$0xff] }
0x1198   : > { %5250 = vmatpush3.bf16.msra.mxu0 %v5249_v42 }
0x1199   : > { %5282 = vmatpush3.bf16.msra.mxu1 %v5281_v43  ;;  %5252 = vmatprep.subr.bf16.mxu0 %v5251_v53 }
0x119a   : > { %5284 = vmatprep.subr.bf16.mxu1 %v5283_v56 }
0x119c   : > { %5254 = vmatpush3.bf16.msra.mxu0 %v5253_v59 }
0x119d   : > { %5286 = vmatpush3.bf16.msra.mxu1 %v5285_v63 }
0x119f   : > { %4059 = vmatmul.mubr.f32.vlgmr.msra.gmra.mrb[36].mxu0 %v3307_v0 }
0x11a0   : > { %4129 = vmatmul.mubr.f32.vlgmr.msra.gmra.mrb[40].mxu1 %v3309_v48 }
0x1212   : > { %v4455_v47 = vpop.f32.mrb[30].mxu0  ;;  %v4490_v1 = vpop.f32.mrb[34].mxu1 }
0x1213   : > { %v4456_v4 = vpop.f32.mrb[31].mxu0  ;;  %v4491_v5 = vpop.f32.mrb[35].mxu1 }
0x1214   : > { %v4457_v49 = vadd.f32 %v4456_v4, %v4455_v47  ;;  %v4492_v7 = vadd.f32 %v4491_v5, %v4490_v1 }
0x1216   : > { %v3641_v8 = vadd.f32 %v4457_v49, %v4334_v2 }
0x1218   : > { %v3711_v9 = vadd.f32 %v4492_v7, %v3641_v8 }
0x1232   : > { %v4525_v12 = vpop.f32.mrb[32].mxu0  ;;  %v4560_v13 = vpop.f32.mrb[36].mxu1 }
0x1233   : > { %v4526_v60 = vpop.f32.mrb[33].mxu0  ;;  %v4561_v15 = vpop.f32.mrb[37].mxu1 }
0x1234   : > { %v4527_v16 = vadd.f32 %v4526_v60, %v4525_v12  ;;  %v4562_v61 = vadd.f32 %v4561_v15, %v4560_v13 }
0x1236   : > { %v3781_v17 = vadd.f32 %v4527_v16, %v3711_v9 }
0x1238   : > { %v3851_v21 = vadd.f32 %v4562_v61, %v3781_v17 }
0x1252   : > { %v4595_v22 = vpop.f32.mrb[34].mxu0 }
0x1253   : > { %v4630_v45 = vpop.f32.mrb[38].mxu1  ;;  %v4596_v50 = vpop.f32.mrb[35].mxu0 }
0x1254   : > { %v4597_v23 = vadd.f32 %v4596_v50, %v4595_v22  ;;  %v4631_v24 = vpop.f32.mrb[39].mxu1 }
0x1255   : > { %v4632_v25 = vadd.f32 %v4631_v24, %v4630_v45 }
0x1256   : > { %v3921_v26 = vadd.f32 %v4597_v23, %v3851_v21 }
0x1258   : > { %v3991_v14 = vadd.f32 %v4632_v25, %v3921_v26 }
0x1272   : > { %v4665_v30 = vpop.f32.mrb[36].mxu0 }
0x1273   : > { %v4700_v27 = vpop.f32.mrb[40].mxu1  ;;  %v4666_v51 = vpop.f32.mrb[37].mxu0 }
0x1274   : > { %v4667_v44 = vadd.f32 %v4666_v51, %v4665_v30  ;;  %v4701_v46 = vpop.f32.mrb[41].mxu1 }
0x1275   : > { %v4702_v6 = vadd.f32 %v4701_v46, %v4700_v27 }
0x1276   : > { %v4061_v28 = vadd.f32 %v4667_v44, %v3991_v14 }
0x1278   : > { %v4131_v32 = vadd.f32 %v4702_v6, %v4061_v28 }
0x127a   : > { %v4134_v52 = vadd.f32 %v4131_v32, %v5883_v10  ;;  %v4335_v10 = vld [vmem:[%s6911_s16] ss:$0 sm:$0xff] }
0x127c   : > { %v4137_v33 = vsel %vm598_vm1, %v4134_v52, 0.0 }
0x127d   : > { %4138 = vadd.xlane.f32.xlu0 %v4137_v33 }
0x130a   : > { %v4139_v34 = vpop.xlane.xlu0 %4138 }
0x130b   : > { %v4140_v62 = vmul.f32 0.03125, %v4139_v34 }
0x130d   : > { %v4141_v29 = vsub.f32 %v4134_v52, %v4140_v62 }
0x130f   : > { %v4142_v31 = vmul.f32 %v4141_v29, %v4141_v29 }
0x1311   : > { %v4143_v35 = vsel %vm598_vm1, %v4142_v31, 0.0 }
0x1312   : > { %4144 = vadd.xlane.f32.xlu1 %v4143_v35 }
0x139f   : > { %v4145_v3 = vpop.xlane.xlu1 %4144 }
0x13a0   : > { %v4146_v36 = vmul.f32 0.03125, %v4145_v3 }
0x13a2   : > { %v4147_v20 = vadd.f32 1e-05, %v4146_v36 }
0x13a4   : > { %5316 = vrsqrt.f32 %v4147_v20 }
0x13ae   : > { %v5317_v37 = vpop.eup %5316 }
0x13af   : > { %v4149_v18 = vmul.f32 %v5317_v37, %v4141_v29 }
0x13b1   : > { %v4156_v39 = vmul.f32 %v4335_v10, %v4149_v18 }
0x13b3   : > { %v4163_v40 = vadd.f32 %v4336_v38, %v4156_v39 }
0x13b5   : > { %4164 = vst.msk [vmem:[%s584_s2] sm:$0xff] %vm598_vm1, %v4163_v40 }
0x13b6 PF: > { %s28_s27 = sadd.s32 1, %s5324_s27  }
0x13b7   : > { %p25_p4 = scmp.ge.s32.totalorder %s28_s27, 4  }
0x13b9   :  { %27 = sbr.rel (!%p25_p4) target bundleno = 4 (0x4), region = 146 }

// kernel: ehr_transformer_forward.4
= control target key start
LH: loop header
LB: loop body
LE: loop exit
PB: predicated region body
PF: predicated region fallthrough
CT: control target
= control target key end

     0   :  { %s7106_s0 = inlined_call_operand.vmem [shape: f32[2,8,16], index: 0, kind: input, shape index: {}]   ;;  %s7107_s1 = inlined_call_operand.vmem [shape: f32[8,32], index: 1, kind: input, shape index: {}]   ;;  %s7108_s2 = inlined_call_operand.vmem [shape: f32[16,32], index: 2, kind: input, shape index: {}]   ;;  %s7109_s3 = inlined_call_operand.vmem [shape: f32[1,32], index: 3, kind: input, shape index: {}]   ;;  %s7110_s4 = inlined_call_operand.vmem [shape: f32[2,1,8], index: 4, kind: input, shape index: {}]   ;;  %s7111_s5 = inlined_call_operand.vmem [shape: f32[4,32,8], index: 5, kind: input, shape index: {}]   ;;  %s7112_s6 = inlined_call_operand.vmem [shape: f32[4,32,8], index: 6, kind: input, shape index: {}]   ;;  %s7113_s7 = inlined_call_operand.vmem [shape: f32[4,32,8], index: 7, kind: input, shape index: {}]   ;;  %s7114_s8 = inlined_call_operand.vmem [shape: f32[4,1,8], index: 8, kind: input, shape index: {}]   ;;  %s7115_s9 = inlined_call_operand.vmem [shape: f32[4,1,8], index: 9, kind: input, shape index: {}]   ;;  %s7116_s10 = inlined_call_operand.vmem [shape: f32[4,1,8], index: 10, kind: input, shape index: {}]   ;;  %s7117_s11 = inlined_call_operand.vmem [shape: f32[4,8,32], index: 11, kind: input, shape index: {}]   ;;  %s7118_s12 = inlined_call_operand.vmem [shape: f32[1,32], index: 12, kind: input, shape index: {}]   ;;  %s7119_s13 = inlined_call_operand.vmem [shape: f32[1,32], index: 13, kind: input, shape index: {}]   ;;  %s7120_s14 = inlined_call_operand.vmem [shape: f32[1,32], index: 14, kind: input, shape index: {}]   ;;  %s7121_s15 = inlined_call_operand.vmem [shape: f32[32,2048], index: 15, kind: input, shape index: {}]   ;;  %s7122_s16 = inlined_call_operand.vmem [shape: f32[1,2048], index: 16, kind: input, shape index: {}]   ;;  %s7123_s17 = inlined_call_operand.vmem [shape: f32[2048,32], index: 17, kind: input, shape index: {}]   ;;  %s7124_s18 = inlined_call_operand.vmem [shape: f32[1,32], index: 18, kind: input, shape index: {}]   ;;  %s7125_s19 = inlined_call_operand.vmem [shape: f32[1,32], index: 19, kind: input, shape index: {}]   ;;  %s7126_s20 = inlined_call_operand.vmem [shape: f32[1,32], index: 20, kind: input, shape index: {}]   ;;  %s7127_s21 = inlined_call_operand.vmem [shape: f32[2,8,32], index: 21, kind: output, shape index: {}]  }
   0x1   :  { %7132 = sst [smem:[#allocation2_spill]] %s7106_s0 }
   0x2   :  { %7133 = sst [smem:[#allocation3_spill]] %s7107_s1 }
   0x3   :  { %7134 = sst [smem:[#allocation4_spill]] %s7108_s2  ;;  %s5620_s2 = smov 0  }
   0x4   :  { %7135 = sst [smem:[#allocation5_spill]] %s7109_s3 }
   0x5   :  { %7136 = sst [smem:[#allocation6_spill]] %s7110_s4 }
   0x6   :  { %7137 = sst [smem:[#allocation7_spill]] %s7111_s5 }
   0x7 LB: > { %s4393_s25 = sadd.s32 4294967295, %s5505_s2   ;;  %p4397_p0 = scmp.ge.s32.totalorder %s5505_s2, 1  ;;  %s5505_s2 = sphi %s5620_s2, %s31_s2  }
   0x8   : > { %p594_p1 = scmp.lt.s32.totalorder %s5505_s2, 3 }
   0xa   : > { %p595_p2 = pnand %p4397_p0, %p594_p1 }
   0xb   : > { %s7138_s3 = sld [smem:[#allocation4_spill]] (!%p595_p2)  ;;  %p655_p3 = scmp.lt.s32.totalorder (!%p595_p2), %s4393_s25, 1  ;;  %v5507_v2 = vmov (!%p595_p2), 0.0|0.0   ;;  %vm5508_vm0 = vmmov (!%p595_p2), 0   ;;  %v5509_v4 = vmov (!%p595_p2), 0.0   ;;  %v838_v7 = vld [vmem:[%s7112_s6] sm:$0xff] (!%p595_p2) }
   0xc   : > { %598 = sbr.rel (%p595_p2) target bundleno = 5264 (0x1490), region = 104  ;;  %5073 = vmatprep.subr.bf16.mxu0 (!%p595_p2), %v5507_v2  ;;  %4878 = vmatprep.mubr.msk.f32.mxu0 (!%p595_p2), %vm5508_vm0, %v5509_v4  ;;  %s7139_s30 = sld [smem:[#allocation7_spill]] (!%p595_p2)  ;;  %v839_v9 = vld [vmem:[%s7112_s6 + $0x8] sm:$0xff] (!%p595_p2)  ;;  %vm676_vm1 = vcmask (!%p595_p2), 130048   ;;  %v840_v15 = vld [vmem:[%s7112_s6 + $0x10] sm:$0xff] (!%p595_p2)  ;;  %v841_v16 = vld [vmem:[%s7112_s6 + $0x18] sm:$0xff] (!%p595_p2) }
   0xd   : > { %5076 = vmatprep.subr.bf16.mxu1 (!%p595_p2), %v5507_v2  ;;  %4889 = vmatprep.mubr.msk.f32.mxu1 (!%p595_p2), %vm5508_vm0, %v5509_v4  ;;  %v5083_v10 = vpack.c.bf16 (!%p595_p2), %v839_v9, %v838_v7  ;;  %s7140_s0 = sld [smem:[#allocation2_spill]] (!%p595_p2)  ;;  %v5086_v17 = vpack.c.bf16 (!%p595_p2), %v841_v16, %v840_v15  ;;  %s7141_s5 = sld [smem:[#allocation5_spill]] (!%p595_p2)  ;;  %v919_v19 = vld [vmem:[%s7113_s7] sm:$0xff] (!%p595_p2)  ;;  %v920_v20 = vld [vmem:[%s7113_s7 + $0x8] sm:$0xff] (!%p595_p2)  ;;  %vm764_vm2 = vcmask (!%p595_p2), 261120   ;;  %v921_v27 = vld [vmem:[%s7113_s7 + $0x10] sm:$0xff] (!%p595_p2) }
   0xe   : > { %s7142_s29 = sld [smem:[#allocation3_spill]] (!%p595_p2)  ;;  %v5089_v25 = vpack.c.bf16 (!%p595_p2), %v920_v20, %v919_v19  ;;  %v922_v28 = vld [vmem:[%s7113_s7 + $0x18] sm:$0xff] (!%p595_p2)  ;;  %v4426_v36 = vld [vmem:[%s7113_s7 + $0x20] sm:$0xff] (!%p595_p2)  ;;  %v4427_v37 = vld [vmem:[%s7113_s7 + $0x28] sm:$0xff] (!%p595_p2)  ;;  %vm1000_vm3 = vcmask (!%p595_p2), 64512   ;;  %s7143_s28 = sld [smem:[#allocation6_spill]] (!%p595_p2) }
   0xf   : > { %v5092_v29 = vpack.c.bf16 (!%p595_p2), %v922_v28, %v921_v27  ;;  %v5107_v38 = vpack.c.bf16 (!%p595_p2), %v4427_v37, %v4426_v36  ;;  %v4428_v39 = vld [vmem:[%s7113_s7 + $0x30] sm:$0xff] (!%p595_p2)  ;;  %v4429_v40 = vld [vmem:[%s7113_s7 + $0x38] sm:$0xff] (!%p595_p2)  ;;  %v4404_v42 = vld [vmem:[%s7115_s9] ss:$0 sm:$0xff] (!%p595_p2) }
  0x10   : > { %v5110_v41 = vpack.c.bf16 (!%p595_p2), %v4429_v40, %v4428_v39  ;;  %v4402_v45 = vld [vmem:[%s7114_s8] ss:$0 sm:$0xff] (!%p595_p2)  ;;  %v4420_v9 = vld [vmem:[%s7112_s6 + $0x28] sm:$0xff] (!%p595_p2)  ;;  %v4417_v20 = vld [vmem:[%s7114_s8 + $0x1] ss:$0 sm:$0xff] (!%p595_p2) }
  0x11   : > { %v667_v0 = vld [vmem:[%s7138_s3] sm:$0xff] (!%p595_p2)  ;;  %v668_v1 = vld [vmem:[%s7138_s3 + $0x8] sm:$0xff] (!%p595_p2) }
  0x12   : > { %v5074_v3 = vpack.c.bf16 (!%p595_p2), %v668_v1, %v667_v0  ;;  %v753_v5 = vld [vmem:[%s7139_s30] sm:$0xff] (!%p595_p2)  ;;  %v754_v6 = vld [vmem:[%s7139_s30 + $0x8] sm:$0xff] (!%p595_p2)  ;;  %v755_v12 = vld [vmem:[%s7139_s30 + $0x10] sm:$0xff] (!%p595_p2) }
  0x13   : > { %s7146_s25 = smov (!%p655_p3, %s4393_s25), 1  ;;  %v5077_v8 = vpack.c.bf16 %v754_v6, %v753_v5  ;;  %v756_v13 = vld [vmem:[%s7139_s30 + $0x18] sm:$0xff]  ;;  %v4400_v18 = vld [vmem:[%s7141_s5] ss:$0 sm:$0xff]  ;;  %v4413_v31 = vld [vmem:[%s7139_s30 + $0x28] sm:$0xff] }
  0x14   : > { %5075 = vmatpush3.bf16.msra.mxu0 %v5074_v3  ;;  %s7130_s27 = sshll.u32 %s7146_s25, 3  ;;  %v5080_v14 = vpack.c.bf16 %v756_v13, %v755_v12  ;;  %v750_v22 = vld [vmem:[%s7142_s29] sm:$0xff]  ;;  %v4414_v33 = vld [vmem:[%s7139_s30 + $0x30] sm:$0xff]  ;;  %v4415_v34 = vld [vmem:[%s7139_s30 + $0x38] sm:$0xff]  ;;  %s661_s29 = scalar_lea.vmem %s7143_s28, %s7146_s25 }
  0x15   : > { %5078 = vmatpush3.bf16.msra.mxu1 %v5077_v8  ;;  %5082 = vmatprep.subr.bf16.mxu0 %v5507_v2  ;;  %s658_s4 = scalar_lea.vmem %s7140_s0, %s7130_s27  ;;  %v4412_v30 = vld [vmem:[%s7139_s30 + $0x20] sm:$0xff]  ;;  %v5098_v35 = vpack.c.bf16 %v4415_v34, %v4414_v33  ;;  %v4421_v13 = vld [vmem:[%s7112_s6 + $0x30] sm:$0xff]  ;;  %v4436_v37 = vld [vmem:[%s7117_s11 + $0x8] sm:$0xff]  ;;  %s7144_s3 = sshll.u32 %s7146_s25, 3 }
  0x16   : > { %5079 = vmatprep.subr.bf16.mxu1 %v5507_v2  ;;  %v666_v11 = vld [vmem:[%s658_s4] sm:$0xff]  ;;  %v5095_v32 = vpack.c.bf16 %v4413_v31, %v4412_v30  ;;  %s665_s1 = scalar_lea.vmem %s7127_s21, %s7144_s3 }
  0x17   : > { %4879 = vmatmul.mubr.msk.f32.vlgmr.msra.gmra.mrb[0].mxu0 %vm676_vm1, %v666_v11  ;;  %v4406_v50 = vld [vmem:[%s7116_s10] ss:$0 sm:$0xff] }
  0x18   : > { %5084 = vmatpush3.bf16.msra.mxu0 %v5083_v10  ;;  %4900 = vmatprep.mubr.msk.f32.mxu0 %vm5508_vm0, %v5509_v4  ;;  %v5768_v59 = vld [vmem:[%s661_s29] ss:$0 sm:$0xff] }
  0x19   : > { %5085 = vmatprep.subr.bf16.mxu0 %v5507_v2  ;;  %5081 = vmatpush3.bf16.msra.mxu1 %v5080_v14  ;;  %v4419_v8 = vld [vmem:[%s7112_s6 + $0x20] sm:$0xff]  ;;  %v4422_v14 = vld [vmem:[%s7112_s6 + $0x38] sm:$0xff] }
  0x1a   : > { %5088 = vmatprep.subr.bf16.mxu1 %v5507_v2  ;;  %v5101_v11 = vpack.c.bf16 %v4420_v9, %v4419_v8  ;;  %v5104_v15 = vpack.c.bf16 %v4422_v14, %v4421_v13  ;;  %v4458_v14 = vld [vmem:[%s7116_s10 + $0x2] ss:$0 sm:$0xff] }
  0x1c   : > { %5087 = vmatpush3.bf16.msra.mxu0 %v5086_v17 }
  0x1d   : > { %4914 = vmatprep.subr.mxu0 %v5509_v4 }
  0xea   : > { %v746_v21 = vpop.f32.mrb[0].mxu0 }
  0xeb   : > { %v747_v23 = vadd.f32 %v4400_v18, %v746_v21  ;;  %v4880_v24 = vpop.f32.mrb[1].mxu0  ;;  %v4424_v18 = vld [vmem:[%s7115_s9 + $0x1] ss:$0 sm:$0xff] }
  0xed   : > { %v5691_v26 = vadd.f32 %v750_v22, %v747_v23  ;;  %v4431_v23 = vld [vmem:[%s7116_s10 + $0x1] ss:$0 sm:$0xff] }
  0xef   : > { %4890 = vmatmul.mubr.msk.f32.vlgmr.msra.gmra.mrb[0].mxu1 %vm764_vm2, %v5691_v26  ;;  %4901 = vmatmul.mubr.msk.f32.vlgmr.msra.gmra.mrb[2].mxu0 %vm764_vm2, %v5691_v26 }
  0xf0   : > { %5090 = vmatpush3.bf16.msra.mxu1 %v5089_v25  ;;  %4911 = vmatprep.mubr.msk.f32.mxu1 %vm5508_vm0, %v5509_v4 }
  0xf1   : > { %5091 = vmatprep.subr.bf16.mxu1 %v5507_v2  ;;  %4916 = vmatprep.mubr.msk.f32.mxu0 %vm5508_vm0, %v5509_v4 }
  0xf4   : > { %5093 = vmatpush3.bf16.msra.mxu1 %v5092_v29 }
  0xf5   : > { %5094 = vmatprep.subr.bf16.mxu1 %v5507_v2 }
  0xf7   : > { %4912 = vmatmul.mubr.msk.f32.vlgmr.msra.gmra.mrb[2].mxu1 %vm764_vm2, %v5691_v26 }
  0xf8   : > { %5096 = vmatpush3.bf16.msra.mxu1 %v5095_v32  ;;  %4932 = vmatprep.mubr.msk.f32.mxu1 %vm5508_vm0, %v5509_v4 }
  0xf9   : > { %5097 = vmatprep.subr.bf16.mxu1 %v5507_v2 }
  0xfc   : > { %5099 = vmatpush3.bf16.msra.mxu1 %v5098_v35 }
  0xfd   : > { %5106 = vmatprep.subr.bf16.mxu1 %v5507_v2 }
  0xff   : > { %4933 = vmatmul.mubr.msk.f32.vlgmr.msra.gmra.mrb[4].mxu1 %vm764_vm2, %v5691_v26 }
 0x100   : > { %5108 = vmatpush3.bf16.msra.mxu1 %v5107_v38  ;;  %4954 = vmatprep.mubr.msk.f32.mxu1 %vm5508_vm0, %v5509_v4 }
 0x101   : > { %5109 = vmatprep.subr.bf16.mxu1 %v5507_v2 }
 0x104   : > { %5111 = vmatpush3.bf16.msra.mxu1 %v5110_v41  ;;  %v1169_v41 = vld [vmem:[%s7117_s11] sm:$0xff] }
 0x105   : > { %4967 = vmatprep.subr.mxu1 %v5509_v4 }
 0x107   : > { %4955 = vmatmul.mubr.msk.f32.vlgmr.msra.gmra.mrb[6].mxu1 %vm764_vm2, %v5691_v26 }
 0x108   : > { %4969 = vmatprep.mubr.msk.f32.mxu1 %vm5508_vm0, %v5509_v4  ;;  %4968 = vmatpush3.msra.mxu1 %v4436_v37  ;;  %v4468_v37 = vld [vmem:[%s7139_s30 + $0x78] sm:$0xff] }
 0x109   : > { %5112 = vmatprep.subr.bf16.mxu1 %v5507_v2 }
 0x1c2   : > { %v834_v43 = vpop.f32.mrb[0].mxu1  ;;  %v915_v44 = vpop.f32.mrb[2].mxu0 }
 0x1c3   : > { %v916_v46 = vadd.f32 %v4404_v42, %v915_v44  ;;  %v4891_v47 = vpop.f32.mrb[1].mxu1  ;;  %v4902_v48 = vpop.f32.mrb[3].mxu0  ;;  %v835_v49 = vadd.f32 %v4402_v45, %v834_v43  ;;  %v4446_v42 = vld [vmem:[%s7112_s6 + $0x40] sm:$0xff]  ;;  %v4447_v43 = vld [vmem:[%s7112_s6 + $0x48] sm:$0xff]  ;;  %v4448_v45 = vld [vmem:[%s7112_s6 + $0x50] sm:$0xff] }
 0x1c4   : > { %v5119_v44 = vpack.c.bf16 %v4447_v43, %v4446_v42  ;;  %v4439_v48 = vld [vmem:[%s7139_s30 + $0x40] sm:$0xff]  ;;  %v4481_v42 = vld [vmem:[%s7113_s7 + $0x70] sm:$0xff]  ;;  %v4482_v43 = vld [vmem:[%s7113_s7 + $0x78] sm:$0xff] }
 0x1c5   : > { %4915 = vmatpush3.xpose.msk.msra.mxu0 %vm1000_vm3, %v916_v46  ;;  %v4449_v46 = vld [vmem:[%s7112_s6 + $0x58] sm:$0xff] }
 0x1c6   : > { %4919 = vmatprep.subr.mxu0 %v5509_v4  ;;  %v5122_v47 = vpack.c.bf16 %v4449_v46, %v4448_v45  ;;  %v4472_v45 = vld [vmem:[%s7112_s6 + $0x60] sm:$0xff]  ;;  %v4473_v46 = vld [vmem:[%s7112_s6 + $0x68] sm:$0xff] }
 0x1c8   : > { %4917 = vmatmul.mubr.msk.f32.vlgmr.msra.gmra.mrb[4].mxu0 %vm1000_vm3, %v835_v49  ;;  %v4440_v49 = vld [vmem:[%s7139_s30 + $0x48] sm:$0xff] }
 0x1c9   : > { %4921 = vmatprep.mubr.msk.f32.mxu0 %vm5508_vm0, %v5509_v4 }
 0x1ca   : > { %v996_v51 = vpop.f32.mrb[2].mxu1 }
 0x1cb   : > { %v997_v52 = vadd.f32 %v4406_v50, %v996_v51  ;;  %v4913_v53 = vpop.f32.mrb[3].mxu1  ;;  %v5113_v50 = vpack.c.bf16 %v4440_v49, %v4439_v48  ;;  %v4441_v51 = vld [vmem:[%s7139_s30 + $0x50] sm:$0xff]  ;;  %v4475_v49 = vld [vmem:[%s7112_s6 + $0x78] sm:$0xff] }
 0x1cc   : > { %v4474_v48 = vld [vmem:[%s7112_s6 + $0x70] sm:$0xff] }
 0x1cd   : > { %4920 = vmatpush3.msra.mxu0 %v997_v52  ;;  %v4442_v52 = vld [vmem:[%s7139_s30 + $0x58] sm:$0xff] }
 0x1ce   : > { %5100 = vmatprep.subr.bf16.mxu0 %v5507_v2 }
 0x1d2   : > { %v1249_v54 = vpop.f32.mrb[4].mxu1 }
 0x1d3   : > { %v4934_v55 = vpop.f32.mrb[5].mxu1  ;;  %v1250_v24 = vadd.f32 %v4417_v20, %v1249_v54 }
 0x1d4   : > { %v5116_v55 = vpack.c.bf16 %v4442_v52, %v4441_v51  ;;  %v5140_v52 = vpack.c.bf16 %v4475_v49, %v4474_v48  ;;  %v2793_v49 = vld [vmem:[%s7121_s15 + $0x198] sm:$0xff] }
 0x1da   : > { %v1415_v56 = vpop.f32.mrb[6].mxu1 }
 0x1db   : > { %v4956_v57 = vpop.f32.mrb[7].mxu1  ;;  %v1416_v25 = vadd.f32 %v4431_v23, %v1415_v56  ;;  %v4453_v56 = vld [vmem:[%s7113_s7 + $0x40] sm:$0xff] }
 0x1dc   : > { %v4454_v57 = vld [vmem:[%s7113_s7 + $0x48] sm:$0xff] }
 0x29b   : > { %v1073_v58 = vpop.f32.mrb[4].mxu0 }
 0x29c   : > { %v1077_v60 = vmul.f32 0.35355338, %v1073_v58  ;;  %v4918_v61 = vpop.f32.mrb[5].mxu0 }
 0x29d   : > { %v5125_v61 = vpack.c.bf16 %v4454_v57, %v4453_v56 }
 0x29e   : > { %v1084_v62 = vadd.f32 %v5768_v59, %v1077_v60 }
 0x2a0   : > { %v1085_v63 = vsel %vm1000_vm3, %v1084_v62, -inf }
 0x2a1   : > { %1086 = vmax.xlane.f32.xlu0 %v1085_v63  ;;  %v4456_v63 = vld [vmem:[%s7113_s7 + $0x58] sm:$0xff] }
 0x32e   : > { %v1087_v0 = vpop.xlane.xlu0 %1086 }
 0x32f   : > { %v1088_v1 = vsub.f32 %v1084_v62, %v1087_v0  ;;  %v4455_v62 = vld [vmem:[%s7113_s7 + $0x50] sm:$0xff]  ;;  %v4451_v0 = vld [vmem:[%s7115_s9 + $0x2] ss:$0 sm:$0xff] }
 0x331   : > { %v1089_v3 = vmul.f32 1.442695, %v1088_v1  ;;  %v5128_v1 = vpack.c.bf16 %v4456_v63, %v4455_v62  ;;  %v4470_v62 = vld [vmem:[%s7114_s8 + $0x3] ss:$0 sm:$0xff] }
 0x333   : > { %5479 = vpow2.f32 %v1089_v3 }
 0x33d   : > { %v5480_v5 = vpop.eup %5479 }
 0x33e   : > { %v1091_v6 = vsel %vm1000_vm3, %v5480_v5, 0.0 }
 0x33f   : > { %1092 = vadd.xlane.f32.xlu0 %v1091_v6 }
 0x3cc   : > { %v1093_v7 = vpop.xlane.xlu0 %1092 }
 0x3cd   : > { %5481 = vrcp.f32 %v1093_v7 }
 0x3d7   : > { %v5482_v10 = vpop.eup %5481 }
 0x3d8   : > { %v1095_v12 = vmul.f32 %v5482_v10, %v5480_v5  ;;  %v4444_v10 = vld [vmem:[%s7114_s8 + $0x2] ss:$0 sm:$0xff] }
 0x3da   : > { %4922 = vmatmul.mubr.msk.f32.vlgmr.msra.gmra.mrb[6].mxu0 %vm1000_vm3, %v1095_v12 }
 0x3db   : > { %5102 = vmatpush3.bf16.msra.mxu0 %v5101_v11  ;;  %4943 = vmatprep.mubr.msk.f32.mxu0 %vm5508_vm0, %v5509_v4 }
 0x3dc   : > { %5103 = vmatprep.subr.bf16.mxu0 %v5507_v2 }
 0x3df   : > { %5105 = vmatpush3.bf16.msra.mxu0 %v5104_v15 }
 0x3e0   : > { %4957 = vmatprep.subr.mxu0 %v5509_v4 }
 0x3e2   : > { %4944 = vmatmul.mubr.msk.f32.vlgmr.msra.gmra.mrb[8].mxu0 %vm764_vm2, %v5691_v26 }
 0x3e3   : > { %4959 = vmatprep.mubr.msk.f32.mxu0 %vm5508_vm0, %v5509_v4 }
 0x4ad   : > { %v1165_v16 = vpop.f32.mrb[6].mxu0 }
 0x4ae   : > { %v4923_v17 = vpop.f32.mrb[7].mxu0 }
 0x4b5   : > { %v1332_v19 = vpop.f32.mrb[8].mxu0 }
 0x4b6   : > { %v1333_v21 = vadd.f32 %v4424_v18, %v1332_v19  ;;  %v4945_v22 = vpop.f32.mrb[9].mxu0 }
 0x4b8   : > { %4958 = vmatpush3.xpose.msk.msra.mxu0 %vm1000_vm3, %v1333_v21 }
 0x4b9   : > { %4962 = vmatprep.subr.mxu0 %v5509_v4 }
 0x4bb   : > { %4960 = vmatmul.mubr.msk.f32.vlgmr.msra.gmra.mrb[10].mxu0 %vm1000_vm3, %v1250_v24 }
 0x4bc   : > { %4963 = vmatpush3.msra.mxu0 %v1416_v25  ;;  %4964 = vmatprep.mubr.msk.f32.mxu0 %vm5508_vm0, %v5509_v4 }
 0x4bd   : > { %4972 = vmatprep.subr.mxu0 %v5509_v4 }
 0x58e   : > { %v1491_v27 = vpop.f32.mrb[10].mxu0 }
 0x58f   : > { %v1495_v28 = vmul.f32 0.35355338, %v1491_v27  ;;  %v4961_v29 = vpop.f32.mrb[11].mxu0 }
 0x590   : > { %v4463_v29 = vld [vmem:[%s7117_s11 + $0x10] sm:$0xff] }
 0x591   : > { %v1496_v30 = vadd.f32 %v5768_v59, %v1495_v28 }
 0x593   : > { %v1497_v31 = vsel %vm1000_vm3, %v1496_v30, -inf }
 0x594   : > { %1498 = vmax.xlane.f32.xlu1 %v1497_v31  ;;  %v4465_v31 = vld [vmem:[%s7139_s30 + $0x60] sm:$0xff] }
 0x621   : > { %v1499_v32 = vpop.xlane.xlu1 %1498 }
 0x622   : > { %v1500_v33 = vsub.f32 %v1496_v30, %v1499_v32  ;;  %v4466_v32 = vld [vmem:[%s7139_s30 + $0x68] sm:$0xff] }
 0x624   : > { %v1501_v34 = vmul.f32 1.442695, %v1500_v33 }
 0x626   : > { %5483 = vpow2.f32 %v1501_v34  ;;  %v5131_v34 = vpack.c.bf16 %v4466_v32, %v4465_v31 }
 0x630   : > { %v5484_v35 = vpop.eup %5483 }
 0x631   : > { %v1503_v36 = vsel %vm1000_vm3, %v5484_v35, 0.0 }
 0x632   : > { %1504 = vadd.xlane.f32.xlu1 %v1503_v36  ;;  %v4467_v36 = vld [vmem:[%s7139_s30 + $0x70] sm:$0xff] }
 0x6bf   : > { %v1505_v38 = vpop.xlane.xlu1 %1504 }
 0x6c0   : > { %5485 = vrcp.f32 %v1505_v38  ;;  %v5134_v38 = vpack.c.bf16 %v4468_v37, %v4467_v36  ;;  %v2761_v37 = vld [vmem:[%s7121_s15 + $0x98] sm:$0xff] }
 0x6ca   : > { %v5486_v39 = vpop.eup %5485 }
 0x6cb   : > { %v1507_v40 = vmul.f32 %v5486_v39, %v5484_v35  ;;  %v4479_v39 = vld [vmem:[%s7113_s7 + $0x60] sm:$0xff] }
 0x6cd   : > { %4965 = vmatmul.mubr.msk.f32.vlgmr.msra.gmra.mrb[12].mxu0 %vm1000_vm3, %v1507_v40  ;;  %v4480_v40 = vld [vmem:[%s7113_s7 + $0x68] sm:$0xff] }
 0x6ce   : > { %4973 = vmatpush3.msra.mxu0 %v1169_v41  ;;  %4974 = vmatprep.mubr.msk.f32.mxu0 %vm5508_vm0, %v5509_v4  ;;  %v5143_v41 = vpack.c.bf16 %v4480_v40, %v4479_v39  ;;  %v2758_v39 = vld [vmem:[%s7121_s15 + $0x80] sm:$0xff] }
 0x6cf   : > { %5118 = vmatprep.subr.bf16.mxu0 %v5507_v2 }
 0x6d1   : > { %4975 = vmatmul.mubr.msk.f32.vlgmr.msra.gmra.mrb[14].mxu0 %vm1000_vm3, %v1165_v16 }
 0x6d2   : > { %5120 = vmatpush3.bf16.msra.mxu0 %v5119_v44  ;;  %4996 = vmatprep.mubr.msk.f32.mxu0 %vm5508_vm0, %v5509_v4  ;;  %v5146_v44 = vpack.c.bf16 %v4482_v43, %v4481_v42  ;;  %v2744_v42 = vld [vmem:[%s7121_s15 + $0x10] sm:$0xff] }
 0x6d3   : > { %5121 = vmatprep.subr.bf16.mxu0 %v5507_v2  ;;  %v2760_v43 = vld [vmem:[%s7121_s15 + $0x90] sm:$0xff] }
 0x6d6   : > { %5123 = vmatpush3.bf16.msra.mxu0 %v5122_v47  ;;  %v5137_v47 = vpack.c.bf16 %v4473_v46, %v4472_v45  ;;  %v2775_v45 = vld [vmem:[%s7121_s15 + $0x108] sm:$0xff] }
 0x6d7   : > { %5010 = vmatprep.subr.mxu0 %v5509_v4  ;;  %v2791_v46 = vld [vmem:[%s7121_s15 + $0x188] sm:$0xff] }
 0x6d8   : > { %v5152_v48 = vpack.c.bf16 %v2791_v46, %v2775_v45 }
 0x6d9   : > { %4997 = vmatmul.mubr.msk.f32.vlgmr.msra.gmra.mrb[16].mxu0 %vm764_vm2, %v5691_v26 }
 0x6da   : > { %5012 = vmatprep.mubr.msk.f32.mxu0 %vm5508_vm0, %v5509_v4 }
 0x7a0   : > { %v1577_v53 = vpop.f32.mrb[12].mxu0 }
 0x7a1   : > { %v4966_v54 = vpop.f32.mrb[13].mxu0  ;;  %4970 = vmatmul.mubr.msk.f32.vlgmr.msra.gmra.mrb[8].mxu1 %vm1000_vm3, %v1577_v53 }
 0x7a2   : > { %5114 = vmatpush3.bf16.msra.mxu1 %v5113_v50  ;;  %4985 = vmatprep.mubr.msk.f32.mxu1 %vm5508_vm0, %v5509_v4 }
 0x7a3   : > { %5115 = vmatprep.subr.bf16.mxu1 %v5507_v2 }
 0x7a4   : > { %v1725_v58 = vpop.f32.mrb[14].mxu0 }
 0x7a5   : > { %v4976_v60 = vpop.f32.mrb[15].mxu0 }
 0x7a6   : > { %5117 = vmatpush3.bf16.msra.mxu1 %v5116_v55 }
 0x7a7   : > { %5124 = vmatprep.subr.bf16.mxu1 %v5507_v2 }
 0x7a9   : > { %4986 = vmatmul.mubr.msk.f32.vlgmr.msra.gmra.mrb[10].mxu1 %vm764_vm2, %v5691_v26 }
 0x7aa   : > { %5126 = vmatpush3.bf16.msra.mxu1 %v5125_v61  ;;  %5007 = vmatprep.mubr.msk.f32.mxu1 %vm5508_vm0, %v5509_v4 }
 0x7ab   : > { %5127 = vmatprep.subr.bf16.mxu1 %v5507_v2 }
 0x7ac   : > { %v1891_v3 = vpop.f32.mrb[16].mxu0 }
 0x7ad   : > { %v1892_v5 = vadd.f32 %v4451_v0, %v1891_v3  ;;  %v4998_v6 = vpop.f32.mrb[17].mxu0 }
 0x7ae   : > { %5129 = vmatpush3.bf16.msra.mxu1 %v5128_v1  ;;  %v4484_v1 = vld [vmem:[%s7116_s10 + $0x3] ss:$0 sm:$0xff] }
 0x7af   : > { %5011 = vmatpush3.xpose.msk.msra.mxu0 %vm1000_vm3, %v1892_v5  ;;  %5020 = vmatprep.subr.mxu1 %v5509_v4 }
 0x7b0   : > { %5015 = vmatprep.subr.mxu0 %v5509_v4 }
 0x7b1   : > { %5008 = vmatmul.mubr.msk.f32.vlgmr.msra.gmra.mrb[12].mxu1 %vm764_vm2, %v5691_v26 }
 0x7b2   : > { %5022 = vmatprep.mubr.msk.f32.mxu1 %vm5508_vm0, %v5509_v4  ;;  %5021 = vmatpush3.msra.mxu1 %v4463_v29 }
 0x7b3   : > { %5136 = vmatprep.subr.bf16.mxu1 %v5507_v2 }
 0x874   : > { %v1652_v7 = vpop.f32.mrb[8].mxu1 }
 0x875   : > { %v5888_v8 = vadd.f32 %v1725_v58, %v1652_v7  ;;  %v4971_v9 = vpop.f32.mrb[9].mxu1 }
 0x87c   : > { %v1808_v11 = vpop.f32.mrb[10].mxu1 }
 0x87d   : > { %v1809_v12 = vadd.f32 %v4444_v10, %v1808_v11  ;;  %v4987_v13 = vpop.f32.mrb[11].mxu1 }
 0x87f   : > { %5013 = vmatmul.mubr.msk.f32.vlgmr.msra.gmra.mrb[18].mxu0 %vm1000_vm3, %v1809_v12 }
 0x880   : > { %5017 = vmatprep.mubr.msk.f32.mxu0 %vm5508_vm0, %v5509_v4 }
 0x884   : > { %v1974_v15 = vpop.f32.mrb[12].mxu1 }
 0x885   : > { %v1975_v16 = vadd.f32 %v4458_v14, %v1974_v15  ;;  %v5009_v17 = vpop.f32.mrb[13].mxu1 }
 0x887   : > { %5016 = vmatpush3.msra.mxu0 %v1975_v16  ;;  %v4489_v16 = vld [vmem:[%s7117_s11 + $0x18] sm:$0xff] }
 0x888   : > { %5130 = vmatprep.subr.bf16.mxu0 %v5507_v2 }
 0x952   : > { %v2050_v18 = vpop.f32.mrb[18].mxu0 }
 0x953   : > { %v2054_v19 = vmul.f32 0.35355338, %v2050_v18  ;;  %v5014_v20 = vpop.f32.mrb[19].mxu0 }
 0x955   : > { %v2055_v21 = vadd.f32 %v5768_v59, %v2054_v19 }
 0x957   : > { %v2056_v22 = vsel %vm1000_vm3, %v2055_v21, -inf }
 0x958   : > { %2057 = vmax.xlane.f32.xlu0 %v2056_v22  ;;  %v4491_v22 = vld [vmem:[%s7118_s12] ss:$0 sm:$0xff] }
 0x9e5   : > { %v2058_v23 = vpop.xlane.xlu0 %2057 }
 0x9e6   : > { %v2059_v24 = vsub.f32 %v2055_v21, %v2058_v23 }
 0x9e8   : > { %v2060_v25 = vmul.f32 1.442695, %v2059_v24 }
 0x9ea   : > { %5487 = vpow2.f32 %v2060_v25 }
 0x9f4   : > { %v5488_v27 = vpop.eup %5487 }
 0x9f5   : > { %v2062_v28 = vsel %vm1000_vm3, %v5488_v27, 0.0 }
 0x9f6   : > { %2063 = vadd.xlane.f32.xlu1 %v2062_v28 }
 0xa83   : > { %v2064_v30 = vpop.xlane.xlu1 %2063 }
 0xa84   : > { %5489 = vrcp.f32 %v2064_v30 }
 0xa8e   : > { %v5490_v33 = vpop.eup %5489 }
 0xa8f   : > { %v2066_v35 = vmul.f32 %v5490_v33, %v5488_v27 }
 0xa91   : > { %5018 = vmatmul.mubr.msk.f32.vlgmr.msra.gmra.mrb[20].mxu0 %vm1000_vm3, %v2066_v35  ;;  %v2759_v35 = vld [vmem:[%s7121_s15 + $0x88] sm:$0xff] }
 0xa92   : > { %5132 = vmatpush3.bf16.msra.mxu0 %v5131_v34  ;;  %5033 = vmatprep.mubr.msk.f32.mxu0 %vm5508_vm0, %v5509_v4  ;;  %v2743_v34 = vld [vmem:[%s7121_s15 + $0x8] sm:$0xff] }
 0xa93   : > { %5133 = vmatprep.subr.bf16.mxu0 %v5507_v2  ;;  %v5148_v36 = vpack.c.bf16 %v2759_v35, %v2743_v34 }
 0xa96   : > { %5135 = vmatpush3.bf16.msra.mxu0 %v5134_v38  ;;  %v2742_v38 = vld [vmem:[%s7121_s15] sm:$0xff] }
 0xa97   : > { %5142 = vmatprep.subr.bf16.mxu0 %v5507_v2 }
 0xa99   : > { %5034 = vmatmul.mubr.msk.f32.vlgmr.msra.gmra.mrb[22].mxu0 %vm764_vm2, %v5691_v26 }
 0xa9a   : > { %5144 = vmatpush3.bf16.msra.mxu0 %v5143_v41  ;;  %5055 = vmatprep.mubr.msk.f32.mxu0 %vm5508_vm0, %v5509_v4  ;;  %v5150_v41 = vpack.c.bf16 %v2758_v39, %v2742_v38  ;;  %v2799_v38 = vld [vmem:[%s7121_s15 + $0x1c8] sm:$0xff]  ;;  %v2785_v39 = vld [vmem:[%s7121_s15 + $0x158] sm:$0xff] }
 0xa9b   : > { %5145 = vmatprep.subr.bf16.mxu0 %v5507_v2 }
 0xa9e   : > { %5147 = vmatpush3.bf16.msra.mxu0 %v5146_v44  ;;  %v5158_v44 = vpack.c.bf16 %v2760_v43, %v2744_v42  ;;  %v2782_v43 = vld [vmem:[%s7121_s15 + $0x140] sm:$0xff] }
 0xa9f   : > { %5068 = vmatprep.subr.mxu0 %v5509_v4 }
 0xaa1   : > { %5056 = vmatmul.mubr.msk.f32.vlgmr.msra.gmra.mrb[24].mxu0 %vm764_vm2, %v5691_v26 }
 0xaa2   : > { %5070 = vmatprep.mubr.msk.f32.mxu0 %vm5508_vm0, %v5509_v4  ;;  %5069 = vmatpush3.msra.mxu0 %v4489_v16 }
 0xb64   : > { %v2136_v50 = vpop.f32.mrb[20].mxu0 }
 0xb65   : > { %v5019_v51 = vpop.f32.mrb[21].mxu0  ;;  %5023 = vmatmul.mubr.msk.f32.vlgmr.msra.gmra.mrb[14].mxu1 %vm1000_vm3, %v2136_v50  ;;  %v2774_v50 = vld [vmem:[%s7121_s15 + $0x100] sm:$0xff] }
 0xb66   : > { %5138 = vmatpush3.bf16.msra.mxu1 %v5137_v47  ;;  %5044 = vmatprep.mubr.msk.f32.mxu1 %vm5508_vm0, %v5509_v4  ;;  %v2777_v47 = vld [vmem:[%s7121_s15 + $0x118] sm:$0xff]  ;;  %v2790_v51 = vld [vmem:[%s7121_s15 + $0x180] sm:$0xff] }
 0xb67   : > { %5139 = vmatprep.subr.bf16.mxu1 %v5507_v2  ;;  %v4477_v2 = vld [vmem:[%s7115_s9 + $0x3] ss:$0 sm:$0xff] }
 0xb6a   : > { %5141 = vmatpush3.bf16.msra.mxu1 %v5140_v52  ;;  %v5160_v52 = vpack.c.bf16 %v2793_v49, %v2777_v47  ;;  %v2784_v47 = vld [vmem:[%s7121_s15 + $0x150] sm:$0xff]  ;;  %v2755_v49 = vld [vmem:[%s7121_s15 + $0x68] sm:$0xff] }
 0xb6b   : > { %5058 = vmatprep.subr.mxu1 %v5509_v4 }
 0xb6c   : > { %v2295_v53 = vpop.f32.mrb[22].mxu0 }
 0xb6d   : > { %v5035_v54 = vpop.f32.mrb[23].mxu0  ;;  %5045 = vmatmul.mubr.msk.f32.vlgmr.msra.gmra.mrb[16].mxu1 %vm764_vm2, %v5691_v26  ;;  %v2296_v3 = vadd.f32 %v4470_v62, %v2295_v53  ;;  %v5154_v53 = vpack.c.bf16 %v2790_v51, %v2774_v50  ;;  %v2771_v50 = vld [vmem:[%s7121_s15 + $0xe8] sm:$0xff]  ;;  %v2757_v51 = vld [vmem:[%s7121_s15 + $0x78] sm:$0xff] }
 0xb6e   : > { %5060 = vmatprep.mubr.msk.f32.mxu1 %vm5508_vm0, %v5509_v4  ;;  %v2776_v54 = vld [vmem:[%s7121_s15 + $0x110] sm:$0xff] }
 0xb74   : > { %v2461_v55 = vpop.f32.mrb[24].mxu0 }
 0xb75   : > { %v5057_v56 = vpop.f32.mrb[25].mxu0  ;;  %v2462_v5 = vadd.f32 %v4484_v1, %v2461_v55  ;;  %v2792_v55 = vld [vmem:[%s7121_s15 + $0x190] sm:$0xff] }
 0xb76   : > { %v5162_v56 = vpack.c.bf16 %v2792_v55, %v2776_v54  ;;  %v2754_v55 = vld [vmem:[%s7121_s15 + $0x60] sm:$0xff] }
 0xc38   : > { %v2211_v57 = vpop.f32.mrb[14].mxu1 }
 0xc39   : > { %v2215_v58 = vadd.f32 %v2211_v57, %v5888_v8  ;;  %v5024_v60 = vpop.f32.mrb[15].mxu1  ;;  %v2747_v57 = vld [vmem:[%s7121_s15 + $0x28] sm:$0xff] }
 0xc3a   : > { %v2749_v60 = vld [vmem:[%s7121_s15 + $0x38] sm:$0xff] }
 0xc40   : > { %v2378_v61 = vpop.f32.mrb[16].mxu1 }
 0xc41   : > { %v2379_v63 = vadd.f32 %v4477_v2, %v2378_v61  ;;  %v5046_v0 = vpop.f32.mrb[17].mxu1  ;;  %v2765_v61 = vld [vmem:[%s7121_s15 + $0xb8] sm:$0xff] }
 0xc42   : > { %v5172_v62 = vpack.c.bf16 %v2765_v61, %v2749_v60  ;;  %v2756_v60 = vld [vmem:[%s7121_s15 + $0x70] sm:$0xff]  ;;  %v2787_v61 = vld [vmem:[%s7121_s15 + $0x168] sm:$0xff] }
 0xc43   : > { %5059 = vmatpush3.xpose.msk.msra.mxu1 %vm1000_vm3, %v2379_v63 }
 0xc44   : > { %5063 = vmatprep.subr.mxu1 %v5509_v4 }
 0xc46   : > { %5061 = vmatmul.mubr.msk.f32.vlgmr.msra.gmra.mrb[18].mxu1 %vm1000_vm3, %v2296_v3  ;;  %v4492_v3 = vld [vmem:[%s7119_s13] ss:$0 sm:$0xff] }
 0xc47   : > { %5064 = vmatpush3.msra.mxu1 %v2462_v5  ;;  %5065 = vmatprep.mubr.msk.f32.mxu1 %vm5508_vm0, %v5509_v4 }
 0xc48   : > { %5149 = vmatprep.subr.bf16.mxu1 %v5148_v36  ;;  %v2768_v36 = vld [vmem:[%s7121_s15 + $0xd0] sm:$0xff] }
 0xd19   : > { %v2537_v6 = vpop.f32.mrb[18].mxu1 }
 0xd1a   : > { %v2541_v7 = vmul.f32 0.35355338, %v2537_v6  ;;  %v5062_v8 = vpop.f32.mrb[19].mxu1  ;;  %v4493_v6 = vld [vmem:[%s7120_s14] ss:$0 sm:$0xff] }
 0xd1b   : > { %v2762_v8 = vld [vmem:[%s7121_s15 + $0xa0] sm:$0xff] }
 0xd1c   : > { %v2542_v9 = vadd.f32 %v5768_v59, %v2541_v7  ;;  %v2746_v7 = vld [vmem:[%s7121_s15 + $0x20] sm:$0xff] }
 0xd1e   : > { %v2543_v10 = vsel %vm1000_vm3, %v2542_v9, -inf }
 0xd1f   : > { %2544 = vmax.xlane.f32.xlu0 %v2543_v10  ;;  %v2748_v10 = vld [vmem:[%s7121_s15 + $0x30] sm:$0xff] }
 0xdac   : > { %v2545_v11 = vpop.xlane.xlu0 %2544 }
 0xdad   : > { %v2546_v12 = vsub.f32 %v2542_v9, %v2545_v11  ;;  %v2764_v11 = vld [vmem:[%s7121_s15 + $0xb0] sm:$0xff] }
 0xdaf   : > { %v2547_v13 = vmul.f32 1.442695, %v2546_v12  ;;  %v2779_v12 = vld [vmem:[%s7121_s15 + $0x128] sm:$0xff] }
 0xdb1   : > { %5491 = vpow2.f32 %v2547_v13  ;;  %v2795_v13 = vld [vmem:[%s7121_s15 + $0x1a8] sm:$0xff] }
 0xdbb   : > { %v5492_v14 = vpop.eup %5491 }
 0xdbc   : > { %v2549_v15 = vsel %vm1000_vm3, %v5492_v14, 0.0 }
 0xdbd   : > { %2550 = vadd.xlane.f32.xlu1 %v2549_v15  ;;  %v2797_v15 = vld [vmem:[%s7121_s15 + $0x1b8] sm:$0xff] }
 0xe4a   : > { %v2551_v17 = vpop.xlane.xlu1 %2550 }
 0xe4b   : > { %5493 = vrcp.f32 %v2551_v17  ;;  %v5166_v17 = vpack.c.bf16 %v2762_v8, %v2746_v7 }
 0xe55   : > { %v5494_v18 = vpop.eup %5493 }
 0xe56   : > { %v2553_v59 = vmul.f32 %v5494_v18, %v5492_v14  ;;  %v2781_v14 = vld [vmem:[%s7121_s15 + $0x138] sm:$0xff]  ;;  %v5174_v18 = vpack.c.bf16 %v2764_v11, %v2748_v10  ;;  %v2804_v10 = vld [vmem:[%s7121_s15 + $0x1f0] sm:$0xff]  ;;  %v3493_v11 = vld [vmem:[%s7123_s17 + $0x80] sm:$0xff] }
 0xe58   : > { %5066 = vmatmul.mubr.msk.f32.vlgmr.msra.gmra.mrb[20].mxu1 %vm1000_vm3, %v2553_v59  ;;  %v2778_v59 = vld [vmem:[%s7121_s15 + $0x120] sm:$0xff] }
 0xe59   : > { %2957 = vmatprep.mubr.f32.mxu1 %v5509_v4  ;;  %5151 = vmatpush1.bf16.msra.mxu1 %v5150_v41 }
 0xe5a   : > { %5153 = vmatprep.subr.bf16.mxu1 %v5152_v48  ;;  %v2800_v48 = vld [vmem:[%s7121_s15 + $0x1d0] sm:$0xff] }
 0xe5b   : > { %v5194_v54 = vpack.c.bf16 %v2800_v48, %v2784_v47  ;;  %v3500_v47 = vld [vmem:[%s7123_s17 + $0xb8] sm:$0xff]  ;;  %v3531_v48 = vld [vmem:[%s7123_s17 + $0x1b0] sm:$0xff] }
 0xe5d   : > { %5155 = vmatpush1.bf16.msra.mxu1 %v5154_v53 }
 0xf2b   : > { %v2623_v19 = vpop.f32.mrb[20].mxu1 }
 0xf2c   : > { %v5067_v20 = vpop.f32.mrb[21].mxu1  ;;  %5071 = vmatmul.mubr.msk.f32.vlgmr.msra.gmra.mrb[26].mxu0 %vm1000_vm3, %v2623_v19  ;;  %v2794_v19 = vld [vmem:[%s7121_s15 + $0x1a0] sm:$0xff] }
 0xf2d   : > { %3028 = vmatprep.mubr.f32.mxu0 %v5509_v4 }
 0xfff   : > { %v2698_v21 = vpop.f32.mrb[26].mxu0 }
0x1000   : > { %v2702_v23 = vadd.f32 %v2698_v21, %v2215_v58  ;;  %v5072_v24 = vpop.f32.mrb[27].mxu0  ;;  %v2763_v58 = vld [vmem:[%s7121_s15 + $0xa8] sm:$0xff]  ;;  %v5168_v21 = vpack.c.bf16 %v2795_v13, %v2779_v12  ;;  %v3525_v13 = vld [vmem:[%s7123_s17 + $0x180] sm:$0xff] }
0x1001   : > { %v5164_v2 = vpack.c.bf16 %v2763_v58, %v2747_v57  ;;  %v2796_v24 = vld [vmem:[%s7121_s15 + $0x1b0] sm:$0xff]  ;;  %v5196_v57 = vpack.c.bf16 %v2771_v50, %v2755_v49  ;;  %v3494_v12 = vld [vmem:[%s7123_s17 + $0x88] sm:$0xff]  ;;  %v3532_v49 = vld [vmem:[%s7123_s17 + $0x1b8] sm:$0xff] }
0x1002   : > { %v2710_v25 = vadd.f32 %v4491_v22, %v2702_v23  ;;  %v5176_v22 = vpack.c.bf16 %v2797_v15, %v2781_v14  ;;  %v2780_v23 = vld [vmem:[%s7121_s15 + $0x130] sm:$0xff]  ;;  %v3526_v14 = vld [vmem:[%s7123_s17 + $0x188] sm:$0xff] }
0x1003   : > { %5165 = vmatprep.subr.bf16.mxu1 %v5164_v2  ;;  %v2772_v2 = vld [vmem:[%s7121_s15 + $0xf0] sm:$0xff] }
0x1004   : > { %v2711_v27 = vadd.f32 %v2710_v25, %v5691_v26  ;;  %v2745_v26 = vld [vmem:[%s7121_s15 + $0x18] sm:$0xff]  ;;  %v2751_v25 = vld [vmem:[%s7121_s15 + $0x48] sm:$0xff] }
0x1005   : > { %v5156_v40 = vpack.c.bf16 %v2761_v37, %v2745_v26  ;;  %v2752_v26 = vld [vmem:[%s7121_s15 + $0x50] sm:$0xff]  ;;  %v2783_v37 = vld [vmem:[%s7121_s15 + $0x148] sm:$0xff] }
0x1006   : > { %v2714_v28 = vsel %vm764_vm2, %v2711_v27, 0.0  ;;  %v5190_v42 = vpack.c.bf16 %v2768_v36, %v2752_v26  ;;  %v5184_v45 = vpack.c.bf16 %v2799_v38, %v2783_v37  ;;  %v3498_v26 = vld [vmem:[%s7123_s17 + $0xa8] sm:$0xff]  ;;  %v3529_v36 = vld [vmem:[%s7123_s17 + $0x1a0] sm:$0xff] }
0x1007   : > { %2715 = vadd.xlane.f32.xlu0 %v2714_v28  ;;  %5157 = vmatprep.subr.bf16.mxu0 %v5156_v40  ;;  %v2753_v28 = vld [vmem:[%s7121_s15 + $0x58] sm:$0xff]  ;;  %v3530_v37 = vld [vmem:[%s7123_s17 + $0x1a8] sm:$0xff] }
0x1008   : > { %5159 = vmatpush1.bf16.msra.mxu0 %v5158_v44  ;;  %v2801_v40 = vld [vmem:[%s7121_s15 + $0x1d8] sm:$0xff]  ;;  %v2798_v44 = vld [vmem:[%s7121_s15 + $0x1c0] sm:$0xff] }
0x1009   : > { %5161 = vmatprep.subr.bf16.mxu0 %v5160_v52  ;;  %v5192_v46 = vpack.c.bf16 %v2801_v40, %v2785_v39  ;;  %v2773_v52 = vld [vmem:[%s7121_s15 + $0xf8] sm:$0xff]  ;;  %v5186_v53 = vpack.c.bf16 %v2798_v44, %v2782_v43  ;;  %v3481_v40 = vld [vmem:[%s7123_s17 + $0x20] sm:$0xff]  ;;  %v5252_v43 = vpack.c.bf16 %v3530_v37, %v3529_v36 }
0x100a   : > { %v5204_v58 = vpack.c.bf16 %v2773_v52, %v2757_v51  ;;  %v3513_v44 = vld [vmem:[%s7123_s17 + $0x120] sm:$0xff]  ;;  %v3483_v52 = vld [vmem:[%s7123_s17 + $0x30] sm:$0xff]  ;;  %v3540_v37 = vld [vmem:[%s7123_s17 + $0x1f8] sm:$0xff] }
0x100c   : > { %5163 = vmatpush1.bf16.msra.mxu0 %v5162_v56  ;;  %v2770_v56 = vld [vmem:[%s7121_s15 + $0xe0] sm:$0xff] }
0x100d   : > { %5173 = vmatprep.subr.bf16.mxu0 %v5172_v62  ;;  %v2803_v62 = vld [vmem:[%s7121_s15 + $0x1e8] sm:$0xff] }
0x100e   : > { %v5200_v7 = vpack.c.bf16 %v2803_v62, %v2787_v61  ;;  %v3534_v61 = vld [vmem:[%s7123_s17 + $0x1c8] sm:$0xff] }
0x1094   : > { %v2716_v29 = vpop.xlane.xlu0 %2715 }
0x1095   : > { %v2718_v30 = vmul.f32 0.03125, %v2716_v29  ;;  %v2769_v29 = vld [vmem:[%s7121_s15 + $0xd8] sm:$0xff] }
0x1096   : > { %v5188_v35 = vpack.c.bf16 %v2769_v29, %v2753_v28 }
0x1097   : > { %v2719_v31 = vsub.f32 %v2711_v27, %v2718_v30  ;;  %v2767_v27 = vld [vmem:[%s7121_s15 + $0xc8] sm:$0xff]  ;;  %v5170_v30 = vpack.c.bf16 %v2794_v19, %v2778_v59  ;;  %v5212_v59 = vpack.c.bf16 %v3494_v12, %v3493_v11  ;;  %v5244_v19 = vpack.c.bf16 %v3526_v14, %v3525_v13  ;;  %v3536_v11 = vld [vmem:[%s7123_s17 + $0x1d8] sm:$0xff]  ;;  %v3487_v14 = vld [vmem:[%s7123_s17 + $0x50] sm:$0xff] }
0x1098   : > { %v5180_v34 = vpack.c.bf16 %v2767_v27, %v2751_v25  ;;  %v3527_v25 = vld [vmem:[%s7123_s17 + $0x190] sm:$0xff]  ;;  %v3528_v27 = vld [vmem:[%s7123_s17 + $0x198] sm:$0xff] }
0x1099   : > { %v2720_v32 = vmul.f32 %v2719_v31, %v2719_v31 }
0x109b   : > { %v2721_v33 = vsel %vm764_vm2, %v2720_v32, 0.0  ;;  %v2750_v32 = vld [vmem:[%s7121_s15 + $0x40] sm:$0xff] }
0x109c   : > { %2722 = vadd.xlane.f32.xlu1 %v2721_v33  ;;  %v2766_v33 = vld [vmem:[%s7121_s15 + $0xc0] sm:$0xff] }
0x109d   : > { %v5182_v41 = vpack.c.bf16 %v2766_v33, %v2750_v32  ;;  %v5248_v32 = vpack.c.bf16 %v3528_v27, %v3527_v25  ;;  %v3511_v33 = vld [vmem:[%s7123_s17 + $0x110] sm:$0xff]  ;;  %v3489_v27 = vld [vmem:[%s7123_s17 + $0x60] sm:$0xff] }
0x1129   : > { %v2723_v63 = vpop.xlane.xlu1 %2722 }
0x112a   : > { %v2724_v0 = vmul.f32 0.03125, %v2723_v63  ;;  %v2789_v63 = vld [vmem:[%s7121_s15 + $0x178] sm:$0xff] }
0x112c   : > { %v2725_v1 = vadd.f32 1e-05, %v2724_v0  ;;  %v2805_v0 = vld [vmem:[%s7121_s15 + $0x1f8] sm:$0xff] }
0x112d   : > { %v5208_v8 = vpack.c.bf16 %v2805_v0, %v2789_v63  ;;  %v3485_v0 = vld [vmem:[%s7123_s17 + $0x40] sm:$0xff] }
0x112e   : > { %5495 = vrsqrt.f32 %v2725_v1  ;;  %v5198_v1 = vpack.c.bf16 %v2770_v56, %v2754_v55  ;;  %v5256_v55 = vpack.c.bf16 %v3532_v49, %v3531_v48  ;;  %v3515_v56 = vld [vmem:[%s7123_s17 + $0x130] sm:$0xff]  ;;  %v3590_v49 = vld [vmem:[%s7123_s17 + $0x388] sm:$0xff] }
0x1138   : > { %v5496_v5 = vpop.eup %5495 }
0x1139   : > { %v2727_v9 = vmul.f32 %v5496_v5, %v2719_v31  ;;  %v5178_v31 = vpack.c.bf16 %v2796_v24, %v2780_v23  ;;  %v2786_v5 = vld [vmem:[%s7121_s15 + $0x160] sm:$0xff]  ;;  %v3495_v23 = vld [vmem:[%s7123_s17 + $0x90] sm:$0xff]  ;;  %v3496_v24 = vld [vmem:[%s7123_s17 + $0x98] sm:$0xff] }
0x113b   : > { %v2734_v16 = vmul.f32 %v4492_v3, %v2727_v9  ;;  %v5206_v3 = vpack.c.bf16 %v2772_v2, %v2756_v60  ;;  %v2788_v9 = vld [vmem:[%s7121_s15 + $0x170] sm:$0xff]  ;;  %v3502_v60 = vld [vmem:[%s7123_s17 + $0xc8] sm:$0xff]  ;;  %v3533_v2 = vld [vmem:[%s7123_s17 + $0x1c0] sm:$0xff] }
0x113d   : > { %v6094_v20 = vadd.f32 %v4493_v6, %v2734_v16  ;;  %v2802_v6 = vld [vmem:[%s7121_s15 + $0x1e0] sm:$0xff]  ;;  %v5210_v16 = vpack.c.bf16 %v2804_v10, %v2788_v9  ;;  %v3504_v9 = vld [vmem:[%s7123_s17 + $0xd8] sm:$0xff]  ;;  %v3535_v10 = vld [vmem:[%s7123_s17 + $0x1d0] sm:$0xff] }
0x113e   : > { %v5202_v15 = vpack.c.bf16 %v2802_v6, %v2786_v5  ;;  %v5260_v5 = vpack.c.bf16 %v3534_v61, %v3533_v2  ;;  %v3517_v6 = vld [vmem:[%s7123_s17 + $0x140] sm:$0xff] }
0x113f   : > { %4494 = vmatmul.mubr.msk.f32.vlgmr.msra.gmra.mrb[22].mxu1 %vm764_vm2, %v6094_v20  ;;  %4495 = vmatmul.mubr.msk.f32.vlgmr.msra.gmra.mrb[28].mxu0 %vm764_vm2, %v6094_v20 }
0x1140   : > { %5167 = vmatpush1.bf16.msra.mxu1 %v5166_v17  ;;  %5175 = vmatpush1.bf16.msra.mxu0 %v5174_v18  ;;  %v3477_v17 = vld [vmem:[%s7123_s17] sm:$0xff]  ;;  %v3478_v18 = vld [vmem:[%s7123_s17 + $0x8] sm:$0xff] }
0x1141   : > { %5169 = vmatprep.subr.bf16.mxu1 %v5168_v21  ;;  %5177 = vmatprep.subr.bf16.mxu0 %v5176_v22  ;;  %v3509_v21 = vld [vmem:[%s7123_s17 + $0x100] sm:$0xff]  ;;  %v3510_v22 = vld [vmem:[%s7123_s17 + $0x108] sm:$0xff]  ;;  %v5214_v28 = vpack.c.bf16 %v3478_v18, %v3477_v17  ;;  %v5264_v17 = vpack.c.bf16 %v3536_v11, %v3535_v10  ;;  %v3519_v18 = vld [vmem:[%s7123_s17 + $0x150] sm:$0xff] }
0x1142   : > { %3099 = vmatprep.mubr.f32.mxu1 %v5509_v4  ;;  %3170 = vmatprep.mubr.f32.mxu0 %v5509_v4  ;;  %v5246_v29 = vpack.c.bf16 %v3510_v22, %v3509_v21  ;;  %v3506_v21 = vld [vmem:[%s7123_s17 + $0xe8] sm:$0xff]  ;;  %v3537_v22 = vld [vmem:[%s7123_s17 + $0x1e0] sm:$0xff] }
0x1143   : > { %v3573_v11 = vld [vmem:[%s7123_s17 + $0x300] sm:$0xff] }
0x1144   : > { %5171 = vmatpush1.bf16.msra.mxu1 %v5170_v30  ;;  %5179 = vmatpush1.bf16.msra.mxu0 %v5178_v31  ;;  %v3480_v30 = vld [vmem:[%s7123_s17 + $0x18] sm:$0xff]  ;;  %v5216_v31 = vpack.c.bf16 %v3496_v24, %v3495_v23  ;;  %v3538_v23 = vld [vmem:[%s7123_s17 + $0x1e8] sm:$0xff] }
0x1145   : > { %5181 = vmatprep.subr.bf16.mxu1 %v5180_v34  ;;  %5189 = vmatprep.subr.bf16.mxu0 %v5188_v35  ;;  %v3512_v34 = vld [vmem:[%s7123_s17 + $0x118] sm:$0xff]  ;;  %v3497_v35 = vld [vmem:[%s7123_s17 + $0xa0] sm:$0xff] }
0x1146   : > { %v5250_v39 = vpack.c.bf16 %v3512_v34, %v3511_v33  ;;  %v3507_v34 = vld [vmem:[%s7123_s17 + $0xf0] sm:$0xff] }
0x1147   : > { %4496 = vmatmul.mubr.msk.f32.vlgmr.msra.gmra.mrb[24].mxu1 %vm764_vm2, %v6094_v20  ;;  %4497 = vmatmul.mubr.msk.f32.vlgmr.msra.gmra.mrb[30].mxu0 %vm764_vm2, %v6094_v20 }
0x1148   : > { %5183 = vmatpush1.bf16.msra.mxu1 %v5182_v41  ;;  %5191 = vmatpush1.bf16.msra.mxu0 %v5190_v42  ;;  %v3482_v41 = vld [vmem:[%s7123_s17 + $0x28] sm:$0xff]  ;;  %v5220_v42 = vpack.c.bf16 %v3498_v26, %v3497_v35  ;;  %v3508_v35 = vld [vmem:[%s7123_s17 + $0xf8] sm:$0xff]  ;;  %v3539_v26 = vld [vmem:[%s7123_s17 + $0x1f0] sm:$0xff] }
0x1149   : > { %5185 = vmatprep.subr.bf16.mxu1 %v5184_v45  ;;  %5193 = vmatprep.subr.bf16.mxu0 %v5192_v46  ;;  %v3514_v45 = vld [vmem:[%s7123_s17 + $0x128] sm:$0xff]  ;;  %v3499_v46 = vld [vmem:[%s7123_s17 + $0xb0] sm:$0xff]  ;;  %v5222_v50 = vpack.c.bf16 %v3482_v41, %v3481_v40  ;;  %v5240_v36 = vpack.c.bf16 %v3508_v35, %v3507_v34  ;;  %v5272_v40 = vpack.c.bf16 %v3540_v37, %v3539_v26 }
0x114a   : > { %3241 = vmatprep.mubr.f32.mxu1 %v5509_v4  ;;  %3312 = vmatprep.mubr.f32.mxu0 %v5509_v4  ;;  %v5254_v51 = vpack.c.bf16 %v3514_v45, %v3513_v44  ;;  %v3557_v45 = vld [vmem:[%s7123_s17 + $0x280] sm:$0xff]  ;;  %v3562_v26 = vld [vmem:[%s7123_s17 + $0x2a8] sm:$0xff] }
0x114b   : > { %v3594_v37 = vld [vmem:[%s7123_s17 + $0x3a8] sm:$0xff] }
0x114c   : > { %5187 = vmatpush1.bf16.msra.mxu1 %v5186_v53  ;;  %5195 = vmatpush1.bf16.msra.mxu0 %v5194_v54  ;;  %v3484_v53 = vld [vmem:[%s7123_s17 + $0x38] sm:$0xff]  ;;  %v5224_v54 = vpack.c.bf16 %v3500_v47, %v3499_v46  ;;  %v3558_v46 = vld [vmem:[%s7123_s17 + $0x288] sm:$0xff]  ;;  %v3589_v47 = vld [vmem:[%s7123_s17 + $0x380] sm:$0xff] }
0x114d   : > { %5197 = vmatprep.subr.bf16.mxu1 %v5196_v57  ;;  %5205 = vmatprep.subr.bf16.mxu0 %v5204_v58  ;;  %v3516_v57 = vld [vmem:[%s7123_s17 + $0x138] sm:$0xff]  ;;  %v3501_v58 = vld [vmem:[%s7123_s17 + $0xc0] sm:$0xff]  ;;  %v5226_v62 = vpack.c.bf16 %v3484_v53, %v3483_v52  ;;  %v5276_v48 = vpack.c.bf16 %v3558_v46, %v3557_v45 }
0x114e   : > { %v5258_v63 = vpack.c.bf16 %v3516_v57, %v3515_v56 }
0x114f   : > { %4498 = vmatmul.mubr.msk.f32.vlgmr.msra.gmra.mrb[26].mxu1 %vm764_vm2, %v6094_v20  ;;  %4499 = vmatmul.mubr.msk.f32.vlgmr.msra.gmra.mrb[32].mxu0 %vm764_vm2, %v6094_v20 }
0x1150   : > { %5199 = vmatpush1.bf16.msra.mxu1 %v5198_v1  ;;  %5207 = vmatpush1.bf16.msra.mxu0 %v5206_v3  ;;  %v3486_v1 = vld [vmem:[%s7123_s17 + $0x48] sm:$0xff]  ;;  %v5228_v3 = vpack.c.bf16 %v3502_v60, %v3501_v58  ;;  %v6442_v58 = vld [vmem:[%s7122_s16] sm:$0xff] }
0x1151   : > { %5201 = vmatprep.subr.bf16.mxu1 %v5200_v7  ;;  %5209 = vmatprep.subr.bf16.mxu0 %v5208_v8  ;;  %v3518_v7 = vld [vmem:[%s7123_s17 + $0x148] sm:$0xff]  ;;  %v3503_v8 = vld [vmem:[%s7123_s17 + $0xd0] sm:$0xff]  ;;  %v5230_v12 = vpack.c.bf16 %v3486_v1, %v3485_v0 }
0x1152   : > { %3383 = vmatprep.mubr.f32.mxu1 %v5509_v4  ;;  %3454 = vmatprep.mubr.f32.mxu0 %v5509_v4  ;;  %v3479_v4 = vld [vmem:[%s7123_s17 + $0x10] sm:$0xff]  ;;  %v5262_v13 = vpack.c.bf16 %v3518_v7, %v3517_v6  ;;  %v3542_v6 = vld [vmem:[%s7123_s17 + $0x208] sm:$0xff] }
0x1153   : > { %v5218_v38 = vpack.c.bf16 %v3480_v30, %v3479_v4  ;;  %v3490_v4 = vld [vmem:[%s7123_s17 + $0x68] sm:$0xff]  ;;  %v3521_v30 = vld [vmem:[%s7123_s17 + $0x160] sm:$0xff] }
0x1154   : > { %5203 = vmatpush1.bf16.msra.mxu1 %v5202_v15  ;;  %5211 = vmatpush1.bf16.msra.mxu0 %v5210_v16  ;;  %v3488_v15 = vld [vmem:[%s7123_s17 + $0x58] sm:$0xff]  ;;  %v5232_v16 = vpack.c.bf16 %v3504_v9, %v3503_v8 }
0x1155   : > { %5213 = vmatprep.subr.bf16.mxu1 %v5212_v59  ;;  %5245 = vmatprep.subr.bf16.mxu0 %v5244_v19  ;;  %v3520_v59 = vld [vmem:[%s7123_s17 + $0x158] sm:$0xff]  ;;  %v3505_v19 = vld [vmem:[%s7123_s17 + $0xe0] sm:$0xff]  ;;  %v5234_v24 = vpack.c.bf16 %v3488_v15, %v3487_v14 }
0x1156   : > { %v5266_v25 = vpack.c.bf16 %v3520_v59, %v3519_v18  ;;  %v3560_v18 = vld [vmem:[%s7123_s17 + $0x298] sm:$0xff]  ;;  %v3591_v59 = vld [vmem:[%s7123_s17 + $0x390] sm:$0xff] }
0x1157   : > { %4500 = vmatmul.mubr.msk.f32.vlgmr.msra.gmra.mrb[28].mxu1 %vm764_vm2, %v6094_v20  ;;  %4501 = vmatmul.mubr.msk.f32.vlgmr.msra.gmra.mrb[34].mxu0 %vm764_vm2, %v6094_v20 }
0x1158   : > { %5215 = vmatpush3.bf16.msra.mxu1 %v5214_v28  ;;  %5247 = vmatpush3.bf16.msra.mxu0 %v5246_v29  ;;  %v5236_v28 = vpack.c.bf16 %v3506_v21, %v3505_v19  ;;  %v5268_v29 = vpack.c.bf16 %v3538_v23, %v3537_v22  ;;  %v3592_v19 = vld [vmem:[%s7123_s17 + $0x398] sm:$0xff] }
0x1159   : > { %5217 = vmatprep.subr.bf16.mxu1 %v5216_v31  ;;  %5249 = vmatprep.subr.bf16.mxu0 %v5248_v32  ;;  %v3522_v31 = vld [vmem:[%s7123_s17 + $0x168] sm:$0xff]  ;;  %v5238_v32 = vpack.c.bf16 %v3490_v4, %v3489_v27  ;;  %v3544_v27 = vld [vmem:[%s7123_s17 + $0x218] sm:$0xff] }
0x115a   : > { %v5270_v33 = vpack.c.bf16 %v3522_v31, %v3521_v30  ;;  %v5312_v30 = vpack.c.bf16 %v3592_v19, %v3591_v59  ;;  %v3575_v31 = vld [vmem:[%s7123_s17 + $0x310] sm:$0xff] }
0x115c   : > { %5219 = vmatpush3.bf16.msra.mxu1 %v5218_v38  ;;  %5251 = vmatpush3.bf16.msra.mxu0 %v5250_v39  ;;  %v3491_v38 = vld [vmem:[%s7123_s17 + $0x70] sm:$0xff]  ;;  %v3492_v39 = vld [vmem:[%s7123_s17 + $0x78] sm:$0xff] }
0x115d   : > { %5221 = vmatprep.subr.bf16.mxu1 %v5220_v42  ;;  %5253 = vmatprep.subr.bf16.mxu0 %v5252_v43  ;;  %v5242_v41 = vpack.c.bf16 %v3492_v39, %v3491_v38  ;;  %v3523_v42 = vld [vmem:[%s7123_s17 + $0x170] sm:$0xff]  ;;  %v3524_v43 = vld [vmem:[%s7123_s17 + $0x178] sm:$0xff] }
0x115e   : > { %v5274_v44 = vpack.c.bf16 %v3524_v43, %v3523_v42  ;;  %v3545_v42 = vld [vmem:[%s7123_s17 + $0x220] sm:$0xff]  ;;  %v3546_v43 = vld [vmem:[%s7123_s17 + $0x228] sm:$0xff] }
0x1160   : > { %5223 = vmatpush3.bf16.msra.mxu1 %v5222_v50  ;;  %5255 = vmatpush3.bf16.msra.mxu0 %v5254_v51  ;;  %v5308_v50 = vpack.c.bf16 %v3590_v49, %v3589_v47  ;;  %v2810_v51 = vlaneseq  ;;  %v3578_v49 = vld [vmem:[%s7123_s17 + $0x328] sm:$0xff] }
0x1161   : > { %5225 = vmatprep.subr.bf16.mxu1 %v5224_v54  ;;  %5257 = vmatprep.subr.bf16.mxu0 %v5256_v55  ;;  %v6430_v54 = vld [vmem:[%s7122_s16 + $0x8] sm:$0xff] }
0x1162   : > { %v6424_v52 = vshrl.u32 %v2810_v51, 7 }
0x1164   : > { %5227 = vmatpush3.bf16.msra.mxu1 %v5226_v62  ;;  %5259 = vmatpush3.bf16.msra.mxu0 %v5258_v63  ;;  %v2836_v53 = vsub.s32 6, %v6424_v52  ;;  %v2812_v56 = vsub.s32 0, %v6424_v52  ;;  %v2820_v57 = vsub.s32 2, %v6424_v52  ;;  %v2816_v60 = vsub.s32 1, %v6424_v52 }
0x1165   : > { %5229 = vmatprep.subr.bf16.mxu1 %v5228_v3  ;;  %5261 = vmatprep.subr.bf16.mxu0 %v5260_v5  ;;  %v2824_v2 = vsub.s32 3, %v6424_v52  ;;  %v3541_v5 = vld [vmem:[%s7123_s17 + $0x200] sm:$0xff] }
0x1166   : > { %v6435_v55 = vrot.slane %v6430_v54, %v2836_v53  ;;  %v2813_v61 = vrot.slane %v6442_v58, %v2812_v56  ;;  %v2821_v62 = vrot.slane %v6442_v58, %v2820_v57  ;;  %v2817_v63 = vrot.slane %v6442_v58, %v2816_v60 }
0x1167   : > { %v2825_v0 = vrot.slane %v6442_v58, %v2824_v2  ;;  %v5278_v23 = vpack.c.bf16 %v3542_v6, %v3541_v5  ;;  %v2845_v6 = vrot.slane %v6430_v54, %v2812_v56 }
0x1168   : > { %5231 = vmatpush3.bf16.msra.mxu1 %v5230_v12  ;;  %5263 = vmatpush3.bf16.msra.mxu0 %v5262_v13  ;;  %v3574_v12 = vld [vmem:[%s7123_s17 + $0x308] sm:$0xff]  ;;  %v3559_v13 = vld [vmem:[%s7123_s17 + $0x290] sm:$0xff] }
0x1169   : > { %5233 = vmatprep.subr.bf16.mxu1 %v5232_v16  ;;  %5265 = vmatprep.subr.bf16.mxu0 %v5264_v17  ;;  %v2832_v16 = vsub.s32 5, %v6424_v52  ;;  %v2840_v17 = vsub.s32 7, %v6424_v52  ;;  %v5280_v4 = vpack.c.bf16 %v3560_v18, %v3559_v13  ;;  %v3580_v13 = vld [vmem:[%s7123_s17 + $0x338] sm:$0xff]  ;;  %v3598_v18 = vld [vmem:[%s7123_s17 + $0x3c8] sm:$0xff] }
0x116b   : > { %v2833_v34 = vrot.slane %v6442_v58, %v2832_v16  ;;  %v2841_v35 = vrot.slane %v6442_v58, %v2840_v17 }
0x116c   : > { %5235 = vmatpush3.bf16.msra.mxu1 %v5234_v24  ;;  %5267 = vmatpush3.bf16.msra.mxu0 %v5266_v25  ;;  %v5310_v24 = vpack.c.bf16 %v3574_v12, %v3573_v11  ;;  %v3543_v25 = vld [vmem:[%s7123_s17 + $0x210] sm:$0xff]  ;;  %v2853_v11 = vrot.slane %v6430_v54, %v2820_v57  ;;  %v3597_v57 = vld [vmem:[%s7123_s17 + $0x3c0] sm:$0xff] }
0x116d   : > { %5237 = vmatprep.subr.bf16.mxu1 %v5236_v28  ;;  %5269 = vmatprep.subr.bf16.mxu0 %v5268_v29 }
0x1170   : > { %5239 = vmatpush3.bf16.msra.mxu1 %v5238_v32  ;;  %5271 = vmatpush3.bf16.msra.mxu0 %v5270_v33  ;;  %v3576_v32 = vld [vmem:[%s7123_s17 + $0x318] sm:$0xff]  ;;  %v3561_v33 = vld [vmem:[%s7123_s17 + $0x2a0] sm:$0xff] }
0x1171   : > { %5241 = vmatprep.subr.bf16.mxu1 %v5240_v36  ;;  %5273 = vmatprep.subr.bf16.mxu0 %v5272_v40  ;;  %v3593_v36 = vld [vmem:[%s7123_s17 + $0x3a0] sm:$0xff]  ;;  %v5282_v40 = vpack.c.bf16 %v3544_v27, %v3543_v25  ;;  %v5284_v46 = vpack.c.bf16 %v3562_v26, %v3561_v33  ;;  %v3550_v25 = vld [vmem:[%s7123_s17 + $0x248] sm:$0xff]  ;;  %v3567_v33 = vld [vmem:[%s7123_s17 + $0x2d0] sm:$0xff] }
0x1172   : > { %v5316_v47 = vpack.c.bf16 %v3594_v37, %v3593_v36  ;;  %v3600_v26 = vld [vmem:[%s7123_s17 + $0x3d8] sm:$0xff]  ;;  %v2828_v36 = vsub.s32 4, %v6424_v52  ;;  %v3701_v52 = vld [vmem:[%s7123_s17 + $0x700] sm:$0xff] }
0x1174   : > { %5243 = vmatpush3.bf16.msra.mxu1 %v5242_v41  ;;  %5275 = vmatpush3.bf16.msra.mxu0 %v5274_v44  ;;  %v5314_v41 = vpack.c.bf16 %v3576_v32, %v3575_v31  ;;  %v3581_v31 = vld [vmem:[%s7123_s17 + $0x340] sm:$0xff]  ;;  %v3582_v32 = vld [vmem:[%s7123_s17 + $0x348] sm:$0xff] }
0x1175   : > { %5277 = vmatprep.subr.bf16.mxu1 %v5276_v48  ;;  %5309 = vmatprep.subr.bf16.mxu0 %v5308_v50  ;;  %v3577_v48 = vld [vmem:[%s7123_s17 + $0x320] sm:$0xff]  ;;  %v3563_v50 = vld [vmem:[%s7123_s17 + $0x2b0] sm:$0xff] }
0x1212   : > { %v2959_v1 = vpop.f32.mrb[22].mxu1  ;;  %v3030_v3 = vpop.f32.mrb[28].mxu0 }
0x1213   : > { %v2960_v7 = vadd.f32 %v2959_v1, %v2813_v61  ;;  %v3031_v8 = vadd.f32 %v3030_v3, %v2821_v62  ;;  %v2961_v9 = vpop.f32.mrb[23].mxu1  ;;  %v3032_v10 = vpop.f32.mrb[29].mxu0  ;;  %v3564_v62 = vld [vmem:[%s7123_s17 + $0x2b8] sm:$0xff]  ;;  %v5286_v1 = vpack.c.bf16 %v3546_v43, %v3545_v42  ;;  %v3583_v43 = vld [vmem:[%s7123_s17 + $0x350] sm:$0xff] }
0x1214   : > { %v2962_v14 = vadd.f32 %v2961_v9, %v2817_v63  ;;  %v3033_v15 = vadd.f32 %v3032_v10, %v2825_v0  ;;  %v3595_v63 = vld [vmem:[%s7123_s17 + $0x3b0] sm:$0xff]  ;;  %v3596_v0 = vld [vmem:[%s7123_s17 + $0x3b8] sm:$0xff]  ;;  %v5288_v56 = vpack.c.bf16 %v3564_v62, %v3563_v50  ;;  %v3601_v50 = vld [vmem:[%s7123_s17 + $0x3e0] sm:$0xff] }
0x1215   : > { %v3461_v28 = vmax.f32 %v2960_v7, 0.0  ;;  %v3463_v29 = vmax.f32 %v3031_v8, 0.0  ;;  %v5318_v7 = vpack.c.bf16 %v3578_v49, %v3577_v48  ;;  %v3547_v8 = vld [vmem:[%s7123_s17 + $0x230] sm:$0xff]  ;;  %v3548_v9 = vld [vmem:[%s7123_s17 + $0x238] sm:$0xff]  ;;  %v5320_v12 = vpack.c.bf16 %v3596_v0, %v3595_v63  ;;  %v3569_v48 = vld [vmem:[%s7123_s17 + $0x2e0] sm:$0xff] }
0x1216   : > { %v3462_v21 = vmax.f32 %v2962_v14, 0.0  ;;  %v3464_v22 = vmax.f32 %v3033_v15, 0.0  ;;  %v3579_v10 = vld [vmem:[%s7123_s17 + $0x330] sm:$0xff]  ;;  %v3565_v14 = vld [vmem:[%s7123_s17 + $0x2c0] sm:$0xff]  ;;  %v3566_v15 = vld [vmem:[%s7123_s17 + $0x2c8] sm:$0xff] }
0x1217   : > { %v3552_v42 = vld [vmem:[%s7123_s17 + $0x258] sm:$0xff]  ;;  %v3570_v49 = vld [vmem:[%s7123_s17 + $0x2e8] sm:$0xff] }
0x1218   : > { %3804 = vmatprep.mubr.f32.mxu1 %v3462_v21  ;;  %3874 = vmatprep.mubr.f32.mxu0 %v3464_v22  ;;  %v5290_v21 = vpack.c.bf16 %v3548_v9, %v3547_v8  ;;  %v5322_v22 = vpack.c.bf16 %v3580_v13, %v3579_v10  ;;  %v3603_v13 = vld [vmem:[%s7123_s17 + $0x3f0] sm:$0xff] }
0x1219   : > { %3805 = vmatmul.mubr.f32.vlgmr.msra.gmra.mrb[30].mxu1 %v3461_v28  ;;  %3875 = vmatmul.mubr.f32.vlgmr.msra.gmra.mrb[36].mxu0 %v3463_v29 }
0x121a   : > { %v6514_v38 = vpop.f32.mrb[24].mxu1  ;;  %v6516_v39 = vpop.f32.mrb[30].mxu0  ;;  %5279 = vmatpush3.bf16.msra.mxu1 %v5278_v23  ;;  %5311 = vmatpush3.bf16.msra.mxu0 %v5310_v24  ;;  %v5292_v23 = vpack.c.bf16 %v3566_v15, %v3565_v14  ;;  %v3549_v24 = vld [vmem:[%s7123_s17 + $0x240] sm:$0xff]  ;;  %v3604_v14 = vld [vmem:[%s7123_s17 + $0x3f8] sm:$0xff]  ;;  %v2829_v15 = vrot.slane %v6442_v58, %v2828_v36 }
0x121b   : > { %v3103_v44 = vpop.f32.mrb[25].mxu1  ;;  %v3174_v45 = vpop.f32.mrb[31].mxu0  ;;  %5281 = vmatprep.subr.bf16.mxu1 %v5280_v4  ;;  %5313 = vmatprep.subr.bf16.mxu0 %v5312_v30  ;;  %v5324_v30 = vpack.c.bf16 %v3598_v18, %v3597_v57  ;;  %v5294_v37 = vpack.c.bf16 %v3550_v25, %v3549_v24  ;;  %v5336_v24 = vpack.c.bf16 %v3604_v14, %v3603_v13  ;;  %v3588_v25 = vld [vmem:[%s7123_s17 + $0x378] sm:$0xff]  ;;  %v3609_v13 = vld [vmem:[%s7123_s17 + $0x420] sm:$0xff]  ;;  %v3610_v14 = vld [vmem:[%s7123_s17 + $0x428] sm:$0xff] }
0x121c   : > { %v3104_v51 = vadd.f32 %v3103_v44, %v2833_v34  ;;  %v3175_v61 = vadd.f32 %v3174_v45, %v2841_v35  ;;  %v3568_v34 = vld [vmem:[%s7123_s17 + $0x2d8] sm:$0xff]  ;;  %v3599_v35 = vld [vmem:[%s7123_s17 + $0x3d0] sm:$0xff]  ;;  %v2861_v44 = vrot.slane %v6430_v54, %v2828_v36  ;;  %v3102_v36 = vadd.f32 %v6514_v38, %v2829_v15  ;;  %v3638_v38 = vld [vmem:[%s7123_s17 + $0x508] sm:$0xff] }
0x121d   : > { %v5296_v45 = vpack.c.bf16 %v3568_v34, %v3567_v33  ;;  %v2857_v33 = vrot.slane %v6430_v54, %v2824_v2  ;;  %v3606_v2 = vld [vmem:[%s7123_s17 + $0x408] sm:$0xff]  ;;  %v3641_v15 = vld [vmem:[%s7123_s17 + $0x520] sm:$0xff] }
0x121e   : > { %v3466_v3 = vmax.f32 %v3104_v51, 0.0  ;;  %v3468_v5 = vmax.f32 %v3175_v61, 0.0  ;;  %5283 = vmatpush3.bf16.msra.mxu1 %v5282_v40  ;;  %5315 = vmatpush3.bf16.msra.mxu0 %v5314_v41  ;;  %v5326_v40 = vpack.c.bf16 %v3582_v32, %v3581_v31  ;;  %v3551_v41 = vld [vmem:[%s7123_s17 + $0x250] sm:$0xff]  ;;  %v3602_v51 = vld [vmem:[%s7123_s17 + $0x3e8] sm:$0xff] }
0x121f   : > { %5285 = vmatprep.subr.bf16.mxu1 %v5284_v46  ;;  %5317 = vmatprep.subr.bf16.mxu0 %v5316_v47  ;;  %v5328_v46 = vpack.c.bf16 %v3600_v26, %v3599_v35  ;;  %v3584_v47 = vld [vmem:[%s7123_s17 + $0x358] sm:$0xff]  ;;  %v5298_v63 = vpack.c.bf16 %v3552_v42, %v3551_v41  ;;  %v5332_v10 = vpack.c.bf16 %v3602_v51, %v3601_v50  ;;  %v3622_v31 = vld [vmem:[%s7123_s17 + $0x488] sm:$0xff]  ;;  %v3637_v42 = vld [vmem:[%s7123_s17 + $0x500] sm:$0xff] }
0x1220   : > { %3944 = vmatprep.mubr.f32.mxu1 %v3466_v3  ;;  %4014 = vmatprep.mubr.f32.mxu0 %v3468_v5  ;;  %v5330_v0 = vpack.c.bf16 %v3584_v47, %v3583_v43  ;;  %v3553_v3 = vld [vmem:[%s7123_s17 + $0x260] sm:$0xff]  ;;  %v3554_v5 = vld [vmem:[%s7123_s17 + $0x268] sm:$0xff]  ;;  %v3465_v47 = vmax.f32 %v3102_v36, 0.0  ;;  %v3608_v50 = vld [vmem:[%s7123_s17 + $0x418] sm:$0xff] }
0x1221   : > { %v5302_v57 = vpack.c.bf16 %v3554_v5, %v3553_v3  ;;  %v3654_v32 = vld [vmem:[%s7123_s17 + $0x588] sm:$0xff]  ;;  %v3639_v51 = vld [vmem:[%s7123_s17 + $0x510] sm:$0xff] }
0x1222   : > { %v3243_v59 = vpop.f32.mrb[26].mxu1  ;;  %v3314_v19 = vpop.f32.mrb[32].mxu0  ;;  %5287 = vmatpush3.bf16.msra.mxu1 %v5286_v1  ;;  %5319 = vmatpush3.bf16.msra.mxu0 %v5318_v7  ;;  %v5300_v1 = vpack.c.bf16 %v3570_v49, %v3569_v48  ;;  %v3607_v49 = vld [vmem:[%s7123_s17 + $0x410] sm:$0xff]  ;;  %v3626_v3 = vld [vmem:[%s7123_s17 + $0x4a8] sm:$0xff] }
0x1223   : > { %v6578_v27 = vadd.f32 %v3243_v59, %v2845_v6  ;;  %v6580_v28 = vadd.f32 %v3314_v19, %v2853_v11  ;;  %v6582_v29 = vpop.f32.mrb[27].mxu1  ;;  %v6584_v4 = vpop.f32.mrb[33].mxu0  ;;  %5289 = vmatprep.subr.bf16.mxu1 %v5288_v56  ;;  %5321 = vmatprep.subr.bf16.mxu0 %v5320_v12  ;;  %v3585_v11 = vld [vmem:[%s7123_s17 + $0x360] sm:$0xff]  ;;  %v3586_v56 = vld [vmem:[%s7123_s17 + $0x368] sm:$0xff]  ;;  %v3572_v12 = vld [vmem:[%s7123_s17 + $0x2f8] sm:$0xff] }
0x1224   : > { %v5334_v18 = vpack.c.bf16 %v3586_v56, %v3585_v11  ;;  %v3555_v59 = vld [vmem:[%s7123_s17 + $0x270] sm:$0xff]  ;;  %v3556_v19 = vld [vmem:[%s7123_s17 + $0x278] sm:$0xff]  ;;  %v3317_v43 = vadd.f32 %v6584_v4, %v2857_v33  ;;  %v5374_v4 = vpack.c.bf16 %v3638_v38, %v3637_v42  ;;  %v3658_v11 = vld [vmem:[%s7123_s17 + $0x5a8] sm:$0xff]  ;;  %v5346_v56 = vpack.c.bf16 %v3608_v50, %v3607_v49 }
0x1225   : > { %v5306_v34 = vpack.c.bf16 %v3556_v19, %v3555_v59  ;;  %v3627_v59 = vld [vmem:[%s7123_s17 + $0x4b0] sm:$0xff]  ;;  %v3628_v19 = vld [vmem:[%s7123_s17 + $0x4b8] sm:$0xff]  ;;  %v3629_v33 = vld [vmem:[%s7123_s17 + $0x4c0] sm:$0xff] }
0x1226   : > { %5291 = vmatpush3.bf16.msra.mxu1 %v5290_v21  ;;  %5323 = vmatpush3.bf16.msra.mxu0 %v5322_v22  ;;  %v3587_v21 = vld [vmem:[%s7123_s17 + $0x370] sm:$0xff]  ;;  %v2837_v22 = vrot.slane %v6442_v58, %v2836_v53  ;;  %v2849_v53 = vrot.slane %v6430_v54, %v2816_v60  ;;  %v3653_v58 = vld [vmem:[%s7123_s17 + $0x580] sm:$0xff]  ;;  %v3472_v5 = vmax.f32 %v3317_v43, 0.0  ;;  %v3646_v38 = vld [vmem:[%s7123_s17 + $0x548] sm:$0xff] }
0x1227   : > { %5293 = vmatprep.subr.bf16.mxu1 %v5292_v23  ;;  %5325 = vmatprep.subr.bf16.mxu0 %v5324_v30  ;;  %v3621_v30 = vld [vmem:[%s7123_s17 + $0x480] sm:$0xff]  ;;  %v5338_v35 = vpack.c.bf16 %v3588_v25, %v3587_v21  ;;  %v3659_v21 = vld [vmem:[%s7123_s17 + $0x5b0] sm:$0xff]  ;;  %v5352_v25 = vpack.c.bf16 %v3628_v19, %v3627_v59  ;;  %v3632_v43 = vld [vmem:[%s7123_s17 + $0x4d8] sm:$0xff] }
0x1228   : > { %v5340_v26 = vpack.c.bf16 %v3622_v31, %v3621_v30  ;;  %v3173_v60 = vadd.f32 %v6516_v39, %v2837_v22  ;;  %v3246_v41 = vadd.f32 %v6582_v29, %v2849_v53  ;;  %v3623_v39 = vld [vmem:[%s7123_s17 + $0x490] sm:$0xff]  ;;  %v3660_v22 = vld [vmem:[%s7123_s17 + $0x5b8] sm:$0xff] }
0x1229   : > { %v3655_v29 = vld [vmem:[%s7123_s17 + $0x590] sm:$0xff]  ;;  %v3612_v31 = vld [vmem:[%s7123_s17 + $0x438] sm:$0xff] }
0x122a   : > { %v3385_v61 = vpop.f32.mrb[28].mxu1  ;;  %v3456_v62 = vpop.f32.mrb[34].mxu0  ;;  %5295 = vmatpush3.bf16.msra.mxu1 %v5294_v37  ;;  %5327 = vmatpush3.bf16.msra.mxu0 %v5326_v40  ;;  %v5372_v37 = vpack.c.bf16 %v3654_v32, %v3653_v58  ;;  %v3605_v40 = vld [vmem:[%s7123_s17 + $0x400] sm:$0xff]  ;;  %v3467_v48 = vmax.f32 %v3173_v60, 0.0  ;;  %v3611_v30 = vld [vmem:[%s7123_s17 + $0x430] sm:$0xff]  ;;  %v5384_v58 = vpack.c.bf16 %v3660_v22, %v3659_v21  ;;  %v3644_v32 = vld [vmem:[%s7123_s17 + $0x538] sm:$0xff] }
0x122b   : > { %v6636_v6 = vadd.f32 %v3385_v61, %v2861_v44  ;;  %v6639_v7 = vadd.f32 %v3456_v62, %v6435_v55  ;;  %v6641_v8 = vpop.f32.mrb[29].mxu1  ;;  %v6643_v9 = vpop.f32.mrb[35].mxu0  ;;  %5297 = vmatprep.subr.bf16.mxu1 %v5296_v45  ;;  %5329 = vmatprep.subr.bf16.mxu0 %v5328_v46  ;;  %v3571_v55 = vld [vmem:[%s7123_s17 + $0x2f0] sm:$0xff]  ;;  %v3624_v44 = vld [vmem:[%s7123_s17 + $0x498] sm:$0xff]  ;;  %v5342_v46 = vpack.c.bf16 %v3606_v2, %v3605_v40  ;;  %v3470_v61 = vmax.f32 %v3246_v41, 0.0  ;;  %v3613_v40 = vld [vmem:[%s7123_s17 + $0x440] sm:$0xff] }
0x122c   : > { %v5304_v23 = vpack.c.bf16 %v3572_v12, %v3571_v55  ;;  %v3656_v45 = vld [vmem:[%s7123_s17 + $0x598] sm:$0xff]  ;;  %v5344_v62 = vpack.c.bf16 %v3624_v44, %v3623_v39  ;;  %v3643_v53 = vld [vmem:[%s7123_s17 + $0x530] sm:$0xff]  ;;  %v5354_v36 = vpack.c.bf16 %v3612_v31, %v3611_v30  ;;  %v3614_v2 = vld [vmem:[%s7123_s17 + $0x448] sm:$0xff] }
0x122d   : > { %v5386_v60 = vpack.c.bf16 %v3644_v32, %v3643_v53  ;;  %v3645_v41 = vld [vmem:[%s7123_s17 + $0x540] sm:$0xff]  ;;  %v3631_v39 = vld [vmem:[%s7123_s17 + $0x4d0] sm:$0xff]  ;;  %v3620_v22 = vld [vmem:[%s7123_s17 + $0x478] sm:$0xff]  ;;  %v2865_v53 = vrot.slane %v6430_v54, %v2832_v16 }
0x122e   : > { %5299 = vmatpush3.bf16.msra.mxu1 %v5298_v63  ;;  %5331 = vmatpush3.bf16.msra.mxu0 %v5330_v0  ;;  %v5376_v63 = vpack.c.bf16 %v3656_v45, %v3655_v29  ;;  %v3640_v0 = vld [vmem:[%s7123_s17 + $0x518] sm:$0xff]  ;;  %v3663_v44 = vld [vmem:[%s7123_s17 + $0x5d0] sm:$0xff]  ;;  %v5358_v45 = vpack.c.bf16 %v3614_v2, %v3613_v40  ;;  %v3685_v30 = vld [vmem:[%s7123_s17 + $0x680] sm:$0xff] }
0x122f   : > { %5301 = vmatprep.subr.bf16.mxu1 %v5300_v1  ;;  %5333 = vmatprep.subr.bf16.mxu0 %v5332_v10  ;;  %v3625_v1 = vld [vmem:[%s7123_s17 + $0x4a0] sm:$0xff]  ;;  %v5378_v55 = vpack.c.bf16 %v3640_v0, %v3639_v51  ;;  %v3664_v29 = vld [vmem:[%s7123_s17 + $0x5d8] sm:$0xff]  ;;  %v3647_v49 = vld [vmem:[%s7123_s17 + $0x550] sm:$0xff] }
0x1230   : > { %v3657_v10 = vld [vmem:[%s7123_s17 + $0x5a0] sm:$0xff]  ;;  %v5348_v12 = vpack.c.bf16 %v3626_v3, %v3625_v1  ;;  %v5392_v50 = vpack.c.bf16 %v3664_v29, %v3663_v44  ;;  %v3648_v51 = vld [vmem:[%s7123_s17 + $0x558] sm:$0xff]  ;;  %v3666_v0 = vld [vmem:[%s7123_s17 + $0x5e8] sm:$0xff]  ;;  %v3471_v29 = vmax.f32 %v6580_v28, 0.0 }
0x1231   : > { %v5394_v3 = vpack.c.bf16 %v3648_v51, %v3647_v49  ;;  %v3619_v21 = vld [vmem:[%s7123_s17 + $0x470] sm:$0xff]  ;;  %v3686_v31 = vld [vmem:[%s7123_s17 + $0x688] sm:$0xff]  ;;  %v3669_v16 = vld [vmem:[%s7123_s17 + $0x600] sm:$0xff] }
0x1232   : > { %5303 = vmatpush3.bf16.msra.mxu1 %v5302_v57  ;;  %5335 = vmatpush3.bf16.msra.mxu0 %v5334_v18  ;;  %v5380_v57 = vpack.c.bf16 %v3658_v11, %v3657_v10  ;;  %v3642_v18 = vld [vmem:[%s7123_s17 + $0x528] sm:$0xff]  ;;  %v3617_v10 = vld [vmem:[%s7123_s17 + $0x460] sm:$0xff]  ;;  %v3688_v40 = vld [vmem:[%s7123_s17 + $0x698] sm:$0xff] }
0x1233   : > { %5305 = vmatprep.subr.bf16.mxu1 %v5304_v23  ;;  %5337 = vmatprep.subr.bf16.mxu0 %v5336_v24  ;;  %v5350_v23 = vpack.c.bf16 %v3610_v14, %v3609_v13  ;;  %v5382_v24 = vpack.c.bf16 %v3642_v18, %v3641_v15  ;;  %v3618_v11 = vld [vmem:[%s7123_s17 + $0x468] sm:$0xff]  ;;  %v3635_v13 = vld [vmem:[%s7123_s17 + $0x4f0] sm:$0xff]  ;;  %v3636_v14 = vld [vmem:[%s7123_s17 + $0x4f8] sm:$0xff] }
0x1234   : > { %v3667_v15 = vld [vmem:[%s7123_s17 + $0x5f0] sm:$0xff]  ;;  %v5366_v18 = vpack.c.bf16 %v3618_v11, %v3617_v10  ;;  %v5368_v19 = vpack.c.bf16 %v3636_v14, %v3635_v13  ;;  %v3718_v32 = vld [vmem:[%s7123_s17 + $0x788] sm:$0xff]  ;;  %v3721_v28 = vld [vmem:[%s7123_s17 + $0x7a0] sm:$0xff] }
0x1235   : > { %v3703_v44 = vld [vmem:[%s7123_s17 + $0x710] sm:$0xff]  ;;  %v3722_v49 = vld [vmem:[%s7123_s17 + $0x7a8] sm:$0xff]  ;;  %v3692_v11 = vld [vmem:[%s7123_s17 + $0x6b8] sm:$0xff] }
0x1236   : > { %5307 = vmatpush3.bf16.msra.mxu1 %v5306_v34  ;;  %5339 = vmatpush3.bf16.msra.mxu0 %v5338_v35  ;;  %v3630_v34 = vld [vmem:[%s7123_s17 + $0x4c8] sm:$0xff]  ;;  %v3661_v35 = vld [vmem:[%s7123_s17 + $0x5c0] sm:$0xff]  ;;  %v3691_v10 = vld [vmem:[%s7123_s17 + $0x6b0] sm:$0xff] }
0x1237   : > { %5341 = vmatprep.subr.bf16.mxu1 %v5340_v26  ;;  %5373 = vmatprep.subr.bf16.mxu0 %v5372_v37  ;;  %v3662_v26 = vld [vmem:[%s7123_s17 + $0x5c8] sm:$0xff]  ;;  %v5356_v37 = vpack.c.bf16 %v3630_v34, %v3629_v33  ;;  %v2873_v33 = vrot.slane %v6430_v54, %v2840_v17  ;;  %v5370_v34 = vpack.c.bf16 %v3620_v22, %v3619_v21  ;;  %v3693_v21 = vld [vmem:[%s7123_s17 + $0x6c0] sm:$0xff] }
0x1238   : > { %v5388_v42 = vpack.c.bf16 %v3662_v26, %v3661_v35  ;;  %v5404_v26 = vpack.c.bf16 %v3686_v31, %v3685_v30  ;;  %v3702_v54 = vld [vmem:[%s7123_s17 + $0x708] sm:$0xff]  ;;  %v3388_v17 = vadd.f32 %v6641_v8, %v2865_v53  ;;  %v3720_v8 = vld [vmem:[%s7123_s17 + $0x798] sm:$0xff]  ;;  %v5416_v14 = vpack.c.bf16 %v3692_v11, %v3691_v10  ;;  %v3677_v53 = vld [vmem:[%s7123_s17 + $0x640] sm:$0xff] }
0x1239   : > { %3945 = vmatmul.mubr.f32.vlgmr.msra.gmra.mrb[32].mxu1 %v3465_v47  ;;  %4015 = vmatmul.mubr.f32.vlgmr.msra.gmra.mrb[38].mxu0 %v3467_v48  ;;  %v5360_v47 = vpack.c.bf16 %v3632_v43, %v3631_v39  ;;  %v3615_v48 = vld [vmem:[%s7123_s17 + $0x450] sm:$0xff]  ;;  %v3459_v2 = vadd.f32 %v6643_v9, %v2873_v33  ;;  %v5438_v39 = vpack.c.bf16 %v3702_v54, %v3701_v52  ;;  %v3672_v9 = vld [vmem:[%s7123_s17 + $0x618] sm:$0xff]  ;;  %v3694_v22 = vld [vmem:[%s7123_s17 + $0x6c8] sm:$0xff]  ;;  %v3473_v11 = vmax.f32 %v6636_v6, 0.0 }
0x123a   : > { %5343 = vmatpush3.bf16.msra.mxu1 %v5342_v46  ;;  %4084 = vmatprep.mubr.f32.mxu1 %v3470_v61  ;;  %v5390_v46 = vpack.c.bf16 %v3646_v38, %v3645_v41  ;;  %v3633_v61 = vld [vmem:[%s7123_s17 + $0x4e0] sm:$0xff]  ;;  %v3469_v38 = vmax.f32 %v6578_v27, 0.0  ;;  %v3671_v43 = vld [vmem:[%s7123_s17 + $0x610] sm:$0xff]  ;;  %v3704_v27 = vld [vmem:[%s7123_s17 + $0x718] sm:$0xff]  ;;  %v5420_v31 = vpack.c.bf16 %v3694_v22, %v3693_v21 }
0x123b   : > { %5375 = vmatpush3.bf16.msra.mxu0 %v5374_v4  ;;  %4154 = vmatprep.mubr.f32.mxu0 %v3472_v5  ;;  %v3616_v4 = vld [vmem:[%s7123_s17 + $0x458] sm:$0xff]  ;;  %v5410_v51 = vpack.c.bf16 %v3672_v9, %v3671_v43 }
0x123c   : > { %5345 = vmatprep.subr.bf16.mxu1 %v5344_v62  ;;  %5377 = vmatprep.subr.bf16.mxu0 %v5376_v63  ;;  %v3634_v62 = vld [vmem:[%s7123_s17 + $0x4e8] sm:$0xff]  ;;  %v3665_v63 = vld [vmem:[%s7123_s17 + $0x5e0] sm:$0xff]  ;;  %v5362_v1 = vpack.c.bf16 %v3616_v4, %v3615_v48  ;;  %v3474_v48 = vmax.f32 %v3388_v17, 0.0  ;;  %v3679_v17 = vld [vmem:[%s7123_s17 + $0x650] sm:$0xff] }
0x123d   : > { %v5364_v5 = vpack.c.bf16 %v3634_v62, %v3633_v61  ;;  %v5442_v61 = vpack.c.bf16 %v3704_v27, %v3703_v44  ;;  %v3713_v27 = vld [vmem:[%s7123_s17 + $0x760] sm:$0xff] }
0x123e   : > { %5347 = vmatpush3.bf16.msra.mxu1 %v5346_v56  ;;  %v3649_v56 = vld [vmem:[%s7123_s17 + $0x560] sm:$0xff] }
0x123f   : > { %5379 = vmatpush3.bf16.msra.mxu0 %v5378_v55  ;;  %5349 = vmatprep.subr.bf16.mxu1 %v5348_v12  ;;  %v5396_v55 = vpack.c.bf16 %v3666_v0, %v3665_v63  ;;  %v3650_v12 = vld [vmem:[%s7123_s17 + $0x568] sm:$0xff]  ;;  %v3673_v63 = vld [vmem:[%s7123_s17 + $0x620] sm:$0xff] }
0x1240   : > { %5381 = vmatprep.subr.bf16.mxu0 %v5380_v57  ;;  %v3668_v57 = vld [vmem:[%s7123_s17 + $0x5f8] sm:$0xff]  ;;  %v5398_v59 = vpack.c.bf16 %v3650_v12, %v3649_v56  ;;  %v3674_v0 = vld [vmem:[%s7123_s17 + $0x628] sm:$0xff]  ;;  %v3723_v56 = vld [vmem:[%s7123_s17 + $0x7b0] sm:$0xff] }
0x1241   : > { %v5414_v12 = vpack.c.bf16 %v3674_v0, %v3673_v63  ;;  %v3684_v63 = vld [vmem:[%s7123_s17 + $0x678] sm:$0xff] }
0x1242   : > { %5351 = vmatpush3.bf16.msra.mxu1 %v5350_v23  ;;  %v3651_v23 = vld [vmem:[%s7123_s17 + $0x570] sm:$0xff] }
0x1243   : > { %5383 = vmatpush3.bf16.msra.mxu0 %v5382_v24  ;;  %5353 = vmatprep.subr.bf16.mxu1 %v5352_v25  ;;  %v5400_v24 = vpack.c.bf16 %v3668_v57, %v3667_v15  ;;  %v3652_v25 = vld [vmem:[%s7123_s17 + $0x578] sm:$0xff]  ;;  %v3675_v15 = vld [vmem:[%s7123_s17 + $0x630] sm:$0xff] }
0x1244   : > { %5385 = vmatprep.subr.bf16.mxu0 %v5384_v58  ;;  %v3717_v58 = vld [vmem:[%s7123_s17 + $0x780] sm:$0xff]  ;;  %v5402_v35 = vpack.c.bf16 %v3652_v25, %v3651_v23  ;;  %v3676_v57 = vld [vmem:[%s7123_s17 + $0x638] sm:$0xff] }
0x1245   : > { %v3725_v23 = vld [vmem:[%s7123_s17 + $0x7c0] sm:$0xff]  ;;  %v5418_v25 = vpack.c.bf16 %v3676_v57, %v3675_v15 }
0x1246   : > { %5355 = vmatpush3.bf16.msra.mxu1 %v5354_v36  ;;  %v3670_v36 = vld [vmem:[%s7123_s17 + $0x608] sm:$0xff] }
0x1247   : > { %5387 = vmatpush3.bf16.msra.mxu0 %v5386_v60  ;;  %5357 = vmatprep.subr.bf16.mxu1 %v5356_v37  ;;  %v5436_v60 = vpack.c.bf16 %v3718_v32, %v3717_v58  ;;  %v3687_v37 = vld [vmem:[%s7123_s17 + $0x690] sm:$0xff]  ;;  %v5406_v41 = vpack.c.bf16 %v3670_v36, %v3669_v16  ;;  %v3678_v58 = vld [vmem:[%s7123_s17 + $0x648] sm:$0xff]  ;;  %v3709_v32 = vld [vmem:[%s7123_s17 + $0x740] sm:$0xff] }
0x1248   : > { %5389 = vmatprep.subr.bf16.mxu0 %v5388_v42  ;;  %v3719_v42 = vld [vmem:[%s7123_s17 + $0x790] sm:$0xff]  ;;  %v3728_v36 = vld [vmem:[%s7123_s17 + $0x7d8] sm:$0xff] }
0x1249   : > { %v5440_v4 = vpack.c.bf16 %v3720_v8, %v3719_v42  ;;  %v3727_v16 = vld [vmem:[%s7123_s17 + $0x7d0] sm:$0xff]  ;;  %v3697_v42 = vld [vmem:[%s7123_s17 + $0x6e0] sm:$0xff]  ;;  %v3698_v8 = vld [vmem:[%s7123_s17 + $0x6e8] sm:$0xff] }
0x124a   : > { %5359 = vmatpush3.bf16.msra.mxu1 %v5358_v45  ;;  %v5408_v45 = vpack.c.bf16 %v3688_v40, %v3687_v37  ;;  %v3680_v37 = vld [vmem:[%s7123_s17 + $0x658] sm:$0xff]  ;;  %v3711_v40 = vld [vmem:[%s7123_s17 + $0x750] sm:$0xff]  ;;  %v5428_v44 = vpack.c.bf16 %v3698_v8, %v3697_v42 }
0x124b   : > { %5391 = vmatpush3.bf16.msra.mxu0 %v5390_v46  ;;  %5361 = vmatprep.subr.bf16.mxu1 %v5360_v47  ;;  %v3689_v46 = vld [vmem:[%s7123_s17 + $0x6a0] sm:$0xff]  ;;  %v3690_v47 = vld [vmem:[%s7123_s17 + $0x6a8] sm:$0xff]  ;;  %v5426_v43 = vpack.c.bf16 %v3680_v37, %v3679_v17 }
0x124c   : > { %5393 = vmatprep.subr.bf16.mxu0 %v5392_v50  ;;  %v3476_v50 = vmax.f32 %v3459_v2, 0.0  ;;  %v5412_v62 = vpack.c.bf16 %v3690_v47, %v3689_v46  ;;  %v5456_v2 = vpack.c.bf16 %v3728_v36, %v3727_v16  ;;  %v3714_v47 = vld [vmem:[%s7123_s17 + $0x768] sm:$0xff] }
0x124e   : > { %5363 = vmatpush3.bf16.msra.mxu1 %v5362_v1  ;;  %v3705_v1 = vld [vmem:[%s7123_s17 + $0x720] sm:$0xff] }
0x124f   : > { %5395 = vmatpush3.bf16.msra.mxu0 %v5394_v3  ;;  %5365 = vmatprep.subr.bf16.mxu1 %v5364_v5  ;;  %v5444_v3 = vpack.c.bf16 %v3722_v49, %v3721_v28  ;;  %v3706_v5 = vld [vmem:[%s7123_s17 + $0x728] sm:$0xff]  ;;  %v3731_v28 = vld [vmem:[%s7123_s17 + $0x7f0] sm:$0xff]  ;;  %v3732_v49 = vld [vmem:[%s7123_s17 + $0x7f8] sm:$0xff] }
0x1250   : > { %5397 = vmatprep.subr.bf16.mxu0 %v5396_v55  ;;  %v3724_v55 = vld [vmem:[%s7123_s17 + $0x7b8] sm:$0xff]  ;;  %v5446_v13 = vpack.c.bf16 %v3706_v5, %v3705_v1  ;;  %v5464_v0 = vpack.c.bf16 %v3732_v49, %v3731_v28  ;;  %v3715_v1 = vld [vmem:[%s7123_s17 + $0x770] sm:$0xff] }
0x1252   : > { %5367 = vmatpush3.bf16.msra.mxu1 %v5366_v18  ;;  %v3707_v18 = vld [vmem:[%s7123_s17 + $0x730] sm:$0xff] }
0x1253   : > { %5399 = vmatpush3.bf16.msra.mxu0 %v5398_v59  ;;  %5369 = vmatprep.subr.bf16.mxu1 %v5368_v19  ;;  %v5448_v59 = vpack.c.bf16 %v3724_v55, %v3723_v56  ;;  %v3708_v19 = vld [vmem:[%s7123_s17 + $0x738] sm:$0xff]  ;;  %v3475_v56 = vmax.f32 %v6639_v7, 0.0 }
0x1254   : > { %5401 = vmatprep.subr.bf16.mxu0 %v5400_v24  ;;  %v3726_v24 = vld [vmem:[%s7123_s17 + $0x7c8] sm:$0xff]  ;;  %v5450_v30 = vpack.c.bf16 %v3708_v19, %v3707_v18 }
0x1255   : > { %v5452_v33 = vpack.c.bf16 %v3726_v24, %v3725_v23 }
0x1256   : > { %5371 = vmatpush3.bf16.msra.mxu1 %v5370_v34  ;;  %v3710_v34 = vld [vmem:[%s7123_s17 + $0x748] sm:$0xff] }
0x1257   : > { %5403 = vmatpush3.bf16.msra.mxu0 %v5402_v35  ;;  %5405 = vmatprep.subr.bf16.mxu1 %v5404_v26  ;;  %v3695_v35 = vld [vmem:[%s7123_s17 + $0x6d0] sm:$0xff]  ;;  %v3696_v26 = vld [vmem:[%s7123_s17 + $0x6d8] sm:$0xff]  ;;  %v5454_v52 = vpack.c.bf16 %v3710_v34, %v3709_v32 }
0x1258   : > { %5437 = vmatprep.subr.bf16.mxu0 %v5436_v60  ;;  %v5422_v60 = vpack.c.bf16 %v3678_v58, %v3677_v53  ;;  %v5424_v54 = vpack.c.bf16 %v3696_v26, %v3695_v35 }
0x1259   : > { %4085 = vmatmul.mubr.f32.vlgmr.msra.gmra.mrb[34].mxu1 %v3469_v38  ;;  %v3729_v38 = vld [vmem:[%s7123_s17 + $0x7e0] sm:$0xff] }
0x125a   : > { %4155 = vmatmul.mubr.f32.vlgmr.msra.gmra.mrb[40].mxu0 %v3471_v29  ;;  %5407 = vmatpush3.bf16.msra.mxu1 %v5406_v41  ;;  %v3712_v41 = vld [vmem:[%s7123_s17 + $0x758] sm:$0xff]  ;;  %v3681_v29 = vld [vmem:[%s7123_s17 + $0x660] sm:$0xff] }
0x125b   : > { %4224 = vmatprep.mubr.f32.mxu1 %v3474_v48  ;;  %5439 = vmatpush3.bf16.msra.mxu0 %v5438_v39  ;;  %v3730_v39 = vld [vmem:[%s7123_s17 + $0x7e8] sm:$0xff]  ;;  %v5458_v9 = vpack.c.bf16 %v3712_v41, %v3711_v40  ;;  %v3699_v48 = vld [vmem:[%s7123_s17 + $0x6f0] sm:$0xff] }
0x125c   : > { %4294 = vmatprep.mubr.f32.mxu0 %v3476_v50  ;;  %5409 = vmatprep.subr.bf16.mxu1 %v5408_v45  ;;  %v3682_v45 = vld [vmem:[%s7123_s17 + $0x668] sm:$0xff]  ;;  %v5460_v46 = vpack.c.bf16 %v3730_v39, %v3729_v38 }
0x125d   : > { %5441 = vmatprep.subr.bf16.mxu0 %v5440_v4  ;;  %v3700_v4 = vld [vmem:[%s7123_s17 + $0x6f8] sm:$0xff]  ;;  %v5430_v50 = vpack.c.bf16 %v3682_v45, %v3681_v29 }
0x125e   : > { %5411 = vmatpush3.bf16.msra.mxu1 %v5410_v51  ;;  %v5462_v51 = vpack.c.bf16 %v3714_v47, %v3713_v27 }
0x125f   : > { %5443 = vmatpush3.bf16.msra.mxu0 %v5442_v61  ;;  %5413 = vmatprep.subr.bf16.mxu1 %v5412_v62  ;;  %v5432_v61 = vpack.c.bf16 %v3700_v4, %v3699_v48  ;;  %v3683_v62 = vld [vmem:[%s7123_s17 + $0x670] sm:$0xff] }
0x1260   : > { %5445 = vmatprep.subr.bf16.mxu0 %v5444_v3  ;;  %v3716_v3 = vld [vmem:[%s7123_s17 + $0x778] sm:$0xff]  ;;  %v5434_v5 = vpack.c.bf16 %v3684_v63, %v3683_v62 }
0x1261   : > { %v5466_v10 = vpack.c.bf16 %v3716_v3, %v3715_v1 }
0x1262   : > { %5415 = vmatpush3.bf16.msra.mxu1 %v5414_v12 }
0x1263   : > { %5447 = vmatpush3.bf16.msra.mxu0 %v5446_v13  ;;  %5417 = vmatprep.subr.bf16.mxu1 %v5416_v14  ;;  %v4502_v13 = vld [vmem:[%s7124_s18] ss:$0 sm:$0xff] }
0x1264   : > { %5449 = vmatprep.subr.bf16.mxu0 %v5448_v59 }
0x1266   : > { %5419 = vmatpush3.bf16.msra.mxu1 %v5418_v25 }
0x1267   : > { %5451 = vmatpush3.bf16.msra.mxu0 %v5450_v30  ;;  %5421 = vmatprep.subr.bf16.mxu1 %v5420_v31 }
0x1268   : > { %5453 = vmatprep.subr.bf16.mxu0 %v5452_v33 }
0x126a   : > { %5423 = vmatpush3.bf16.msra.mxu1 %v5422_v60 }
0x126b   : > { %5455 = vmatpush3.bf16.msra.mxu0 %v5454_v52  ;;  %5425 = vmatprep.subr.bf16.mxu1 %v5424_v54 }
0x126c   : > { %5457 = vmatprep.subr.bf16.mxu0 %v5456_v2 }
0x126e   : > { %5427 = vmatpush3.bf16.msra.mxu1 %v5426_v43 }
0x126f   : > { %5459 = vmatpush3.bf16.msra.mxu0 %v5458_v9  ;;  %5429 = vmatprep.subr.bf16.mxu1 %v5428_v44 }
0x1270   : > { %5461 = vmatprep.subr.bf16.mxu0 %v5460_v46  ;;  %v4504_v46 = vld [vmem:[%s7126_s20] ss:$0 sm:$0xff] }
0x1272   : > { %5431 = vmatpush3.bf16.msra.mxu1 %v5430_v50 }
0x1273   : > { %5463 = vmatpush3.bf16.msra.mxu0 %v5462_v51  ;;  %5433 = vmatprep.subr.bf16.mxu1 %v5432_v61 }
0x1274   : > { %5465 = vmatprep.subr.bf16.mxu0 %v5464_v0 }
0x1276   : > { %5435 = vmatpush3.bf16.msra.mxu1 %v5434_v5 }
0x1277   : > { %5467 = vmatpush3.bf16.msra.mxu0 %v5466_v10 }
0x1279   : > { %4225 = vmatmul.mubr.f32.vlgmr.msra.gmra.mrb[36].mxu1 %v3473_v11 }
0x127a   : > { %4295 = vmatmul.mubr.f32.vlgmr.msra.gmra.mrb[42].mxu0 %v3475_v56 }
0x12ec   : > { %v4626_v55 = vpop.f32.mrb[30].mxu1  ;;  %v4661_v12 = vpop.f32.mrb[36].mxu0 }
0x12ed   : > { %v4627_v14 = vpop.f32.mrb[31].mxu1  ;;  %v4662_v15 = vpop.f32.mrb[37].mxu0 }
0x12ee   : > { %v4628_v57 = vadd.f32 %v4627_v14, %v4626_v55  ;;  %v4663_v18 = vadd.f32 %v4662_v15, %v4661_v12 }
0x12f0   : > { %v3807_v59 = vadd.f32 %v4628_v57, %v4502_v13 }
0x12f2   : > { %v3877_v19 = vadd.f32 %v4663_v18, %v3807_v59 }
0x130c   : > { %v4696_v21 = vpop.f32.mrb[32].mxu1  ;;  %v4731_v22 = vpop.f32.mrb[38].mxu0 }
0x130d   : > { %v4697_v6 = vpop.f32.mrb[33].mxu1  ;;  %v4732_v23 = vpop.f32.mrb[39].mxu0 }
0x130e   : > { %v4698_v24 = vadd.f32 %v4697_v6, %v4696_v21  ;;  %v4733_v7 = vadd.f32 %v4732_v23, %v4731_v22 }
0x1310   : > { %v3947_v25 = vadd.f32 %v4698_v24, %v3877_v19 }
0x1312   : > { %v4017_v30 = vadd.f32 %v4733_v7, %v3947_v25 }
0x132c   : > { %v4766_v31 = vpop.f32.mrb[34].mxu1 }
0x132d   : > { %v4801_v53 = vpop.f32.mrb[40].mxu0  ;;  %v4767_v58 = vpop.f32.mrb[35].mxu1 }
0x132e   : > { %v4768_v32 = vadd.f32 %v4767_v58, %v4766_v31  ;;  %v4802_v33 = vpop.f32.mrb[41].mxu0 }
0x132f   : > { %v4803_v34 = vadd.f32 %v4802_v33, %v4801_v53 }
0x1330   : > { %v4087_v35 = vadd.f32 %v4768_v32, %v4017_v30 }
0x1332   : > { %v4157_v26 = vadd.f32 %v4803_v34, %v4087_v35 }
0x134c   : > { %v4836_v16 = vpop.f32.mrb[36].mxu1 }
0x134d   : > { %v4871_v36 = vpop.f32.mrb[42].mxu0  ;;  %v4837_v60 = vpop.f32.mrb[37].mxu1 }
0x134e   : > { %v4838_v52 = vadd.f32 %v4837_v60, %v4836_v16  ;;  %v4872_v54 = vpop.f32.mrb[43].mxu0 }
0x134f   : > { %v4873_v17 = vadd.f32 %v4872_v54, %v4871_v36 }
0x1350   : > { %v4227_v37 = vadd.f32 %v4838_v52, %v4157_v26 }
0x1352   : > { %v4297_v40 = vadd.f32 %v4873_v17, %v4227_v37 }
0x1354   : > { %v4300_v2 = vadd.f32 %v4297_v40, %v6094_v20  ;;  %v4503_v20 = vld [vmem:[%s7125_s19] ss:$0 sm:$0xff] }
0x1356   : > { %v4303_v41 = vsel %vm764_vm2, %v4300_v2, 0.0 }
0x1357   : > { %4304 = vadd.xlane.f32.xlu0 %v4303_v41 }
0x13e4   : > { %v4305_v42 = vpop.xlane.xlu0 %4304 }
0x13e5   : > { %v4306_v8 = vmul.f32 0.03125, %v4305_v42 }
0x13e7   : > { %v4307_v38 = vsub.f32 %v4300_v2, %v4306_v8 }
0x13e9   : > { %v4308_v39 = vmul.f32 %v4307_v38, %v4307_v38 }
0x13eb   : > { %v4309_v43 = vsel %vm764_vm2, %v4308_v39, 0.0 }
0x13ec   : > { %4310 = vadd.xlane.f32.xlu1 %v4309_v43 }
0x1479   : > { %v4311_v9 = vpop.xlane.xlu1 %4310 }
0x147a   : > { %v4312_v44 = vmul.f32 0.03125, %v4311_v9 }
0x147c   : > { %v4313_v29 = vadd.f32 1e-05, %v4312_v44 }
0x147e   : > { %5497 = vrsqrt.f32 %v4313_v29 }
0x1488   : > { %v5498_v45 = vpop.eup %5497 }
0x1489   : > { %v4315_v27 = vmul.f32 %v5498_v45, %v4307_v38 }
0x148b   : > { %v4322_v47 = vmul.f32 %v4503_v20, %v4315_v27 }
0x148d   : > { %v4329_v48 = vadd.f32 %v4504_v46, %v4322_v47 }
0x148f   : > { %4330 = vst.msk [vmem:[%s665_s1] sm:$0xff] %vm764_vm2, %v4329_v48 }
0x1490 PF: > { %s31_s2 = sadd.s32 1, %s5505_s2  }
0x1491   : > { %p28_p4 = scmp.ge.s32.totalorder %s31_s2, 4  }
0x1493   :  { %30 = sbr.rel (!%p28_p4) target bundleno = 7 (0x7), region = 158 }

</bundles_post_ra>
